<compile_context>
chip_gen: v7x
topology: tpu7x:2x2x1
jax: 0.10.0
libtpu: 0.0.40
codegen_flags: <defaults>
</compile_context>

<pallas_src>
import functools

import numpy as np

import jax
import jax.numpy as jnp
from jax import lax
from jax.experimental import pallas as pl
from jax.experimental.pallas import tpu as pltpu

LANES = 128   # minimum lane width; all channel dims are zero-padded into it
WIN = 49      # 7x7 combined (conv1 o conv2) window offsets per conv2 position
POS = 49      # 7x7 conv2 output positions
TAPS = 9      # 3x3 conv2 taps

_TAP_IJ = [(ti, tj) for ti in range(3) for tj in range(3)]
_POS_IJ = [(pi, pj) for pi in range(7) for pj in range(7)]


def _round_up(n, m):
    return (n + m - 1) // m * m


def _full_spec(shape):
    """Whole-array block, constant index -> fetched once, resident across grid."""
    nd = len(shape)
    return pl.BlockSpec(shape, lambda i: (0,) * nd)


# -----------------------------------------------------------------------------
# Fused encoder kernel (one grid step = one batch block of `bb` rows).
#   p1_ref : (1, 49*bb, 128)  window pixels (lanes 0..48) + per-tap bias
#                             indicators (lanes 49..57); rows = (pos, batch)
#   w1_ref : (128, NA_PAD)    conv1 weights scattered over window lanes + bias rows
#   w2_ref : (NA_PAD, 128)    conv2 weights, rows = (tap, cin) concatenated
#   w3_ref : (49*128, 128)    conv3 weights, rows = (pos, cin-padded-128)
#   wfc_ref: (128, 128)       fc weight (in, out)
#   o_ref  : (1, bb, 128)     rows 0..B-1 / lanes 0..L-1 are the real output
#   a3_ref : (bb, 49*128)     VMEM scratch: conv2 output relaid out batch-major
# -----------------------------------------------------------------------------
def _encoder_kernel(p1_ref, w1_ref, w2_ref, b2_ref, w3_ref, b3_ref,
                    wfc_ref, bfc_ref, o_ref, a3_ref, *, bb):
    # conv1 for all 9 conv2 taps at once (bias via indicator lanes) -> ReLU.
    a1 = jnp.maximum(
        jnp.dot(p1_ref[0], w1_ref[...], preferred_element_type=jnp.float32),
        0.0).astype(jnp.bfloat16)                       # (49*bb, 9h padded)

    # conv2: single matmul over the concatenated (tap, cin) contraction -> ReLU.
    a2 = jnp.maximum(
        jnp.dot(a1, w2_ref[...], preferred_element_type=jnp.float32)
        + b2_ref[...], 0.0)                             # (49*bb, 128), rows (pos, b)

    # Relayout (pos, batch) rows into batch rows x (pos-major, 128-lane) groups:
    # 49 whole-(bb,128) vreg copies, no lane shuffles.
    for p in range(POS):
        a3_ref[:, p * LANES:(p + 1) * LANES] = a2[p * bb:(p + 1) * bb, :]

    # conv3 (7x7 "valid" -> 1x1): one K = 49*128 matmul -> ReLU.
    a3 = jnp.maximum(
        jnp.dot(a3_ref[...].astype(jnp.bfloat16), w3_ref[...],
                preferred_element_type=jnp.float32) + b3_ref[...],
        0.0).astype(jnp.bfloat16)                       # (bb, 128)

    # fc (no ReLU).
    o_ref[0] = (jnp.dot(a3, wfc_ref[...], preferred_element_type=jnp.float32)
                + bfc_ref[...]).astype(o_ref.dtype)


# -----------------------------------------------------------------------------
# Per-forward XLA glue: window tensor in the kernel's exact row/lane layout.
# Combined pixel index: input[4*pi + 2*ti + ki - 3, 4*pj + 2*tj + kj - 3];
# a single (3,0) zero pad makes every out-of-range read (conv1's own padding
# AND conv2's padding of the conv1 activation) come out as exactly 0.
# -----------------------------------------------------------------------------
def _build_patches(x_nchw, nb, bb, ind_const):
    B = x_nchw.shape[0]
    bp = nb * bb
    xp = jnp.pad(x_nchw[:, 0], ((0, bp - B), (3, 0), (3, 0)))          # (bp,31,31)
    xr = jnp.stack([xp[:, o:o + 25:4, :] for o in range(7)], axis=1)   # (bp,7or,7pi,31)
    win = jnp.stack([xr[..., o:o + 25:4] for o in range(7)], axis=2)   # (bp,7or,7oc,7pi,7pj)
    # win[b, or, oc, pi, pj] = xp[b, 4*pi + or, 4*pj + oc]
    win = jnp.transpose(win, (3, 4, 0, 1, 2)).reshape(POS, bp, WIN)    # (p, b, w)
    extra = jnp.broadcast_to(ind_const[:, None, :], (POS, bp, LANES - WIN))
    p1 = jnp.concatenate([win, extra], axis=-1)                        # (p, b, 128)
    p1 = p1.reshape(POS, nb, bb, LANES).transpose(1, 0, 2, 3)
    return p1.reshape(nb, POS * bb, LANES).astype(jnp.bfloat16)


def encoder_forward(x_nchw, kparams, latent_dim):
    """x: (B, 1, 28, 28) float32 -> (B, latent_dim)."""
    B = x_nchw.shape[0]
    bb = min(_round_up(B, 8), 32)        # batch rows per grid step (multiple of 8)
    nb = -(-B // bb)                     # grid steps over batch blocks
    p1 = _build_patches(x_nchw, nb, bb, kparams["ind"])

    grid_spec = pltpu.PrefetchScalarGridSpec(
        num_scalar_prefetch=0,
        grid=(nb,),
        in_specs=[
            pl.BlockSpec((1, POS * bb, LANES), lambda i: (i, 0, 0)),
            _full_spec(kparams["w1"].shape),
            _full_spec(kparams["w2"].shape),
            _full_spec(kparams["b2"].shape),
            _full_spec(kparams["w3"].shape),
            _full_spec(kparams["b3"].shape),
            _full_spec(kparams["wfc"].shape),
            _full_spec(kparams["bfc"].shape),
        ],
        out_specs=pl.BlockSpec((1, bb, LANES), lambda i: (i, 0, 0)),
        scratch_shapes=[pltpu.VMEM((bb, POS * LANES), jnp.float32)],
    )
    out = pl.pallas_call(
        functools.partial(_encoder_kernel, bb=bb),
        out_shape=jax.ShapeDtypeStruct((nb, bb, LANES), jnp.float32),
        grid_spec=grid_spec,
        compiler_params=pltpu.CompilerParams(
            dimension_semantics=("parallel",),
            vmem_limit_bytes=32 << 20),
    )(p1, kparams["w1"], kparams["w2"], kparams["b2"],
      kparams["w3"], kparams["b3"], kparams["wfc"], kparams["bfc"])
    return out.reshape(nb * bb, LANES)[:B, :latent_dim]


encoder_forward_jit = jax.jit(encoder_forward, static_argnames=("latent_dim",))


# -----------------------------------------------------------------------------
# Parameters: PyTorch layout at init, repacked ONCE into the kernel layout.
# -----------------------------------------------------------------------------
def init_params(latent_dim=32, seed=0):
    key = jax.random.PRNGKey(seed)
    ks = jax.random.split(key, 8)
    h, L, d2 = latent_dim // 2, latent_dim, latent_dim * 2

    def init(k, shape, fan_in):
        return jax.random.normal(k, shape, jnp.float32) / jnp.sqrt(fan_in)

    return {
        "w1": init(ks[0], (h, 1, 3, 3), 9),       "b1": init(ks[1], (h,), 9),
        "w2": init(ks[2], (L, h, 3, 3), h * 9),   "b2": init(ks[3], (L,), h * 9),
        "w3": init(ks[4], (d2, L, 7, 7), L * 49), "b3": init(ks[5], (d2,), L * 49),
        "w_fc": init(ks[6], (L, d2), d2),         "b_fc": init(ks[7], (L,), d2),
    }


def prepare_params(params, latent_dim):
    h, L, d2 = latent_dim // 2, latent_dim, latent_dim * 2
    assert latent_dim % 2 == 0 and d2 <= LANES, "this packing assumes 2*latent_dim <= 128"
    na_pad = _round_up(TAPS * h, LANES)

    w1c = np.asarray(params["w1"], np.float32)     # (h, 1, 3, 3)
    b1c = np.asarray(params["b1"], np.float32)
    w2c = np.asarray(params["w2"], np.float32)     # (L, h, 3, 3)
    b2c = np.asarray(params["b2"], np.float32)
    w3c = np.asarray(params["w3"], np.float32)     # (d2, L, 7, 7)
    b3c = np.asarray(params["b3"], np.float32)
    wfc = np.asarray(params["w_fc"], np.float32)   # (L, d2)
    bfc = np.asarray(params["b_fc"], np.float32)

    # conv1: rows = window index (0..48) + bias-indicator rows (49..57).
    w1 = np.zeros((LANES, na_pad), np.float32)
    for t, (ti, tj) in enumerate(_TAP_IJ):
        for ki in range(3):
            for kj in range(3):
                w = (2 * ti + ki) * 7 + (2 * tj + kj)
                w1[w, t * h:(t + 1) * h] = w1c[:, 0, ki, kj]
        w1[WIN + t, t * h:(t + 1) * h] = b1c

    # conv2: rows = (tap, cin) concatenated.
    w2 = np.zeros((na_pad, LANES), np.float32)
    for t, (ti, tj) in enumerate(_TAP_IJ):
        w2[t * h:(t + 1) * h, :L] = w2c[:, :, ti, tj].T
    b2 = np.zeros((1, LANES), np.float32); b2[0, :L] = b2c

    # conv3: rows = (position, cin padded to 128).
    w3 = np.zeros((POS * LANES, LANES), np.float32)
    for p, (pi, pj) in enumerate(_POS_IJ):
        w3[p * LANES:p * LANES + L, :d2] = w3c[:, :, pi, pj].T
    b3 = np.zeros((1, LANES), np.float32); b3[0, :d2] = b3c

    # fc.
    wf = np.zeros((LANES, LANES), np.float32); wf[:d2, :L] = wfc.T
    bf = np.zeros((1, LANES), np.float32); bf[0, :L] = bfc

    # Per-(position, tap) validity of conv2's input (0 where conv2 reads its
    # own zero padding) -> extra p1 lanes (49..57), the rest of the pad is 0.
    ind = np.zeros((POS, LANES - WIN), np.float32)
    for p, (pi, pj) in enumerate(_POS_IJ):
        for t, (ti, tj) in enumerate(_TAP_IJ):
            if 2 * pi + ti >= 1 and 2 * pj + tj >= 1:
                ind[p, t] = 1.0

    return {
        "w1": jnp.asarray(w1, jnp.bfloat16),
        "w2": jnp.asarray(w2, jnp.bfloat16),
        "b2": jnp.asarray(b2),
        "w3": jnp.asarray(w3, jnp.bfloat16),
        "b3": jnp.asarray(b3),
        "wfc": jnp.asarray(wf, jnp.bfloat16),
        "bfc": jnp.asarray(bf),
        "ind": jnp.asarray(ind),
    }


# -----------------------------------------------------------------------------
# Pure-JAX f32 reference (mirrors the PyTorch module) for a numerical self-check.
# -----------------------------------------------------------------------------
def reference_forward(x, params):
    dn = ("NCHW", "OIHW", "NCHW")
    hp = lax.Precision.HIGHEST

    def conv(y, w, b, stride, pad):
        y = lax.conv_general_dilated(y, w, (stride, stride),
                                     ((pad, pad), (pad, pad)),
                                     dimension_numbers=dn, precision=hp)
        return jax.nn.relu(y + b.reshape(1, -1, 1, 1))

    y = conv(x, params["w1"], params["b1"], 2, 1)
    y = conv(y, params["w2"], params["b2"], 2, 1)
    y = conv(y, params["w3"], params["b3"], 1, 0)
    y = y.reshape(y.shape[0], -1)
    return jnp.dot(y, params["w_fc"].T, precision=hp) + params["b_fc"]


if __name__ == "__main__":
    latent_dim = 32
    params = init_params(latent_dim=latent_dim, seed=0)
    kparams = prepare_params(params, latent_dim)

    # MNIST-like input (the conv stack requires 28x28): batch=2, 1 channel.
    x = jax.random.normal(jax.random.PRNGKey(0), (2, 1, 28, 28), jnp.float32)

    out = encoder_forward_jit(x, kparams, latent_dim=latent_dim)
    out = jax.block_until_ready(out)
    assert out.shape == (2, latent_dim), out.shape

    ref = reference_forward(x, params)
    err = float(jnp.max(jnp.abs(out - ref)))
    if err > 5e-2:   # bf16 MXU operands, f32 accumulation
        raise AssertionError(f"mismatch vs reference: max abs err = {err}")

    print("KERNEL_OK")
</pallas_src>

<mosaic_0001>
module attributes {stable_mosaic.version = 11 : i64} {
  func.func @_encoder_kernel(%arg0: i32, %arg1: memref<1x392x128xbf16, #tpu.memory_space<vmem>>, %arg2: memref<128x256xbf16, #tpu.memory_space<vmem>>, %arg3: memref<256x128xbf16, #tpu.memory_space<vmem>>, %arg4: memref<1x128xf32, #tpu.memory_space<vmem>>, %arg5: memref<6272x128xbf16, #tpu.memory_space<vmem>>, %arg6: memref<1x128xf32, #tpu.memory_space<vmem>>, %arg7: memref<128x128xbf16, #tpu.memory_space<vmem>>, %arg8: memref<1x128xf32, #tpu.memory_space<vmem>>, %arg9: memref<1x8x128xf32, #tpu.memory_space<vmem>>, %arg10: memref<8x6272xf32, #tpu.memory_space<vmem>>) attributes {dimension_semantics = [#tpu.dimension_semantics<parallel>], iteration_bounds = array<i64: 1>, scalar_prefetch = 0 : i64, scratch_operands = 1 : i64, tpu.core_type = #tpu.core_type<tc>, window_params = [{transform_indices = @transform_0, window_bounds = array<i64: 1, 392, 128>}, {pipeline_mode = #tpu.pipeline_mode<synchronous>, transform_indices = @transform_1, window_bounds = array<i64: 128, 256>}, {pipeline_mode = #tpu.pipeline_mode<synchronous>, transform_indices = @transform_2, window_bounds = array<i64: 256, 128>}, {pipeline_mode = #tpu.pipeline_mode<synchronous>, transform_indices = @transform_3, window_bounds = array<i64: 1, 128>}, {pipeline_mode = #tpu.pipeline_mode<synchronous>, transform_indices = @transform_4, window_bounds = array<i64: 6272, 128>}, {pipeline_mode = #tpu.pipeline_mode<synchronous>, transform_indices = @transform_5, window_bounds = array<i64: 1, 128>}, {pipeline_mode = #tpu.pipeline_mode<synchronous>, transform_indices = @transform_6, window_bounds = array<i64: 128, 128>}, {pipeline_mode = #tpu.pipeline_mode<synchronous>, transform_indices = @transform_7, window_bounds = array<i64: 1, 128>}, {transform_indices = @transform_8, window_bounds = array<i64: 1, 8, 128>}]} {
    %c0 = arith.constant 0 : index
    %c0_0 = arith.constant 0 : index
    %c0_1 = arith.constant 0 : index
    %0 = vector.load %arg1[%c0, %c0_0, %c0_1] : memref<1x392x128xbf16, #tpu.memory_space<vmem>>, vector<1x392x128xbf16>
    %1 = vector.shape_cast %0 : vector<1x392x128xbf16> to vector<392x128xbf16>
    %c0_2 = arith.constant 0 : index
    %c0_3 = arith.constant 0 : index
    %2 = vector.load %arg2[%c0_2, %c0_3] : memref<128x256xbf16, #tpu.memory_space<vmem>>, vector<128x256xbf16>
    %cst = arith.constant dense<0.000000e+00> : vector<392x256xf32>
    %3 = tpu.matmul %1, %2, %cst {dimension_numbers = #tpu.dot_dimension_numbers<[1], [0], [0], [1], [0, 0, 1, 1], [], []>} : vector<392x128xbf16>, vector<128x256xbf16>, vector<392x256xf32> -> vector<392x256xf32>
    %cst_4 = arith.constant 0.000000e+00 : f32
    %4 = vector.broadcast %cst_4 : f32 to vector<392x256xf32>
    %5 = arith.maximumf %3, %4 : vector<392x256xf32>
    %6 = arith.truncf %5 : vector<392x256xf32> to vector<392x256xbf16>
    %c0_5 = arith.constant 0 : index
    %c0_6 = arith.constant 0 : index
    %7 = vector.load %arg3[%c0_5, %c0_6] : memref<256x128xbf16, #tpu.memory_space<vmem>>, vector<256x128xbf16>
    %cst_7 = arith.constant dense<0.000000e+00> : vector<392x128xf32>
    %8 = tpu.matmul %6, %7, %cst_7 {dimension_numbers = #tpu.dot_dimension_numbers<[1], [0], [0], [1], [0, 0, 1, 1], [], []>} : vector<392x256xbf16>, vector<256x128xbf16>, vector<392x128xf32> -> vector<392x128xf32>
    %c0_8 = arith.constant 0 : index
    %c0_9 = arith.constant 0 : index
    %9 = vector.load %arg4[%c0_8, %c0_9] : memref<1x128xf32, #tpu.memory_space<vmem>>, vector<1x128xf32>
    %10 = vector.broadcast %9 : vector<1x128xf32> to vector<392x128xf32>
    %11 = arith.addf %8, %10 : vector<392x128xf32>
    %cst_10 = arith.constant 0.000000e+00 : f32
    %12 = vector.broadcast %cst_10 : f32 to vector<392x128xf32>
    %13 = arith.maximumf %11, %12 : vector<392x128xf32>
    %14 = vector.extract_strided_slice %13 {offsets = [0, 0], sizes = [8, 128], strides = [1, 1]} : vector<392x128xf32> to vector<8x128xf32>
    %c0_11 = arith.constant 0 : index
    %c0_12 = arith.constant 0 : index
    %15 = vector.load %arg10[%c0_11, %c0_12] : memref<8x6272xf32, #tpu.memory_space<vmem>>, vector<8x128xf32>
    tpu.vector_store %arg10[%c0_11, %c0_12], %14 {strides = array<i32>} : memref<8x6272xf32, #tpu.memory_space<vmem>>, vector<8x128xf32>,
    %16 = vector.extract_strided_slice %13 {offsets = [8, 0], sizes = [8, 128], strides = [1, 1]} : vector<392x128xf32> to vector<8x128xf32>
    %c0_13 = arith.constant 0 : index
    %c128 = arith.constant 128 : index
    %17 = vector.load %arg10[%c0_13, %c128] : memref<8x6272xf32, #tpu.memory_space<vmem>>, vector<8x128xf32>
    tpu.vector_store %arg10[%c0_13, %c128], %16 {strides = array<i32>} : memref<8x6272xf32, #tpu.memory_space<vmem>>, vector<8x128xf32>,
    %18 = vector.extract_strided_slice %13 {offsets = [16, 0], sizes = [8, 128], strides = [1, 1]} : vector<392x128xf32> to vector<8x128xf32>
    %c0_14 = arith.constant 0 : index
    %c256 = arith.constant 256 : index
    %19 = vector.load %arg10[%c0_14, %c256] : memref<8x6272xf32, #tpu.memory_space<vmem>>, vector<8x128xf32>
    tpu.vector_store %arg10[%c0_14, %c256], %18 {strides = array<i32>} : memref<8x6272xf32, #tpu.memory_space<vmem>>, vector<8x128xf32>,
    %20 = vector.extract_strided_slice %13 {offsets = [24, 0], sizes = [8, 128], strides = [1, 1]} : vector<392x128xf32> to vector<8x128xf32>
    %c0_15 = arith.constant 0 : index
    %c384 = arith.constant 384 : index
    %21 = vector.load %arg10[%c0_15, %c384] : memref<8x6272xf32, #tpu.memory_space<vmem>>, vector<8x128xf32>
    tpu.vector_store %arg10[%c0_15, %c384], %20 {strides = array<i32>} : memref<8x6272xf32, #tpu.memory_space<vmem>>, vector<8x128xf32>,
    %22 = vector.extract_strided_slice %13 {offsets = [32, 0], sizes = [8, 128], strides = [1, 1]} : vector<392x128xf32> to vector<8x128xf32>
    %c0_16 = arith.constant 0 : index
    %c512 = arith.constant 512 : index
    %23 = vector.load %arg10[%c0_16, %c512] : memref<8x6272xf32, #tpu.memory_space<vmem>>, vector<8x128xf32>
    tpu.vector_store %arg10[%c0_16, %c512], %22 {strides = array<i32>} : memref<8x6272xf32, #tpu.memory_space<vmem>>, vector<8x128xf32>,
    %24 = vector.extract_strided_slice %13 {offsets = [40, 0], sizes = [8, 128], strides = [1, 1]} : vector<392x128xf32> to vector<8x128xf32>
    %c0_17 = arith.constant 0 : index
    %c640 = arith.constant 640 : index
    %25 = vector.load %arg10[%c0_17, %c640] : memref<8x6272xf32, #tpu.memory_space<vmem>>, vector<8x128xf32>
    tpu.vector_store %arg10[%c0_17, %c640], %24 {strides = array<i32>} : memref<8x6272xf32, #tpu.memory_space<vmem>>, vector<8x128xf32>,
    %26 = vector.extract_strided_slice %13 {offsets = [48, 0], sizes = [8, 128], strides = [1, 1]} : vector<392x128xf32> to vector<8x128xf32>
    %c0_18 = arith.constant 0 : index
    %c768 = arith.constant 768 : index
    %27 = vector.load %arg10[%c0_18, %c768] : memref<8x6272xf32, #tpu.memory_space<vmem>>, vector<8x128xf32>
    tpu.vector_store %arg10[%c0_18, %c768], %26 {strides = array<i32>} : memref<8x6272xf32, #tpu.memory_space<vmem>>, vector<8x128xf32>,
    %28 = vector.extract_strided_slice %13 {offsets = [56, 0], sizes = [8, 128], strides = [1, 1]} : vector<392x128xf32> to vector<8x128xf32>
    %c0_19 = arith.constant 0 : index
    %c896 = arith.constant 896 : index
    %29 = vector.load %arg10[%c0_19, %c896] : memref<8x6272xf32, #tpu.memory_space<vmem>>, vector<8x128xf32>
    tpu.vector_store %arg10[%c0_19, %c896], %28 {strides = array<i32>} : memref<8x6272xf32, #tpu.memory_space<vmem>>, vector<8x128xf32>,
    %30 = vector.extract_strided_slice %13 {offsets = [64, 0], sizes = [8, 128], strides = [1, 1]} : vector<392x128xf32> to vector<8x128xf32>
    %c0_20 = arith.constant 0 : index
    %c1024 = arith.constant 1024 : index
    %31 = vector.load %arg10[%c0_20, %c1024] : memref<8x6272xf32, #tpu.memory_space<vmem>>, vector<8x128xf32>
    tpu.vector_store %arg10[%c0_20, %c1024], %30 {strides = array<i32>} : memref<8x6272xf32, #tpu.memory_space<vmem>>, vector<8x128xf32>,
    %32 = vector.extract_strided_slice %13 {offsets = [72, 0], sizes = [8, 128], strides = [1, 1]} : vector<392x128xf32> to vector<8x128xf32>
    %c0_21 = arith.constant 0 : index
    %c1152 = arith.constant 1152 : index
    %33 = vector.load %arg10[%c0_21, %c1152] : memref<8x6272xf32, #tpu.memory_space<vmem>>, vector<8x128xf32>
    tpu.vector_store %arg10[%c0_21, %c1152], %32 {strides = array<i32>} : memref<8x6272xf32, #tpu.memory_space<vmem>>, vector<8x128xf32>,
    %34 = vector.extract_strided_slice %13 {offsets = [80, 0], sizes = [8, 128], strides = [1, 1]} : vector<392x128xf32> to vector<8x128xf32>
    %c0_22 = arith.constant 0 : index
    %c1280 = arith.constant 1280 : index
    %35 = vector.load %arg10[%c0_22, %c1280] : memref<8x6272xf32, #tpu.memory_space<vmem>>, vector<8x128xf32>
    tpu.vector_store %arg10[%c0_22, %c1280], %34 {strides = array<i32>} : memref<8x6272xf32, #tpu.memory_space<vmem>>, vector<8x128xf32>,
    %36 = vector.extract_strided_slice %13 {offsets = [88, 0], sizes = [8, 128], strides = [1, 1]} : vector<392x128xf32> to vector<8x128xf32>
    %c0_23 = arith.constant 0 : index
    %c1408 = arith.constant 1408 : index
    %37 = vector.load %arg10[%c0_23, %c1408] : memref<8x6272xf32, #tpu.memory_space<vmem>>, vector<8x128xf32>
    tpu.vector_store %arg10[%c0_23, %c1408], %36 {strides = array<i32>} : memref<8x6272xf32, #tpu.memory_space<vmem>>, vector<8x128xf32>,
    %38 = vector.extract_strided_slice %13 {offsets = [96, 0], sizes = [8, 128], strides = [1, 1]} : vector<392x128xf32> to vector<8x128xf32>
    %c0_24 = arith.constant 0 : index
    %c1536 = arith.constant 1536 : index
    %39 = vector.load %arg10[%c0_24, %c1536] : memref<8x6272xf32, #tpu.memory_space<vmem>>, vector<8x128xf32>
    tpu.vector_store %arg10[%c0_24, %c1536], %38 {strides = array<i32>} : memref<8x6272xf32, #tpu.memory_space<vmem>>, vector<8x128xf32>,
    %40 = vector.extract_strided_slice %13 {offsets = [104, 0], sizes = [8, 128], strides = [1, 1]} : vector<392x128xf32> to vector<8x128xf32>
    %c0_25 = arith.constant 0 : index
    %c1664 = arith.constant 1664 : index
    %41 = vector.load %arg10[%c0_25, %c1664] : memref<8x6272xf32, #tpu.memory_space<vmem>>, vector<8x128xf32>
    tpu.vector_store %arg10[%c0_25, %c1664], %40 {strides = array<i32>} : memref<8x6272xf32, #tpu.memory_space<vmem>>, vector<8x128xf32>,
    %42 = vector.extract_strided_slice %13 {offsets = [112, 0], sizes = [8, 128], strides = [1, 1]} : vector<392x128xf32> to vector<8x128xf32>
    %c0_26 = arith.constant 0 : index
    %c1792 = arith.constant 1792 : index
    %43 = vector.load %arg10[%c0_26, %c1792] : memref<8x6272xf32, #tpu.memory_space<vmem>>, vector<8x128xf32>
    tpu.vector_store %arg10[%c0_26, %c1792], %42 {strides = array<i32>} : memref<8x6272xf32, #tpu.memory_space<vmem>>, vector<8x128xf32>,
    %44 = vector.extract_strided_slice %13 {offsets = [120, 0], sizes = [8, 128], strides = [1, 1]} : vector<392x128xf32> to vector<8x128xf32>
    %c0_27 = arith.constant 0 : index
    %c1920 = arith.constant 1920 : index
    %45 = vector.load %arg10[%c0_27, %c1920] : memref<8x6272xf32, #tpu.memory_space<vmem>>, vector<8x128xf32>
    tpu.vector_store %arg10[%c0_27, %c1920], %44 {strides = array<i32>} : memref<8x6272xf32, #tpu.memory_space<vmem>>, vector<8x128xf32>,
    %46 = vector.extract_strided_slice %13 {offsets = [128, 0], sizes = [8, 128], strides = [1, 1]} : vector<392x128xf32> to vector<8x128xf32>
    %c0_28 = arith.constant 0 : index
    %c2048 = arith.constant 2048 : index
    %47 = vector.load %arg10[%c0_28, %c2048] : memref<8x6272xf32, #tpu.memory_space<vmem>>, vector<8x128xf32>
    tpu.vector_store %arg10[%c0_28, %c2048], %46 {strides = array<i32>} : memref<8x6272xf32, #tpu.memory_space<vmem>>, vector<8x128xf32>,
    %48 = vector.extract_strided_slice %13 {offsets = [136, 0], sizes = [8, 128], strides = [1, 1]} : vector<392x128xf32> to vector<8x128xf32>
    %c0_29 = arith.constant 0 : index
    %c2176 = arith.constant 2176 : index
    %49 = vector.load %arg10[%c0_29, %c2176] : memref<8x6272xf32, #tpu.memory_space<vmem>>, vector<8x128xf32>
    tpu.vector_store %arg10[%c0_29, %c2176], %48 {strides = array<i32>} : memref<8x6272xf32, #tpu.memory_space<vmem>>, vector<8x128xf32>,
    %50 = vector.extract_strided_slice %13 {offsets = [144, 0], sizes = [8, 128], strides = [1, 1]} : vector<392x128xf32> to vector<8x128xf32>
    %c0_30 = arith.constant 0 : index
    %c2304 = arith.constant 2304 : index
    %51 = vector.load %arg10[%c0_30, %c2304] : memref<8x6272xf32, #tpu.memory_space<vmem>>, vector<8x128xf32>
    tpu.vector_store %arg10[%c0_30, %c2304], %50 {strides = array<i32>} : memref<8x6272xf32, #tpu.memory_space<vmem>>, vector<8x128xf32>,
    %52 = vector.extract_strided_slice %13 {offsets = [152, 0], sizes = [8, 128], strides = [1, 1]} : vector<392x128xf32> to vector<8x128xf32>
    %c0_31 = arith.constant 0 : index
    %c2432 = arith.constant 2432 : index
    %53 = vector.load %arg10[%c0_31, %c2432] : memref<8x6272xf32, #tpu.memory_space<vmem>>, vector<8x128xf32>
    tpu.vector_store %arg10[%c0_31, %c2432], %52 {strides = array<i32>} : memref<8x6272xf32, #tpu.memory_space<vmem>>, vector<8x128xf32>,
    %54 = vector.extract_strided_slice %13 {offsets = [160, 0], sizes = [8, 128], strides = [1, 1]} : vector<392x128xf32> to vector<8x128xf32>
    %c0_32 = arith.constant 0 : index
    %c2560 = arith.constant 2560 : index
    %55 = vector.load %arg10[%c0_32, %c2560] : memref<8x6272xf32, #tpu.memory_space<vmem>>, vector<8x128xf32>
    tpu.vector_store %arg10[%c0_32, %c2560], %54 {strides = array<i32>} : memref<8x6272xf32, #tpu.memory_space<vmem>>, vector<8x128xf32>,
    %56 = vector.extract_strided_slice %13 {offsets = [168, 0], sizes = [8, 128], strides = [1, 1]} : vector<392x128xf32> to vector<8x128xf32>
    %c0_33 = arith.constant 0 : index
    %c2688 = arith.constant 2688 : index
    %57 = vector.load %arg10[%c0_33, %c2688] : memref<8x6272xf32, #tpu.memory_space<vmem>>, vector<8x128xf32>
    tpu.vector_store %arg10[%c0_33, %c2688], %56 {strides = array<i32>} : memref<8x6272xf32, #tpu.memory_space<vmem>>, vector<8x128xf32>,
    %58 = vector.extract_strided_slice %13 {offsets = [176, 0], sizes = [8, 128], strides = [1, 1]} : vector<392x128xf32> to vector<8x128xf32>
    %c0_34 = arith.constant 0 : index
    %c2816 = arith.constant 2816 : index
    %59 = vector.load %arg10[%c0_34, %c2816] : memref<8x6272xf32, #tpu.memory_space<vmem>>, vector<8x128xf32>
    tpu.vector_store %arg10[%c0_34, %c2816], %58 {strides = array<i32>} : memref<8x6272xf32, #tpu.memory_space<vmem>>, vector<8x128xf32>,
    %60 = vector.extract_strided_slice %13 {offsets = [184, 0], sizes = [8, 128], strides = [1, 1]} : vector<392x128xf32> to vector<8x128xf32>
    %c0_35 = arith.constant 0 : index
    %c2944 = arith.constant 2944 : index
    %61 = vector.load %arg10[%c0_35, %c2944] : memref<8x6272xf32, #tpu.memory_space<vmem>>, vector<8x128xf32>
    tpu.vector_store %arg10[%c0_35, %c2944], %60 {strides = array<i32>} : memref<8x6272xf32, #tpu.memory_space<vmem>>, vector<8x128xf32>,
    %62 = vector.extract_strided_slice %13 {offsets = [192, 0], sizes = [8, 128], strides = [1, 1]} : vector<392x128xf32> to vector<8x128xf32>
    %c0_36 = arith.constant 0 : index
    %c3072 = arith.constant 3072 : index
    %63 = vector.load %arg10[%c0_36, %c3072] : memref<8x6272xf32, #tpu.memory_space<vmem>>, vector<8x128xf32>
    tpu.vector_store %arg10[%c0_36, %c3072], %62 {strides = array<i32>} : memref<8x6272xf32, #tpu.memory_space<vmem>>, vector<8x128xf32>,
    %64 = vector.extract_strided_slice %13 {offsets = [200, 0], sizes = [8, 128], strides = [1, 1]} : vector<392x128xf32> to vector<8x128xf32>
    %c0_37 = arith.constant 0 : index
    %c3200 = arith.constant 3200 : index
    %65 = vector.load %arg10[%c0_37, %c3200] : memref<8x6272xf32, #tpu.memory_space<vmem>>, vector<8x128xf32>
    tpu.vector_store %arg10[%c0_37, %c3200], %64 {strides = array<i32>} : memref<8x6272xf32, #tpu.memory_space<vmem>>, vector<8x128xf32>,
    %66 = vector.extract_strided_slice %13 {offsets = [208, 0], sizes = [8, 128], strides = [1, 1]} : vector<392x128xf32> to vector<8x128xf32>
    %c0_38 = arith.constant 0 : index
    %c3328 = arith.constant 3328 : index
    %67 = vector.load %arg10[%c0_38, %c3328] : memref<8x6272xf32, #tpu.memory_space<vmem>>, vector<8x128xf32>
    tpu.vector_store %arg10[%c0_38, %c3328], %66 {strides = array<i32>} : memref<8x6272xf32, #tpu.memory_space<vmem>>, vector<8x128xf32>,
    %68 = vector.extract_strided_slice %13 {offsets = [216, 0], sizes = [8, 128], strides = [1, 1]} : vector<392x128xf32> to vector<8x128xf32>
    %c0_39 = arith.constant 0 : index
    %c3456 = arith.constant 3456 : index
    %69 = vector.load %arg10[%c0_39, %c3456] : memref<8x6272xf32, #tpu.memory_space<vmem>>, vector<8x128xf32>
    tpu.vector_store %arg10[%c0_39, %c3456], %68 {strides = array<i32>} : memref<8x6272xf32, #tpu.memory_space<vmem>>, vector<8x128xf32>,
    %70 = vector.extract_strided_slice %13 {offsets = [224, 0], sizes = [8, 128], strides = [1, 1]} : vector<392x128xf32> to vector<8x128xf32>
    %c0_40 = arith.constant 0 : index
    %c3584 = arith.constant 3584 : index
    %71 = vector.load %arg10[%c0_40, %c3584] : memref<8x6272xf32, #tpu.memory_space<vmem>>, vector<8x128xf32>
    tpu.vector_store %arg10[%c0_40, %c3584], %70 {strides = array<i32>} : memref<8x6272xf32, #tpu.memory_space<vmem>>, vector<8x128xf32>,
    %72 = vector.extract_strided_slice %13 {offsets = [232, 0], sizes = [8, 128], strides = [1, 1]} : vector<392x128xf32> to vector<8x128xf32>
    %c0_41 = arith.constant 0 : index
    %c3712 = arith.constant 3712 : index
    %73 = vector.load %arg10[%c0_41, %c3712] : memref<8x6272xf32, #tpu.memory_space<vmem>>, vector<8x128xf32>
    tpu.vector_store %arg10[%c0_41, %c3712], %72 {strides = array<i32>} : memref<8x6272xf32, #tpu.memory_space<vmem>>, vector<8x128xf32>,
    %74 = vector.extract_strided_slice %13 {offsets = [240, 0], sizes = [8, 128], strides = [1, 1]} : vector<392x128xf32> to vector<8x128xf32>
    %c0_42 = arith.constant 0 : index
    %c3840 = arith.constant 3840 : index
    %75 = vector.load %arg10[%c0_42, %c3840] : memref<8x6272xf32, #tpu.memory_space<vmem>>, vector<8x128xf32>
    tpu.vector_store %arg10[%c0_42, %c3840], %74 {strides = array<i32>} : memref<8x6272xf32, #tpu.memory_space<vmem>>, vector<8x128xf32>,
    %76 = vector.extract_strided_slice %13 {offsets = [248, 0], sizes = [8, 128], strides = [1, 1]} : vector<392x128xf32> to vector<8x128xf32>
    %c0_43 = arith.constant 0 : index
    %c3968 = arith.constant 3968 : index
    %77 = vector.load %arg10[%c0_43, %c3968] : memref<8x6272xf32, #tpu.memory_space<vmem>>, vector<8x128xf32>
    tpu.vector_store %arg10[%c0_43, %c3968], %76 {strides = array<i32>} : memref<8x6272xf32, #tpu.memory_space<vmem>>, vector<8x128xf32>,
    %78 = vector.extract_strided_slice %13 {offsets = [256, 0], sizes = [8, 128], strides = [1, 1]} : vector<392x128xf32> to vector<8x128xf32>
    %c0_44 = arith.constant 0 : index
    %c4096 = arith.constant 4096 : index
    %79 = vector.load %arg10[%c0_44, %c4096] : memref<8x6272xf32, #tpu.memory_space<vmem>>, vector<8x128xf32>
    tpu.vector_store %arg10[%c0_44, %c4096], %78 {strides = array<i32>} : memref<8x6272xf32, #tpu.memory_space<vmem>>, vector<8x128xf32>,
    %80 = vector.extract_strided_slice %13 {offsets = [264, 0], sizes = [8, 128], strides = [1, 1]} : vector<392x128xf32> to vector<8x128xf32>
    %c0_45 = arith.constant 0 : index
    %c4224 = arith.constant 4224 : index
    %81 = vector.load %arg10[%c0_45, %c4224] : memref<8x6272xf32, #tpu.memory_space<vmem>>, vector<8x128xf32>
    tpu.vector_store %arg10[%c0_45, %c4224], %80 {strides = array<i32>} : memref<8x6272xf32, #tpu.memory_space<vmem>>, vector<8x128xf32>,
    %82 = vector.extract_strided_slice %13 {offsets = [272, 0], sizes = [8, 128], strides = [1, 1]} : vector<392x128xf32> to vector<8x128xf32>
    %c0_46 = arith.constant 0 : index
    %c4352 = arith.constant 4352 : index
    %83 = vector.load %arg10[%c0_46, %c4352] : memref<8x6272xf32, #tpu.memory_space<vmem>>, vector<8x128xf32>
    tpu.vector_store %arg10[%c0_46, %c4352], %82 {strides = array<i32>} : memref<8x6272xf32, #tpu.memory_space<vmem>>, vector<8x128xf32>,
    %84 = vector.extract_strided_slice %13 {offsets = [280, 0], sizes = [8, 128], strides = [1, 1]} : vector<392x128xf32> to vector<8x128xf32>
    %c0_47 = arith.constant 0 : index
    %c4480 = arith.constant 4480 : index
    %85 = vector.load %arg10[%c0_47, %c4480] : memref<8x6272xf32, #tpu.memory_space<vmem>>, vector<8x128xf32>
    tpu.vector_store %arg10[%c0_47, %c4480], %84 {strides = array<i32>} : memref<8x6272xf32, #tpu.memory_space<vmem>>, vector<8x128xf32>,
    %86 = vector.extract_strided_slice %13 {offsets = [288, 0], sizes = [8, 128], strides = [1, 1]} : vector<392x128xf32> to vector<8x128xf32>
    %c0_48 = arith.constant 0 : index
    %c4608 = arith.constant 4608 : index
    %87 = vector.load %arg10[%c0_48, %c4608] : memref<8x6272xf32, #tpu.memory_space<vmem>>, vector<8x128xf32>
    tpu.vector_store %arg10[%c0_48, %c4608], %86 {strides = array<i32>} : memref<8x6272xf32, #tpu.memory_space<vmem>>, vector<8x128xf32>,
    %88 = vector.extract_strided_slice %13 {offsets = [296, 0], sizes = [8, 128], strides = [1, 1]} : vector<392x128xf32> to vector<8x128xf32>
    %c0_49 = arith.constant 0 : index
    %c4736 = arith.constant 4736 : index
    %89 = vector.load %arg10[%c0_49, %c4736] : memref<8x6272xf32, #tpu.memory_space<vmem>>, vector<8x128xf32>
    tpu.vector_store %arg10[%c0_49, %c4736], %88 {strides = array<i32>} : memref<8x6272xf32, #tpu.memory_space<vmem>>, vector<8x128xf32>,
    %90 = vector.extract_strided_slice %13 {offsets = [304, 0], sizes = [8, 128], strides = [1, 1]} : vector<392x128xf32> to vector<8x128xf32>
    %c0_50 = arith.constant 0 : index
    %c4864 = arith.constant 4864 : index
    %91 = vector.load %arg10[%c0_50, %c4864] : memref<8x6272xf32, #tpu.memory_space<vmem>>, vector<8x128xf32>
    tpu.vector_store %arg10[%c0_50, %c4864], %90 {strides = array<i32>} : memref<8x6272xf32, #tpu.memory_space<vmem>>, vector<8x128xf32>,
    %92 = vector.extract_strided_slice %13 {offsets = [312, 0], sizes = [8, 128], strides = [1, 1]} : vector<392x128xf32> to vector<8x128xf32>
    %c0_51 = arith.constant 0 : index
    %c4992 = arith.constant 4992 : index
    %93 = vector.load %arg10[%c0_51, %c4992] : memref<8x6272xf32, #tpu.memory_space<vmem>>, vector<8x128xf32>
    tpu.vector_store %arg10[%c0_51, %c4992], %92 {strides = array<i32>} : memref<8x6272xf32, #tpu.memory_space<vmem>>, vector<8x128xf32>,
    %94 = vector.extract_strided_slice %13 {offsets = [320, 0], sizes = [8, 128], strides = [1, 1]} : vector<392x128xf32> to vector<8x128xf32>
    %c0_52 = arith.constant 0 : index
    %c5120 = arith.constant 5120 : index
    %95 = vector.load %arg10[%c0_52, %c5120] : memref<8x6272xf32, #tpu.memory_space<vmem>>, vector<8x128xf32>
    tpu.vector_store %arg10[%c0_52, %c5120], %94 {strides = array<i32>} : memref<8x6272xf32, #tpu.memory_space<vmem>>, vector<8x128xf32>,
    %96 = vector.extract_strided_slice %13 {offsets = [328, 0], sizes = [8, 128], strides = [1, 1]} : vector<392x128xf32> to vector<8x128xf32>
    %c0_53 = arith.constant 0 : index
    %c5248 = arith.constant 5248 : index
    %97 = vector.load %arg10[%c0_53, %c5248] : memref<8x6272xf32, #tpu.memory_space<vmem>>, vector<8x128xf32>
    tpu.vector_store %arg10[%c0_53, %c5248], %96 {strides = array<i32>} : memref<8x6272xf32, #tpu.memory_space<vmem>>, vector<8x128xf32>,
    %98 = vector.extract_strided_slice %13 {offsets = [336, 0], sizes = [8, 128], strides = [1, 1]} : vector<392x128xf32> to vector<8x128xf32>
    %c0_54 = arith.constant 0 : index
    %c5376 = arith.constant 5376 : index
    %99 = vector.load %arg10[%c0_54, %c5376] : memref<8x6272xf32, #tpu.memory_space<vmem>>, vector<8x128xf32>
    tpu.vector_store %arg10[%c0_54, %c5376], %98 {strides = array<i32>} : memref<8x6272xf32, #tpu.memory_space<vmem>>, vector<8x128xf32>,
    %100 = vector.extract_strided_slice %13 {offsets = [344, 0], sizes = [8, 128], strides = [1, 1]} : vector<392x128xf32> to vector<8x128xf32>
    %c0_55 = arith.constant 0 : index
    %c5504 = arith.constant 5504 : index
    %101 = vector.load %arg10[%c0_55, %c5504] : memref<8x6272xf32, #tpu.memory_space<vmem>>, vector<8x128xf32>
    tpu.vector_store %arg10[%c0_55, %c5504], %100 {strides = array<i32>} : memref<8x6272xf32, #tpu.memory_space<vmem>>, vector<8x128xf32>,
    %102 = vector.extract_strided_slice %13 {offsets = [352, 0], sizes = [8, 128], strides = [1, 1]} : vector<392x128xf32> to vector<8x128xf32>
    %c0_56 = arith.constant 0 : index
    %c5632 = arith.constant 5632 : index
    %103 = vector.load %arg10[%c0_56, %c5632] : memref<8x6272xf32, #tpu.memory_space<vmem>>, vector<8x128xf32>
    tpu.vector_store %arg10[%c0_56, %c5632], %102 {strides = array<i32>} : memref<8x6272xf32, #tpu.memory_space<vmem>>, vector<8x128xf32>,
    %104 = vector.extract_strided_slice %13 {offsets = [360, 0], sizes = [8, 128], strides = [1, 1]} : vector<392x128xf32> to vector<8x128xf32>
    %c0_57 = arith.constant 0 : index
    %c5760 = arith.constant 5760 : index
    %105 = vector.load %arg10[%c0_57, %c5760] : memref<8x6272xf32, #tpu.memory_space<vmem>>, vector<8x128xf32>
    tpu.vector_store %arg10[%c0_57, %c5760], %104 {strides = array<i32>} : memref<8x6272xf32, #tpu.memory_space<vmem>>, vector<8x128xf32>,
    %106 = vector.extract_strided_slice %13 {offsets = [368, 0], sizes = [8, 128], strides = [1, 1]} : vector<392x128xf32> to vector<8x128xf32>
    %c0_58 = arith.constant 0 : index
    %c5888 = arith.constant 5888 : index
    %107 = vector.load %arg10[%c0_58, %c5888] : memref<8x6272xf32, #tpu.memory_space<vmem>>, vector<8x128xf32>
    tpu.vector_store %arg10[%c0_58, %c5888], %106 {strides = array<i32>} : memref<8x6272xf32, #tpu.memory_space<vmem>>, vector<8x128xf32>,
    %108 = vector.extract_strided_slice %13 {offsets = [376, 0], sizes = [8, 128], strides = [1, 1]} : vector<392x128xf32> to vector<8x128xf32>
    %c0_59 = arith.constant 0 : index
    %c6016 = arith.constant 6016 : index
    %109 = vector.load %arg10[%c0_59, %c6016] : memref<8x6272xf32, #tpu.memory_space<vmem>>, vector<8x128xf32>
    tpu.vector_store %arg10[%c0_59, %c6016], %108 {strides = array<i32>} : memref<8x6272xf32, #tpu.memory_space<vmem>>, vector<8x128xf32>,
    %110 = vector.extract_strided_slice %13 {offsets = [384, 0], sizes = [8, 128], strides = [1, 1]} : vector<392x128xf32> to vector<8x128xf32>
    %c0_60 = arith.constant 0 : index
    %c6144 = arith.constant 6144 : index
    %111 = vector.load %arg10[%c0_60, %c6144] : memref<8x6272xf32, #tpu.memory_space<vmem>>, vector<8x128xf32>
    tpu.vector_store %arg10[%c0_60, %c6144], %110 {strides = array<i32>} : memref<8x6272xf32, #tpu.memory_space<vmem>>, vector<8x128xf32>,
    %c0_61 = arith.constant 0 : index
    %c0_62 = arith.constant 0 : index
    %112 = vector.load %arg10[%c0_61, %c0_62] : memref<8x6272xf32, #tpu.memory_space<vmem>>, vector<8x6272xf32>
    %113 = arith.truncf %112 : vector<8x6272xf32> to vector<8x6272xbf16>
    %c0_63 = arith.constant 0 : index
    %c0_64 = arith.constant 0 : index
    %114 = vector.load %arg5[%c0_63, %c0_64] : memref<6272x128xbf16, #tpu.memory_space<vmem>>, vector<6272x128xbf16>
    %cst_65 = arith.constant dense<0.000000e+00> : vector<8x128xf32>
    %115 = tpu.matmul %113, %114, %cst_65 {dimension_numbers = #tpu.dot_dimension_numbers<[1], [0], [0], [1], [0, 0, 1, 1], [], []>} : vector<8x6272xbf16>, vector<6272x128xbf16>, vector<8x128xf32> -> vector<8x128xf32>
    %c0_66 = arith.constant 0 : index
    %c0_67 = arith.constant 0 : index
    %116 = vector.load %arg6[%c0_66, %c0_67] : memref<1x128xf32, #tpu.memory_space<vmem>>, vector<1x128xf32>
    %117 = vector.broadcast %116 : vector<1x128xf32> to vector<8x128xf32>
    %118 = arith.addf %115, %117 : vector<8x128xf32>
    %cst_68 = arith.constant 0.000000e+00 : f32
    %119 = vector.broadcast %cst_68 : f32 to vector<8x128xf32>
    %120 = arith.maximumf %118, %119 : vector<8x128xf32>
    %121 = arith.truncf %120 : vector<8x128xf32> to vector<8x128xbf16>
    %c0_69 = arith.constant 0 : index
    %c0_70 = arith.constant 0 : index
    %122 = vector.load %arg7[%c0_69, %c0_70] : memref<128x128xbf16, #tpu.memory_space<vmem>>, vector<128x128xbf16>
    %cst_71 = arith.constant dense<0.000000e+00> : vector<8x128xf32>
    %123 = tpu.matmul %121, %122, %cst_71 {dimension_numbers = #tpu.dot_dimension_numbers<[1], [0], [0], [1], [0, 0, 1, 1], [], []>} : vector<8x128xbf16>, vector<128x128xbf16>, vector<8x128xf32> -> vector<8x128xf32>
    %c0_72 = arith.constant 0 : index
    %c0_73 = arith.constant 0 : index
    %124 = vector.load %arg8[%c0_72, %c0_73] : memref<1x128xf32, #tpu.memory_space<vmem>>, vector<1x128xf32>
    %125 = vector.broadcast %124 : vector<1x128xf32> to vector<8x128xf32>
    %126 = arith.addf %123, %125 : vector<8x128xf32>
    %c0_74 = arith.constant 0 : index
    %c0_75 = arith.constant 0 : index
    %c0_76 = arith.constant 0 : index
    %127 = vector.load %arg9[%c0_74, %c0_75, %c0_76] : memref<1x8x128xf32, #tpu.memory_space<vmem>>, vector<1x8x128xf32>
    %128 = vector.shape_cast %127 : vector<1x8x128xf32> to vector<8x128xf32>
    %129 = vector.shape_cast %126 : vector<8x128xf32> to vector<1x8x128xf32>
    tpu.vector_store %arg9[%c0_74, %c0_75, %c0_76], %129 {strides = array<i32>} : memref<1x8x128xf32, #tpu.memory_space<vmem>>, vector<1x8x128xf32>,
    return
  }
  func.func @transform_0(%arg0: i32) -> (i32, i32, i32) {
    %c0_i32 = arith.constant 0 : i32
    %c0_i32_0 = arith.constant 0 : i32
    %c0_i32_1 = arith.constant 0 : i32
    return %arg0, %c0_i32, %c0_i32_0 : i32, i32, i32
  }
  func.func @transform_1(%arg0: i32) -> (i32, i32) {
    %c0_i32 = arith.constant 0 : i32
    %c0_i32_0 = arith.constant 0 : i32
    %c0_i32_1 = arith.constant 0 : i32
    return %c0_i32, %c0_i32_0 : i32, i32
  }
  func.func @transform_2(%arg0: i32) -> (i32, i32) {
    %c0_i32 = arith.constant 0 : i32
    %c0_i32_0 = arith.constant 0 : i32
    %c0_i32_1 = arith.constant 0 : i32
    return %c0_i32, %c0_i32_0 : i32, i32
  }
  func.func @transform_3(%arg0: i32) -> (i32, i32) {
    %c0_i32 = arith.constant 0 : i32
    %c0_i32_0 = arith.constant 0 : i32
    %c0_i32_1 = arith.constant 0 : i32
    return %c0_i32, %c0_i32_0 : i32, i32
  }
  func.func @transform_4(%arg0: i32) -> (i32, i32) {
    %c0_i32 = arith.constant 0 : i32
    %c0_i32_0 = arith.constant 0 : i32
    %c0_i32_1 = arith.constant 0 : i32
    return %c0_i32, %c0_i32_0 : i32, i32
  }
  func.func @transform_5(%arg0: i32) -> (i32, i32) {
    %c0_i32 = arith.constant 0 : i32
    %c0_i32_0 = arith.constant 0 : i32
    %c0_i32_1 = arith.constant 0 : i32
    return %c0_i32, %c0_i32_0 : i32, i32
  }
  func.func @transform_6(%arg0: i32) -> (i32, i32) {
    %c0_i32 = arith.constant 0 : i32
    %c0_i32_0 = arith.constant 0 : i32
    %c0_i32_1 = arith.constant 0 : i32
    return %c0_i32, %c0_i32_0 : i32, i32
  }
  func.func @transform_7(%arg0: i32) -> (i32, i32) {
    %c0_i32 = arith.constant 0 : i32
    %c0_i32_0 = arith.constant 0 : i32
    %c0_i32_1 = arith.constant 0 : i32
    return %c0_i32, %c0_i32_0 : i32, i32
  }
  func.func @transform_8(%arg0: i32) -> (i32, i32, i32) {
    %c0_i32 = arith.constant 0 : i32
    %c0_i32_0 = arith.constant 0 : i32
    %c0_i32_1 = arith.constant 0 : i32
    return %arg0, %c0_i32, %c0_i32_0 : i32, i32, i32
  }
}

</mosaic_0001>

<bundles_post_ra>
// kernel: encoder_forward.1
= control target key start
LH: loop header
LB: loop body
LE: loop exit
PB: predicated region body
PF: predicated region fallthrough
CT: control target
= control target key end

     0   :  { %v7092_v1 = vmov 0   ;;  %vm7094_vm0 = vmmov 0   ;;  %s8774_s1 = inlined_call_operand.vmem [shape: bf16[128,256], index: 1, kind: input, shape index: {}]   ;;  %s8775_s0 = inlined_call_operand.vmem [shape: bf16[1,392,128], index: 0, kind: input, shape index: {}]   ;;  %s8776_s2 = inlined_call_operand.vmem [shape: bf16[256,128], index: 2, kind: input, shape index: {}]   ;;  %s8777_s4 = inlined_call_operand.vmem [shape: bf16[6272,128], index: 4, kind: input, shape index: {}]   ;;  %s8778_s3 = inlined_call_operand.vmem [shape: f32[1,128], index: 3, kind: input, shape index: {}]   ;;  %s8779_s5 = inlined_call_operand.vmem [shape: f32[1,128], index: 5, kind: input, shape index: {}]   ;;  %s8780_s6 = inlined_call_operand.vmem [shape: bf16[128,128], index: 6, kind: input, shape index: {}]   ;;  %s8781_s7 = inlined_call_operand.vmem [shape: f32[1,128], index: 7, kind: input, shape index: {}]   ;;  %s8782_s8 = inlined_call_operand.vmem [shape: f32[1,8,128], index: 8, kind: output, shape index: {}]  }
   0x1   :  { %v6625_v0 = vld [vmem:[%s8774_s1 + $0x4] ss:$8 sps:$4 sm:$0xff]   ;;  %355 = vmatprep.mubr.bf16.mxu0 %v7092_v1  ;;  %887 = vmatprep.subr.bf16.mxu1 %v7092_v1  ;;  %v6627_v2 = vld [vmem:[%s8774_s1] ss:$8 sps:$4 sm:$0xff]   ;;  %v6628_v3 = vld [vmem:[%s8774_s1 + $0x14] ss:$8 sps:$4 sm:$0xff]  }
   0x2   :  { %323 = vmatprep.subr.bf16.mxu0 %v6625_v0  ;;  %v6630_v4 = vld [vmem:[%s8774_s1 + $0x10] ss:$8 sps:$4 sm:$0xff]   ;;  %v6631_v5 = vld [vmem:[%s8774_s1 + $0x24] ss:$8 sps:$4 sm:$0xff]   ;;  %v6633_v6 = vld [vmem:[%s8774_s1 + $0x20] ss:$8 sps:$4 sm:$0xff]  }
   0x3   :  { %324 = vmatpush1.bf16.msra.mxu0 %v6627_v2  ;;  %v6634_v7 = vld [vmem:[%s8774_s1 + $0x34] ss:$8 sps:$4 sm:$0xff]   ;;  %v6636_v8 = vld [vmem:[%s8774_s1 + $0x30] ss:$8 sps:$4 sm:$0xff]   ;;  %v6637_v9 = vld [vmem:[%s8774_s1 + $0x44] ss:$8 sps:$4 sm:$0xff]  }
   0x4   :  { %325 = vmatprep.subr.bf16.mxu0 %v6628_v3  ;;  %v6639_v10 = vld [vmem:[%s8774_s1 + $0x40] ss:$8 sps:$4 sm:$0xff]   ;;  %v6640_v11 = vld [vmem:[%s8774_s1 + $0x54] ss:$8 sps:$4 sm:$0xff]   ;;  %v6642_v12 = vld [vmem:[%s8774_s1 + $0x50] ss:$8 sps:$4 sm:$0xff]  }
   0x5   :  { %v6643_v13 = vld [vmem:[%s8774_s1 + $0x64] ss:$8 sps:$4 sm:$0xff]   ;;  %v6645_v14 = vld [vmem:[%s8774_s1 + $0x60] ss:$8 sps:$4 sm:$0xff]   ;;  %v6646_v15 = vld [vmem:[%s8774_s1 + $0x74] ss:$8 sps:$4 sm:$0xff]  }
   0x6   :  { %v6648_v16 = vld [vmem:[%s8774_s1 + $0x70] ss:$8 sps:$4 sm:$0xff]   ;;  %v6665_v17 = vld [vmem:[%s8776_s2] sm:$0xff]   ;;  %v6666_v19 = vld [vmem:[%s8776_s2 + $0x8] sm:$0xff]  }
   0x7   :  { %326 = vmatpush1.bf16.msra.mxu0 %v6630_v4  ;;  %v6649_v18 = vld [vmem:[%s8775_s0] sm:$0xff]   ;;  %888 = vmatpush1.bf16.msra.mxu1 %v6665_v17  ;;  %v6668_v20 = vld [vmem:[%s8776_s2 + $0x10] sm:$0xff]   ;;  %v6669_v21 = vld [vmem:[%s8776_s2 + $0x18] sm:$0xff]  }
   0x8   :  { %327 = vmatprep.subr.bf16.mxu0 %v6631_v5  ;;  %889 = vmatprep.subr.bf16.mxu1 %v7092_v1  ;;  %v6650_v22 = vld [vmem:[%s8775_s0 + $0x8] sm:$0xff]   ;;  %v6671_v23 = vld [vmem:[%s8776_s2 + $0x20] sm:$0xff]   ;;  %v6651_v25 = vld [vmem:[%s8775_s0 + $0x10] sm:$0xff]  }
   0x9   :  { %v6672_v24 = vld [vmem:[%s8776_s2 + $0x28] sm:$0xff]   ;;  %v6674_v26 = vld [vmem:[%s8776_s2 + $0x30] sm:$0xff]   ;;  %v6675_v27 = vld [vmem:[%s8776_s2 + $0x38] sm:$0xff]  }
   0xa   :  { %v6652_v28 = vld [vmem:[%s8775_s0 + $0x18] sm:$0xff]   ;;  %v6677_v29 = vld [vmem:[%s8776_s2 + $0x40] sm:$0xff]   ;;  %v6678_v30 = vld [vmem:[%s8776_s2 + $0x48] sm:$0xff]  }
   0xb   :  { %328 = vmatpush1.bf16.msra.mxu0 %v6633_v6  ;;  %890 = vmatpush1.bf16.msra.mxu1 %v6666_v19  ;;  %v6653_v31 = vld [vmem:[%s8775_s0 + $0x20] sm:$0xff]   ;;  %v6680_v32 = vld [vmem:[%s8776_s2 + $0x50] sm:$0xff]   ;;  %v6681_v33 = vld [vmem:[%s8776_s2 + $0x58] sm:$0xff]  }
   0xc   :  { %329 = vmatprep.subr.bf16.mxu0 %v6634_v7  ;;  %891 = vmatprep.subr.bf16.mxu1 %v7092_v1  ;;  %v6654_v34 = vld [vmem:[%s8775_s0 + $0x28] sm:$0xff]   ;;  %v6683_v35 = vld [vmem:[%s8776_s2 + $0x60] sm:$0xff]   ;;  %v6655_v37 = vld [vmem:[%s8775_s0 + $0x30] sm:$0xff]  }
   0xd   :  { %v6684_v36 = vld [vmem:[%s8776_s2 + $0x68] sm:$0xff]   ;;  %v6656_v38 = vld [vmem:[%s8775_s0 + $0x38] sm:$0xff]   ;;  %v6657_v39 = vld [vmem:[%s8775_s0 + $0x40] sm:$0xff]  }
   0xe   :  { %v6658_v40 = vld [vmem:[%s8775_s0 + $0x48] sm:$0xff]   ;;  %v6659_v41 = vld [vmem:[%s8775_s0 + $0x50] sm:$0xff]   ;;  %v6660_v43 = vld [vmem:[%s8775_s0 + $0x58] sm:$0xff]  }
   0xf   :  { %330 = vmatpush1.bf16.msra.mxu0 %v6636_v8  ;;  %892 = vmatpush1.bf16.msra.mxu1 %v6668_v20  ;;  %v6686_v42 = vld [vmem:[%s8776_s2 + $0x70] sm:$0xff]   ;;  %v6687_v44 = vld [vmem:[%s8776_s2 + $0x78] sm:$0xff]   ;;  %v6661_v45 = vld [vmem:[%s8775_s0 + $0x60] sm:$0xff]  }
  0x10   :  { %331 = vmatprep.subr.bf16.mxu0 %v6637_v9  ;;  %893 = vmatprep.subr.bf16.mxu1 %v7092_v1  ;;  %v6662_v46 = vld [vmem:[%s8775_s0 + $0x68] sm:$0xff]   ;;  %v6663_v47 = vld [vmem:[%s8775_s0 + $0x70] sm:$0xff]   ;;  %v6690_v48 = vld [vmem:[%s8777_s4 + $0x40] sm:$0xff]  }
  0x11   :  { %v6691_v49 = vld [vmem:[%s8777_s4] sm:$0xff]   ;;  %v6664_v50 = vld [vmem:[%s8775_s0 + $0x78] sm:$0xff]   ;;  %v6692_v51 = vld [vmem:[%s8777_s4 + $0x48] sm:$0xff]  }
  0x12   :  { %v6693_v52 = vld [vmem:[%s8777_s4 + $0x8] sm:$0xff]   ;;  %v6667_v53 = vld [vmem:[%s8775_s0 + $0x80] sm:$0xff]   ;;  %v6696_v55 = vld [vmem:[%s8777_s4 + $0x50] sm:$0xff]  }
  0x13   :  { %332 = vmatpush1.bf16.msra.mxu0 %v6639_v10  ;;  %894 = vmatpush1.bf16.msra.mxu1 %v6669_v21  ;;  %v6694_v54 = vld [vmem:[%s8777_s4 + $0x140] sm:$0xff]   ;;  %v6670_v56 = vld [vmem:[%s8775_s0 + $0x88] sm:$0xff]   ;;  %v6697_v57 = vld [vmem:[%s8777_s4 + $0x10] sm:$0xff]  }
  0x14   :  { %333 = vmatprep.subr.bf16.mxu0 %v6640_v11  ;;  %895 = vmatprep.subr.bf16.mxu1 %v7092_v1  ;;  %v6673_v58 = vld [vmem:[%s8775_s0 + $0x90] sm:$0xff]   ;;  %v6676_v59 = vld [vmem:[%s8775_s0 + $0x98] sm:$0xff]   ;;  %v6679_v62 = vld [vmem:[%s8775_s0 + $0xa0] sm:$0xff]  }
  0x15   :  { %v6700_v60 = vld [vmem:[%s8777_s4 + $0x58] sm:$0xff]   ;;  %v6682_v63 = vld [vmem:[%s8775_s0 + $0xa8] sm:$0xff]   ;;  %v6685_v0 = vld [vmem:[%s8775_s0 + $0xb0] sm:$0xff]  }
  0x16   :  { %v6701_v61 = vld [vmem:[%s8777_s4 + $0x18] sm:$0xff]   ;;  %v6704_v2 = vld [vmem:[%s8777_s4 + $0x60] sm:$0xff]   ;;  %v6708_v6 = vld [vmem:[%s8777_s4 + $0x68] sm:$0xff]  }
  0x17   :  { %334 = vmatpush1.bf16.msra.mxu0 %v6642_v12  ;;  %896 = vmatpush1.bf16.msra.mxu1 %v6671_v23  ;;  %v6705_v3 = vld [vmem:[%s8777_s4 + $0x20] sm:$0xff]   ;;  %v6688_v4 = vld [vmem:[%s8775_s0 + $0xb8] sm:$0xff]   ;;  %v6709_v7 = vld [vmem:[%s8777_s4 + $0x28] sm:$0xff]  }
  0x18   :  { %335 = vmatprep.subr.bf16.mxu0 %v6643_v13  ;;  %897 = vmatprep.subr.bf16.mxu1 %v7092_v1  ;;  %v6689_v5 = vld [vmem:[%s8775_s0 + $0xc0] ss:$0 sps:$4 sm:$0xff]   ;;  %v6698_v17 = vld [vmem:[%s8777_s4 + $0x148] sm:$0xff]   ;;  %v6702_v23 = vld [vmem:[%s8777_s4 + $0x150] sm:$0xff]  }
  0x19   :  { %v6699_v20 = vld [vmem:[%s8777_s4 + $0x108] sm:$0xff]  }
  0x1b   :  { %336 = vmatpush1.bf16.msra.mxu0 %v6645_v14  ;;  %898 = vmatpush1.bf16.msra.mxu1 %v6672_v24 }
  0x1c   :  { %337 = vmatprep.subr.bf16.mxu0 %v6646_v15  ;;  %899 = vmatprep.subr.bf16.mxu1 %v7092_v1  ;;  %v6695_v15 = vld [vmem:[%s8777_s4 + $0x100] sm:$0xff]  }
  0x1f   :  { %338 = vmatpush1.bf16.msra.mxu0 %v6648_v16  ;;  %900 = vmatpush1.bf16.msra.mxu1 %v6674_v26 }
  0x20   :  { %901 = vmatprep.subr.bf16.mxu1 %v7092_v1  ;;  %6036 = vmatprep.subr.bf16.mxu0 %v6690_v48 }
  0x22   :  { %356 = vmatmul.mubr.bf16.vlgmr.msra.gmra.mrb[0].mxu0 %v6649_v18 }
  0x23   :  { %365 = vmatprep.mubr.bf16.mxu0 %v7092_v1  ;;  %902 = vmatpush1.bf16.msra.mxu1 %v6675_v27 }
  0x24   :  { %903 = vmatprep.subr.bf16.mxu1 %v7092_v1  ;;  %6037 = vmatpush3.bf16.msra.mxu0 %v6691_v49 }
  0x25   :  { %6038 = vmatprep.subr.bf16.mxu0 %v6692_v51 }
  0x27   :  { %904 = vmatpush1.bf16.msra.mxu1 %v6677_v29  ;;  %v6703_v29 = vld [vmem:[%s8777_s4 + $0x110] sm:$0xff]  }
  0x28   :  { %905 = vmatprep.subr.bf16.mxu1 %v7092_v1  ;;  %6039 = vmatpush3.bf16.msra.mxu0 %v6693_v52 }
  0x29   :  { %6040 = vmatprep.subr.bf16.mxu0 %v6696_v55 }
  0x2a   :  { %366 = vmatmul.mubr.bf16.gmra.mrb[4].mxu0 %v6650_v22 }
  0x2b   :  { %375 = vmatprep.mubr.bf16.mxu0 %v7092_v1  ;;  %906 = vmatpush1.bf16.msra.mxu1 %v6678_v30 }
  0x2c   :  { %907 = vmatprep.subr.bf16.mxu1 %v7092_v1  ;;  %6041 = vmatpush3.bf16.msra.mxu0 %v6697_v57  ;;  %v6714_v57 = vld [vmem:[%s8777_s4 + $0x168] sm:$0xff]  }
  0x2d   :  { %6042 = vmatprep.subr.bf16.mxu0 %v6700_v60 }
  0x2f   :  { %908 = vmatpush1.bf16.msra.mxu1 %v6680_v32 }
  0x30   :  { %909 = vmatprep.subr.bf16.mxu1 %v7092_v1  ;;  %6043 = vmatpush3.bf16.msra.mxu0 %v6701_v61 }
  0x31   :  { %6044 = vmatprep.subr.bf16.mxu0 %v6704_v2 }
  0x32   :  { %376 = vmatmul.mubr.bf16.gmra.mrb[8].mxu0 %v6651_v25 }
  0x33   :  { %385 = vmatprep.mubr.bf16.mxu0 %v7092_v1  ;;  %910 = vmatpush1.bf16.msra.mxu1 %v6681_v33  ;;  %v6712_v33 = vld [vmem:[%s8777_s4 + $0x70] sm:$0xff]  }
  0x34   :  { %911 = vmatprep.subr.bf16.mxu1 %v7092_v1  ;;  %6045 = vmatpush3.bf16.msra.mxu0 %v6705_v3 }
  0x35   :  { %6046 = vmatprep.subr.bf16.mxu0 %v6708_v6 }
  0x37   :  { %912 = vmatpush1.bf16.msra.mxu1 %v6683_v35 }
  0x38   :  { %913 = vmatprep.subr.bf16.mxu1 %v7092_v1  ;;  %6047 = vmatpush3.bf16.msra.mxu0 %v6709_v7  ;;  %v6716_v7 = vld [vmem:[%s8777_s4 + $0x78] sm:$0xff]  }
  0x39   :  { %6048 = vmatprep.subr.bf16.mxu0 %v6712_v33 }
  0x3a   :  { %386 = vmatmul.mubr.bf16.gmra.mrb[12].mxu0 %v6652_v28 }
  0x3b   :  { %395 = vmatprep.mubr.bf16.mxu0 %v7092_v1  ;;  %914 = vmatpush1.bf16.msra.mxu1 %v6684_v36  ;;  %v6707_v36 = vld [vmem:[%s8777_s4 + $0x118] sm:$0xff]  }
  0x3c   :  { %915 = vmatprep.subr.bf16.mxu1 %v7092_v1 }
  0x3f   :  { %916 = vmatpush1.bf16.msra.mxu1 %v6686_v42 }
  0x40   :  { %917 = vmatprep.subr.bf16.mxu1 %v7092_v1 }
  0x42   :  { %396 = vmatmul.mubr.bf16.gmra.mrb[16].mxu0 %v6653_v31  ;;  %v6706_v31 = vld [vmem:[%s8777_s4 + $0x158] sm:$0xff]  }
  0x43   :  { %405 = vmatprep.mubr.bf16.mxu0 %v7092_v1  ;;  %918 = vmatpush1.bf16.msra.mxu1 %v6687_v44 }
  0x44   :  { %6080 = vmatprep.subr.bf16.mxu1 %v6694_v54 }
  0x4a   :  { %406 = vmatmul.mubr.bf16.gmra.mrb[20].mxu0 %v6654_v34  ;;  %v6713_v34 = vld [vmem:[%s8777_s4 + $0x30] sm:$0xff]  }
  0x4b   :  { %415 = vmatprep.mubr.bf16.mxu0 %v7092_v1  ;;  %6049 = vmatpush3.bf16.msra.mxu0 %v6713_v34 }
  0x4c   :  { %6050 = vmatprep.subr.bf16.mxu0 %v6716_v7 }
  0x52   :  { %416 = vmatmul.mubr.bf16.gmra.mrb[24].mxu0 %v6655_v37 }
  0x53   :  { %425 = vmatprep.mubr.bf16.mxu0 %v7092_v1 }
  0x5a   :  { %426 = vmatmul.mubr.bf16.gmra.mrb[28].mxu0 %v6656_v38 }
  0x5b   :  { %435 = vmatprep.mubr.bf16.mxu0 %v7092_v1 }
  0x62   :  { %436 = vmatmul.mubr.bf16.gmra.mrb[32].mxu0 %v6657_v39  ;;  %v6710_v39 = vld [vmem:[%s8777_s4 + $0x160] sm:$0xff]  }
  0x63   :  { %445 = vmatprep.mubr.bf16.mxu0 %v7092_v1 }
  0x6a   :  { %446 = vmatmul.mubr.bf16.gmra.mrb[36].mxu0 %v6658_v40 }
  0x6b   :  { %455 = vmatprep.mubr.bf16.mxu0 %v7092_v1 }
  0x72   :  { %456 = vmatmul.mubr.bf16.gmra.mrb[40].mxu0 %v6659_v41 }
  0x73   :  { %465 = vmatprep.mubr.bf16.mxu0 %v7092_v1 }
  0x7a   :  { %466 = vmatmul.mubr.bf16.gmra.mrb[44].mxu0 %v6660_v43 }
  0x7b   :  { %475 = vmatprep.mubr.bf16.mxu0 %v7092_v1 }
  0x82   :  { %476 = vmatmul.mubr.bf16.gmra.mrb[48].mxu0 %v6661_v45  ;;  %v6711_v45 = vld [vmem:[%s8777_s4 + $0x120] sm:$0xff]  }
  0x83   :  { %485 = vmatprep.mubr.bf16.mxu0 %v7092_v1 }
  0x8a   :  { %486 = vmatmul.mubr.bf16.gmra.mrb[52].mxu0 %v6662_v46 }
  0x8b   :  { %495 = vmatprep.mubr.bf16.mxu0 %v7092_v1 }
  0x92   :  { %496 = vmatmul.mubr.bf16.gmra.mrb[56].mxu0 %v6663_v47 }
  0x93   :  { %505 = vmatprep.mubr.bf16.mxu0 %v7092_v1 }
  0x9a   :  { %506 = vmatmul.mubr.bf16.gmra.mrb[60].mxu0 %v6664_v50 }
  0x9b   :  { %515 = vmatprep.mubr.bf16.mxu0 %v7092_v1 }
  0xa2   :  { %516 = vmatmul.mubr.bf16.gmra.mrb[64].mxu0 %v6667_v53 }
  0xa3   :  { %525 = vmatprep.mubr.bf16.mxu0 %v7092_v1 }
  0xaa   :  { %526 = vmatmul.mubr.bf16.gmra.mrb[68].mxu0 %v6670_v56 }
  0xab   :  { %535 = vmatprep.mubr.bf16.mxu0 %v7092_v1 }
  0xb2   :  { %536 = vmatmul.mubr.bf16.gmra.mrb[72].mxu0 %v6673_v58 }
  0xb3   :  { %545 = vmatprep.mubr.bf16.mxu0 %v7092_v1 }
  0xba   :  { %546 = vmatmul.mubr.bf16.gmra.mrb[76].mxu0 %v6676_v59  ;;  %v6715_v59 = vld [vmem:[%s8777_s4 + $0x128] sm:$0xff]  }
  0xbb   :  { %555 = vmatprep.mubr.bf16.mxu0 %v7092_v1 }
  0xc2   :  { %556 = vmatmul.mubr.bf16.gmra.mrb[80].mxu0 %v6679_v62 }
  0xc3   :  { %565 = vmatprep.mubr.bf16.mxu0 %v7092_v1 }
  0xca   :  { %566 = vmatmul.mubr.bf16.gmra.mrb[84].mxu0 %v6682_v63 }
  0xcb   :  { %575 = vmatprep.mubr.bf16.mxu0 %v7092_v1 }
  0xd2   :  { %576 = vmatmul.mubr.bf16.gmra.mrb[88].mxu0 %v6685_v0 }
  0xd3   :  { %585 = vmatprep.mubr.bf16.mxu0 %v7092_v1 }
  0xda   :  { %586 = vmatmul.mubr.bf16.gmra.mrb[92].mxu0 %v6688_v4 }
  0xdb   :  { %595 = vmatprep.mubr.bf16.mxu0 %v7092_v1 }
  0xe2   :  { %596 = vmatmul.mubr.bf16.gmra.mrb[96].mxu0 %v6689_v5 }
  0xf5   :  { %v357_v8 = vpop.f32.mrb[0].mxu0 }
  0xf6   :  { %v359_v9 = vpop.f32.mrb[1].mxu0  ;;  %v604_v10 = vmax.f32 %v357_v8, 0.0 }
  0xf7   :  { %v361_v11 = vpop.f32.mrb[2].mxu0  ;;  %v605_v13 = vmax.f32 %v359_v9, 0.0 }
  0xf8   :  { %v606_v1 = vmax.f32 %v361_v11, 0.0  ;;  %v363_v12 = vpop.f32.mrb[3].mxu0  ;;  %v6717_v11 = vld [vmem:[%s8777_s4 + $0x38] sm:$0xff]  }
  0xf9   :  { %v607_v14 = vmax.f32 %v363_v12, 0.0  ;;  %6051 = vmatpush3.bf16.msra.mxu0 %v6717_v11 }
  0xfa   :  { %v702_v16 = vpack.c.bf16 %v606_v1, %v604_v10 }
  0xfb   :  { %v703_v18 = vpack.c.bf16 %v607_v14, %v605_v13 }
  0xfd   :  { %v367_v19 = vpop.f32.mrb[4].mxu0  ;;  %919 = vmatprep.mubr.bf16.mxu1 %v703_v18 }
  0xfe   :  { %v608_v21 = vmax.f32 %v367_v19, 0.0  ;;  %v369_v22 = vpop.f32.mrb[5].mxu0  ;;  %920 = vmatmul.mubr.bf16.vlgmr.msra.gmra.mrb[0].mxu1 %v702_v16 }
  0xff   :  { %v609_v24 = vmax.f32 %v369_v22, 0.0  ;;  %v371_v25 = vpop.f32.mrb[6].mxu0  ;;  %6081 = vmatpush3.bf16.msra.mxu1 %v6695_v15 }
 0x100   :  { %v610_v26 = vmax.f32 %v371_v25, 0.0  ;;  %v373_v27 = vpop.f32.mrb[7].mxu0  ;;  %6082 = vmatprep.subr.bf16.mxu1 %v6698_v17 }
 0x101   :  { %v611_v28 = vmax.f32 %v373_v27, 0.0 }
 0x102   :  { %v704_v30 = vpack.c.bf16 %v610_v26, %v608_v21 }
 0x103   :  { %v705_v32 = vpack.c.bf16 %v611_v28, %v609_v24  ;;  %6083 = vmatpush3.bf16.msra.mxu1 %v6699_v20  ;;  %v6718_v28 = vld [vmem:[%s8777_s4 + $0x170] sm:$0xff]  }
 0x104   :  { %6084 = vmatprep.subr.bf16.mxu1 %v6702_v23 }
 0x105   :  { %v377_v35 = vpop.f32.mrb[8].mxu0  ;;  %927 = vmatprep.mubr.bf16.mxu1 %v705_v32 }
 0x106   :  { %v612_v37 = vmax.f32 %v377_v35, 0.0  ;;  %v379_v38 = vpop.f32.mrb[9].mxu0  ;;  %928 = vmatmul.mubr.bf16.gmra.mrb[4].mxu1 %v704_v30 }
 0x107   :  { %v613_v40 = vmax.f32 %v379_v38, 0.0  ;;  %v381_v41 = vpop.f32.mrb[10].mxu0  ;;  %6085 = vmatpush3.bf16.msra.mxu1 %v6703_v29  ;;  %v6719_v29 = vld [vmem:[%s8777_s4 + $0x130] sm:$0xff]  }
 0x108   :  { %v614_v42 = vmax.f32 %v381_v41, 0.0  ;;  %v383_v43 = vpop.f32.mrb[11].mxu0  ;;  %6086 = vmatprep.subr.bf16.mxu1 %v6706_v31 }
 0x109   :  { %v615_v44 = vmax.f32 %v383_v43, 0.0 }
 0x10a   :  { %v706_v46 = vpack.c.bf16 %v614_v42, %v612_v37 }
 0x10b   :  { %v707_v47 = vpack.c.bf16 %v615_v44, %v613_v40  ;;  %6087 = vmatpush3.bf16.msra.mxu1 %v6707_v36 }
 0x10c   :  { %6088 = vmatprep.subr.bf16.mxu1 %v6710_v39 }
 0x10d   :  { %935 = vmatprep.mubr.bf16.mxu1 %v707_v47  ;;  %v387_v48 = vpop.f32.mrb[12].mxu0 }
 0x10e   :  { %936 = vmatmul.mubr.bf16.gmra.mrb[8].mxu1 %v706_v46  ;;  %v616_v49 = vmax.f32 %v387_v48, 0.0  ;;  %v389_v50 = vpop.f32.mrb[13].mxu0 }
 0x10f   :  { %v617_v51 = vmax.f32 %v389_v50, 0.0  ;;  %v391_v52 = vpop.f32.mrb[14].mxu0  ;;  %6089 = vmatpush3.bf16.msra.mxu1 %v6711_v45 }
 0x110   :  { %v618_v53 = vmax.f32 %v391_v52, 0.0  ;;  %v393_v54 = vpop.f32.mrb[15].mxu0  ;;  %6090 = vmatprep.subr.bf16.mxu1 %v6714_v57 }
 0x111   :  { %v619_v55 = vmax.f32 %v393_v54, 0.0 }
 0x112   :  { %v708_v56 = vpack.c.bf16 %v618_v53, %v616_v49 }
 0x113   :  { %v709_v58 = vpack.c.bf16 %v619_v55, %v617_v51  ;;  %6091 = vmatpush3.bf16.msra.mxu1 %v6715_v59 }
 0x114   :  { %6092 = vmatprep.subr.bf16.mxu1 %v6718_v28 }
 0x115   :  { %v397_v60 = vpop.f32.mrb[16].mxu0  ;;  %943 = vmatprep.mubr.bf16.mxu1 %v709_v58 }
 0x116   :  { %v620_v61 = vmax.f32 %v397_v60, 0.0  ;;  %v399_v62 = vpop.f32.mrb[17].mxu0  ;;  %944 = vmatmul.mubr.bf16.gmra.mrb[12].mxu1 %v708_v56 }
 0x117   :  { %v621_v63 = vmax.f32 %v399_v62, 0.0  ;;  %v401_v0 = vpop.f32.mrb[18].mxu0  ;;  %6093 = vmatpush3.bf16.msra.mxu1 %v6719_v29 }
 0x118   :  { %v622_v2 = vmax.f32 %v401_v0, 0.0  ;;  %v403_v3 = vpop.f32.mrb[19].mxu0 }
 0x119   :  { %v623_v4 = vmax.f32 %v403_v3, 0.0 }
 0x11a   :  { %v710_v5 = vpack.c.bf16 %v622_v2, %v620_v61 }
 0x11b   :  { %v711_v6 = vpack.c.bf16 %v623_v4, %v621_v63 }
 0x11d   :  { %951 = vmatprep.mubr.bf16.mxu1 %v711_v6  ;;  %v407_v8 = vpop.f32.mrb[20].mxu0 }
 0x11e   :  { %952 = vmatmul.mubr.bf16.gmra.mrb[16].mxu1 %v710_v5  ;;  %v624_v9 = vmax.f32 %v407_v8, 0.0  ;;  %v409_v10 = vpop.f32.mrb[21].mxu0 }
 0x11f   :  { %v625_v1 = vmax.f32 %v409_v10, 0.0  ;;  %v411_v12 = vpop.f32.mrb[22].mxu0 }
 0x120   :  { %v626_v13 = vmax.f32 %v411_v12, 0.0  ;;  %v413_v14 = vpop.f32.mrb[23].mxu0 }
 0x121   :  { %v627_v15 = vmax.f32 %v413_v14, 0.0 }
 0x122   :  { %v712_v16 = vpack.c.bf16 %v626_v13, %v624_v9 }
 0x123   :  { %v713_v17 = vpack.c.bf16 %v627_v15, %v625_v1 }
 0x125   :  { %v417_v18 = vpop.f32.mrb[24].mxu0  ;;  %959 = vmatprep.mubr.bf16.mxu1 %v713_v17 }
 0x126   :  { %v628_v19 = vmax.f32 %v417_v18, 0.0  ;;  %v419_v20 = vpop.f32.mrb[25].mxu0  ;;  %960 = vmatmul.mubr.bf16.gmra.mrb[20].mxu1 %v712_v16 }
 0x127   :  { %v629_v21 = vmax.f32 %v419_v20, 0.0  ;;  %v421_v22 = vpop.f32.mrb[26].mxu0 }
 0x128   :  { %v630_v23 = vmax.f32 %v421_v22, 0.0  ;;  %v423_v24 = vpop.f32.mrb[27].mxu0 }
 0x129   :  { %v631_v25 = vmax.f32 %v423_v24, 0.0 }
 0x12a   :  { %v714_v26 = vpack.c.bf16 %v630_v23, %v628_v19  ;;  %v6720_v23 = vld [vmem:[%s8777_s4 + $0xc0] sm:$0xff]  }
 0x12b   :  { %v715_v27 = vpack.c.bf16 %v631_v25, %v629_v21  ;;  %6058 = vmatprep.subr.bf16.mxu0 %v6720_v23 }
 0x12d   :  { %967 = vmatprep.mubr.bf16.mxu1 %v715_v27  ;;  %v427_v30 = vpop.f32.mrb[28].mxu0 }
 0x12e   :  { %968 = vmatmul.mubr.bf16.gmra.mrb[24].mxu1 %v714_v26  ;;  %v632_v31 = vmax.f32 %v427_v30, 0.0  ;;  %v429_v32 = vpop.f32.mrb[29].mxu0 }
 0x12f   :  { %v633_v33 = vmax.f32 %v429_v32, 0.0  ;;  %v431_v34 = vpop.f32.mrb[30].mxu0 }
 0x130   :  { %v634_v35 = vmax.f32 %v431_v34, 0.0  ;;  %v433_v36 = vpop.f32.mrb[31].mxu0 }
 0x131   :  { %v635_v37 = vmax.f32 %v433_v36, 0.0 }
 0x132   :  { %v716_v38 = vpack.c.bf16 %v634_v35, %v632_v31 }
 0x133   :  { %v717_v39 = vpack.c.bf16 %v635_v37, %v633_v33 }
 0x135   :  { %v437_v40 = vpop.f32.mrb[32].mxu0  ;;  %975 = vmatprep.mubr.bf16.mxu1 %v717_v39 }
 0x136   :  { %v636_v41 = vmax.f32 %v437_v40, 0.0  ;;  %v439_v42 = vpop.f32.mrb[33].mxu0  ;;  %976 = vmatmul.mubr.bf16.gmra.mrb[28].mxu1 %v716_v38  ;;  %v6727_v38 = vld [vmem:[%s8777_s4 + $0x178] sm:$0xff]  }
 0x137   :  { %v637_v43 = vmax.f32 %v439_v42, 0.0  ;;  %v441_v44 = vpop.f32.mrb[34].mxu0  ;;  %6094 = vmatprep.subr.bf16.mxu1 %v6727_v38 }
 0x138   :  { %v638_v45 = vmax.f32 %v441_v44, 0.0  ;;  %v443_v46 = vpop.f32.mrb[35].mxu0 }
 0x139   :  { %v639_v47 = vmax.f32 %v443_v46, 0.0 }
 0x13a   :  { %v718_v48 = vpack.c.bf16 %v638_v45, %v636_v41  ;;  %v6729_v41 = vld [vmem:[%s8777_s4 + $0x138] sm:$0xff]  }
 0x13b   :  { %v719_v49 = vpack.c.bf16 %v639_v47, %v637_v43  ;;  %6095 = vmatpush3.bf16.msra.mxu1 %v6729_v41  ;;  %v6731_v47 = vld [vmem:[%s8777_s4 + $0x240] sm:$0xff]  }
 0x13c   :  { %6124 = vmatprep.subr.bf16.mxu1 %v6731_v47 }
 0x13d   :  { %v447_v50 = vpop.f32.mrb[36].mxu0  ;;  %983 = vmatprep.mubr.bf16.mxu1 %v719_v49 }
 0x13e   :  { %v640_v51 = vmax.f32 %v447_v50, 0.0  ;;  %v449_v52 = vpop.f32.mrb[37].mxu0  ;;  %984 = vmatmul.mubr.bf16.gmra.mrb[32].mxu1 %v718_v48 }
 0x13f   :  { %v641_v53 = vmax.f32 %v449_v52, 0.0  ;;  %v451_v54 = vpop.f32.mrb[38].mxu0 }
 0x140   :  { %v642_v55 = vmax.f32 %v451_v54, 0.0  ;;  %v453_v56 = vpop.f32.mrb[39].mxu0 }
 0x141   :  { %v643_v57 = vmax.f32 %v453_v56, 0.0 }
 0x142   :  { %v720_v58 = vpack.c.bf16 %v642_v55, %v640_v51 }
 0x143   :  { %v721_v59 = vpack.c.bf16 %v643_v57, %v641_v53 }
 0x145   :  { %v457_v60 = vpop.f32.mrb[40].mxu0  ;;  %991 = vmatprep.mubr.bf16.mxu1 %v721_v59 }
 0x146   :  { %v644_v61 = vmax.f32 %v457_v60, 0.0  ;;  %v459_v62 = vpop.f32.mrb[41].mxu0  ;;  %992 = vmatmul.mubr.bf16.gmra.mrb[36].mxu1 %v720_v58 }
 0x147   :  { %v645_v63 = vmax.f32 %v459_v62, 0.0  ;;  %v461_v0 = vpop.f32.mrb[42].mxu0 }
 0x148   :  { %v646_v2 = vmax.f32 %v461_v0, 0.0  ;;  %v463_v3 = vpop.f32.mrb[43].mxu0 }
 0x149   :  { %v647_v4 = vmax.f32 %v463_v3, 0.0 }
 0x14a   :  { %v722_v5 = vpack.c.bf16 %v646_v2, %v644_v61 }
 0x14b   :  { %v723_v6 = vpack.c.bf16 %v647_v4, %v645_v63 }
 0x14d   :  { %v467_v7 = vpop.f32.mrb[44].mxu0  ;;  %999 = vmatprep.mubr.bf16.mxu1 %v723_v6 }
 0x14e   :  { %v648_v8 = vmax.f32 %v467_v7, 0.0  ;;  %v469_v9 = vpop.f32.mrb[45].mxu0  ;;  %1000 = vmatmul.mubr.bf16.gmra.mrb[40].mxu1 %v722_v5 }
 0x14f   :  { %v649_v10 = vmax.f32 %v469_v9, 0.0  ;;  %v471_v11 = vpop.f32.mrb[46].mxu0 }
 0x150   :  { %v650_v1 = vmax.f32 %v471_v11, 0.0  ;;  %v473_v12 = vpop.f32.mrb[47].mxu0 }
 0x151   :  { %v651_v13 = vmax.f32 %v473_v12, 0.0 }
 0x152   :  { %v724_v14 = vpack.c.bf16 %v650_v1, %v648_v8 }
 0x153   :  { %v725_v15 = vpack.c.bf16 %v651_v13, %v649_v10 }
 0x155   :  { %v477_v16 = vpop.f32.mrb[48].mxu0  ;;  %1007 = vmatprep.mubr.bf16.mxu1 %v725_v15 }
 0x156   :  { %v652_v17 = vmax.f32 %v477_v16, 0.0  ;;  %v479_v18 = vpop.f32.mrb[49].mxu0  ;;  %1008 = vmatmul.mubr.bf16.gmra.mrb[44].mxu1 %v724_v14 }
 0x157   :  { %v653_v19 = vmax.f32 %v479_v18, 0.0  ;;  %v481_v20 = vpop.f32.mrb[50].mxu0 }
 0x158   :  { %v654_v21 = vmax.f32 %v481_v20, 0.0  ;;  %v483_v22 = vpop.f32.mrb[51].mxu0 }
 0x159   :  { %v655_v24 = vmax.f32 %v483_v22, 0.0 }
 0x15a   :  { %v726_v25 = vpack.c.bf16 %v654_v21, %v652_v17 }
 0x15b   :  { %v727_v26 = vpack.c.bf16 %v655_v24, %v653_v19 }
 0x15d   :  { %v487_v27 = vpop.f32.mrb[52].mxu0  ;;  %1015 = vmatprep.mubr.bf16.mxu1 %v727_v26 }
 0x15e   :  { %v656_v28 = vmax.f32 %v487_v27, 0.0  ;;  %v489_v29 = vpop.f32.mrb[53].mxu0  ;;  %1016 = vmatmul.mubr.bf16.gmra.mrb[48].mxu1 %v726_v25 }
 0x15f   :  { %v657_v30 = vmax.f32 %v489_v29, 0.0  ;;  %v491_v31 = vpop.f32.mrb[54].mxu0 }
 0x160   :  { %v658_v32 = vmax.f32 %v491_v31, 0.0  ;;  %v493_v33 = vpop.f32.mrb[55].mxu0 }
 0x161   :  { %v659_v34 = vmax.f32 %v493_v33, 0.0 }
 0x162   :  { %v728_v35 = vpack.c.bf16 %v658_v32, %v656_v28 }
 0x163   :  { %v729_v36 = vpack.c.bf16 %v659_v34, %v657_v30 }
 0x165   :  { %v497_v37 = vpop.f32.mrb[56].mxu0  ;;  %1023 = vmatprep.mubr.bf16.mxu1 %v729_v36 }
 0x166   :  { %v660_v39 = vmax.f32 %v497_v37, 0.0  ;;  %v499_v40 = vpop.f32.mrb[57].mxu0  ;;  %1024 = vmatmul.mubr.bf16.gmra.mrb[52].mxu1 %v728_v35 }
 0x167   :  { %v661_v42 = vmax.f32 %v499_v40, 0.0  ;;  %v501_v43 = vpop.f32.mrb[58].mxu0 }
 0x168   :  { %v662_v44 = vmax.f32 %v501_v43, 0.0  ;;  %v503_v45 = vpop.f32.mrb[59].mxu0 }
 0x169   :  { %v663_v46 = vmax.f32 %v503_v45, 0.0 }
 0x16a   :  { %v730_v48 = vpack.c.bf16 %v662_v44, %v660_v39 }
 0x16b   :  { %v731_v49 = vpack.c.bf16 %v663_v46, %v661_v42 }
 0x16d   :  { %v507_v50 = vpop.f32.mrb[60].mxu0  ;;  %1031 = vmatprep.mubr.bf16.mxu1 %v731_v49 }
 0x16e   :  { %v664_v51 = vmax.f32 %v507_v50, 0.0  ;;  %v509_v52 = vpop.f32.mrb[61].mxu0  ;;  %1032 = vmatmul.mubr.bf16.gmra.mrb[56].mxu1 %v730_v48 }
 0x16f   :  { %v665_v53 = vmax.f32 %v509_v52, 0.0  ;;  %v511_v54 = vpop.f32.mrb[62].mxu0 }
 0x170   :  { %v666_v55 = vmax.f32 %v511_v54, 0.0  ;;  %v513_v56 = vpop.f32.mrb[63].mxu0 }
 0x171   :  { %v667_v57 = vmax.f32 %v513_v56, 0.0 }
 0x172   :  { %v732_v58 = vpack.c.bf16 %v666_v55, %v664_v51 }
 0x173   :  { %v733_v59 = vpack.c.bf16 %v667_v57, %v665_v53 }
 0x175   :  { %v517_v60 = vpop.f32.mrb[64].mxu0  ;;  %1039 = vmatprep.mubr.bf16.mxu1 %v733_v59 }
 0x176   :  { %v668_v61 = vmax.f32 %v517_v60, 0.0  ;;  %v519_v62 = vpop.f32.mrb[65].mxu0  ;;  %1040 = vmatmul.mubr.bf16.gmra.mrb[60].mxu1 %v732_v58 }
 0x177   :  { %v669_v63 = vmax.f32 %v519_v62, 0.0  ;;  %v521_v0 = vpop.f32.mrb[66].mxu0 }
 0x178   :  { %v670_v2 = vmax.f32 %v521_v0, 0.0  ;;  %v523_v3 = vpop.f32.mrb[67].mxu0 }
 0x179   :  { %v671_v4 = vmax.f32 %v523_v3, 0.0 }
 0x17a   :  { %v734_v5 = vpack.c.bf16 %v670_v2, %v668_v61 }
 0x17b   :  { %v735_v6 = vpack.c.bf16 %v671_v4, %v669_v63 }
 0x17d   :  { %v527_v7 = vpop.f32.mrb[68].mxu0  ;;  %1047 = vmatprep.mubr.bf16.mxu1 %v735_v6 }
 0x17e   :  { %v672_v8 = vmax.f32 %v527_v7, 0.0  ;;  %v529_v9 = vpop.f32.mrb[69].mxu0  ;;  %1048 = vmatmul.mubr.bf16.gmra.mrb[64].mxu1 %v734_v5 }
 0x17f   :  { %v673_v10 = vmax.f32 %v529_v9, 0.0  ;;  %v531_v11 = vpop.f32.mrb[70].mxu0 }
 0x180   :  { %v674_v1 = vmax.f32 %v531_v11, 0.0  ;;  %v533_v12 = vpop.f32.mrb[71].mxu0 }
 0x181   :  { %v675_v13 = vmax.f32 %v533_v12, 0.0 }
 0x182   :  { %v736_v14 = vpack.c.bf16 %v674_v1, %v672_v8 }
 0x183   :  { %v737_v15 = vpack.c.bf16 %v675_v13, %v673_v10 }
 0x185   :  { %v537_v16 = vpop.f32.mrb[72].mxu0  ;;  %1055 = vmatprep.mubr.bf16.mxu1 %v737_v15 }
 0x186   :  { %v676_v17 = vmax.f32 %v537_v16, 0.0  ;;  %v539_v18 = vpop.f32.mrb[73].mxu0  ;;  %1056 = vmatmul.mubr.bf16.gmra.mrb[68].mxu1 %v736_v14 }
 0x187   :  { %v677_v19 = vmax.f32 %v539_v18, 0.0  ;;  %v541_v20 = vpop.f32.mrb[74].mxu0 }
 0x188   :  { %v678_v21 = vmax.f32 %v541_v20, 0.0  ;;  %v543_v22 = vpop.f32.mrb[75].mxu0  ;;  %v7457_v20 = vld [vmem:[%s8778_s3] ss:$0 sm:$0xff] }
 0x189   :  { %v679_v23 = vmax.f32 %v543_v22, 0.0 }
 0x18a   :  { %v738_v24 = vpack.c.bf16 %v678_v21, %v676_v17 }
 0x18b   :  { %v739_v25 = vpack.c.bf16 %v679_v23, %v677_v19 }
 0x18d   :  { %v547_v26 = vpop.f32.mrb[76].mxu0  ;;  %1063 = vmatprep.mubr.bf16.mxu1 %v739_v25 }
 0x18e   :  { %v680_v27 = vmax.f32 %v547_v26, 0.0  ;;  %v549_v28 = vpop.f32.mrb[77].mxu0  ;;  %1064 = vmatmul.mubr.bf16.gmra.mrb[72].mxu1 %v738_v24 }
 0x18f   :  { %v681_v29 = vmax.f32 %v549_v28, 0.0  ;;  %v551_v30 = vpop.f32.mrb[78].mxu0 }
 0x190   :  { %v682_v31 = vmax.f32 %v551_v30, 0.0  ;;  %v553_v32 = vpop.f32.mrb[79].mxu0 }
 0x191   :  { %v683_v33 = vmax.f32 %v553_v32, 0.0 }
 0x192   :  { %v740_v34 = vpack.c.bf16 %v682_v31, %v680_v27 }
 0x193   :  { %v741_v35 = vpack.c.bf16 %v683_v33, %v681_v29  ;;  %v6721_v29 = vld [vmem:[%s8777_s4 + $0x80] sm:$0xff]   ;;  %v6722_v33 = vld [vmem:[%s8777_s4 + $0xc8] sm:$0xff]  }
 0x195   :  { %v557_v36 = vpop.f32.mrb[80].mxu0  ;;  %1071 = vmatprep.mubr.bf16.mxu1 %v741_v35 }
 0x196   :  { %v684_v37 = vmax.f32 %v557_v36, 0.0  ;;  %v559_v38 = vpop.f32.mrb[81].mxu0  ;;  %1072 = vmatmul.mubr.bf16.gmra.mrb[76].mxu1 %v740_v34 }
 0x197   :  { %v685_v39 = vmax.f32 %v559_v38, 0.0  ;;  %v561_v40 = vpop.f32.mrb[82].mxu0 }
 0x198   :  { %v686_v41 = vmax.f32 %v561_v40, 0.0  ;;  %v563_v42 = vpop.f32.mrb[83].mxu0 }
 0x199   :  { %v687_v43 = vmax.f32 %v563_v42, 0.0 }
 0x19a   :  { %v742_v44 = vpack.c.bf16 %v686_v41, %v684_v37  ;;  %v6723_v37 = vld [vmem:[%s8777_s4 + $0x88] sm:$0xff]   ;;  %v6725_v41 = vld [vmem:[%s8777_s4 + $0x90] sm:$0xff]  }
 0x19b   :  { %v743_v45 = vpack.c.bf16 %v687_v43, %v685_v39  ;;  %v6724_v39 = vld [vmem:[%s8777_s4 + $0xd0] sm:$0xff]  }
 0x19d   :  { %v567_v46 = vpop.f32.mrb[84].mxu0  ;;  %1079 = vmatprep.mubr.bf16.mxu1 %v743_v45 }
 0x19e   :  { %v688_v47 = vmax.f32 %v567_v46, 0.0  ;;  %v569_v48 = vpop.f32.mrb[85].mxu0  ;;  %1080 = vmatmul.mubr.bf16.gmra.mrb[80].mxu1 %v742_v44  ;;  %v6726_v44 = vld [vmem:[%s8777_s4 + $0xd8] sm:$0xff]  }
 0x19f   :  { %v689_v49 = vmax.f32 %v569_v48, 0.0  ;;  %v571_v50 = vpop.f32.mrb[86].mxu0  ;;  %v6728_v48 = vld [vmem:[%s8777_s4 + $0x98] sm:$0xff]  }
 0x1a0   :  { %v690_v51 = vmax.f32 %v571_v50, 0.0  ;;  %v573_v52 = vpop.f32.mrb[87].mxu0 }
 0x1a1   :  { %v691_v53 = vmax.f32 %v573_v52, 0.0  ;;  %v6730_v52 = vld [vmem:[%s8777_s4 + $0xe0] sm:$0xff]  }
 0x1a2   :  { %v744_v54 = vpack.c.bf16 %v690_v51, %v688_v47 }
 0x1a3   :  { %v745_v55 = vpack.c.bf16 %v691_v53, %v689_v49 }
 0x1a5   :  { %v577_v56 = vpop.f32.mrb[88].mxu0  ;;  %1087 = vmatprep.mubr.bf16.mxu1 %v745_v55  ;;  %v6733_v55 = vld [vmem:[%s8777_s4 + $0x200] sm:$0xff]  }
 0x1a6   :  { %v692_v57 = vmax.f32 %v577_v56, 0.0  ;;  %v579_v58 = vpop.f32.mrb[89].mxu0  ;;  %1088 = vmatmul.mubr.bf16.gmra.mrb[84].mxu1 %v744_v54  ;;  %v6732_v54 = vld [vmem:[%s8777_s4 + $0xa0] sm:$0xff]  }
 0x1a7   :  { %v693_v59 = vmax.f32 %v579_v58, 0.0  ;;  %v581_v60 = vpop.f32.mrb[90].mxu0 }
 0x1a8   :  { %v694_v61 = vmax.f32 %v581_v60, 0.0  ;;  %v583_v62 = vpop.f32.mrb[91].mxu0 }
 0x1a9   :  { %v695_v63 = vmax.f32 %v583_v62, 0.0  ;;  %v6736_v62 = vld [vmem:[%s8777_s4 + $0xa8] sm:$0xff]  }
 0x1aa   :  { %v746_v0 = vpack.c.bf16 %v694_v61, %v692_v57  ;;  %v6734_v57 = vld [vmem:[%s8777_s4 + $0xe8] sm:$0xff]  }
 0x1ab   :  { %v747_v2 = vpack.c.bf16 %v695_v63, %v693_v59  ;;  %v6735_v59 = vld [vmem:[%s8777_s4 + $0x248] sm:$0xff]  }
 0x1ad   :  { %v587_v3 = vpop.f32.mrb[92].mxu0  ;;  %1095 = vmatprep.mubr.bf16.mxu1 %v747_v2 }
 0x1ae   :  { %v696_v4 = vmax.f32 %v587_v3, 0.0  ;;  %v589_v5 = vpop.f32.mrb[93].mxu0  ;;  %1096 = vmatmul.mubr.bf16.gmra.mrb[88].mxu1 %v746_v0  ;;  %v6737_v0 = vld [vmem:[%s8777_s4 + $0x208] sm:$0xff]   ;;  %v6738_v3 = vld [vmem:[%s8777_s4 + $0xf0] sm:$0xff]  }
 0x1af   :  { %v697_v6 = vmax.f32 %v589_v5, 0.0  ;;  %v591_v7 = vpop.f32.mrb[94].mxu0  ;;  %v6740_v5 = vld [vmem:[%s8777_s4 + $0xb0] sm:$0xff]  }
 0x1b0   :  { %v698_v8 = vmax.f32 %v591_v7, 0.0  ;;  %v593_v9 = vpop.f32.mrb[95].mxu0 }
 0x1b1   :  { %v699_v10 = vmax.f32 %v593_v9, 0.0  ;;  %v6743_v9 = vld [vmem:[%s8777_s4 + $0x258] sm:$0xff]  }
 0x1b2   :  { %v748_v11 = vpack.c.bf16 %v698_v8, %v696_v4  ;;  %v6739_v4 = vld [vmem:[%s8777_s4 + $0x250] sm:$0xff]   ;;  %v6742_v8 = vld [vmem:[%s8777_s4 + $0xf8] sm:$0xff]  }
 0x1b3   :  { %v749_v1 = vpack.c.bf16 %v699_v10, %v697_v6  ;;  %v6741_v6 = vld [vmem:[%s8777_s4 + $0x210] sm:$0xff]  }
 0x1b5   :  { %1103 = vmatprep.mubr.bf16.mxu1 %v749_v1  ;;  %v597_v12 = vpop.f32.mrb[96].mxu0 }
 0x1b6   :  { %1104 = vmatmul.mubr.bf16.gmra.mrb[92].mxu1 %v748_v11  ;;  %v700_v13 = vmax.f32 %v597_v12, 0.0  ;;  %v599_v14 = vpop.f32.mrb[97].mxu0 }
 0x1b7   :  { %v701_v15 = vmax.f32 %v599_v14, 0.0  ;;  %v601_v16 = vpop.f32.mrb[98].mxu0  ;;  %v6745_v14 = vld [vmem:[%s8777_s4 + $0x218] sm:$0xff]  }
 0x1b8   :  { %v602_v17 = vpop.f32.mrb[99].mxu0  ;;  %v750_v19 = vpack.c.bf16 %v700_v13, %v700_v13  ;;  %v6744_v13 = vld [vmem:[%s8777_s4 + $0xb8] sm:$0xff]  }
 0x1b9   :  { %v751_v18 = vpack.c.bf16 %v701_v15, %v701_v15 }
 0x1bb   :  { %1111 = vmatprep.mubr.bf16.mxu1 %v751_v18  ;;  %v6746_v18 = vld [vmem:[%s8777_s4 + $0x1c0] sm:$0xff]  }
 0x1be   :  { %1112 = vmatmul.mubr.bf16.gmra.mrb[96].mxu1 %v750_v19  ;;  %v6747_v19 = vld [vmem:[%s8777_s4 + $0x260] sm:$0xff]  }
 0x1d1   :  { %v921_v21 = vpop.f32.mrb[0].mxu1 }
 0x1d2   :  { %v922_v22 = vadd.f32 %v7457_v20, %v921_v21  ;;  %v923_v23 = vpop.f32.mrb[1].mxu1 }
 0x1d3   :  { %v924_v24 = vpop.f32.mrb[2].mxu1  ;;  %v6748_v23 = vld [vmem:[%s8777_s4 + $0x180] sm:$0xff]  }
 0x1d4   :  { %v925_v25 = vadd.f32 %v7457_v20, %v924_v24  ;;  %v926_v26 = vpop.f32.mrb[3].mxu1  ;;  %v1119_v27 = vmax.f32 %v922_v22, 0.0  ;;  %v6749_v24 = vld [vmem:[%s8777_s4 + $0x220] sm:$0xff]  }
 0x1d6   :  { %v1120_v28 = vmax.f32 %v925_v25, 0.0  ;;  %v1266_v31 = vpack.c.bf16 %v1119_v27, %v1119_v27  ;;  %v6750_v27 = vld [vmem:[%s8777_s4 + $0x1c8] sm:$0xff]  }
 0x1d8   :  { %v1267_v30 = vpack.c.bf16 %v1120_v28, %v1120_v28  ;;  %v6751_v28 = vld [vmem:[%s8777_s4 + $0x268] sm:$0xff]  }
 0x1d9   :  { %v929_v32 = vpop.f32.mrb[4].mxu1 }
 0x1da   :  { %4490 = vmatprep.mubr.bf16.mxu0 %v1267_v30  ;;  %v931_v34 = vpop.f32.mrb[5].mxu1  ;;  %v930_v7 = vadd.f32 %v7457_v20, %v929_v32 }
 0x1db   :  { %4491 = vmatmul.mubr.bf16.vlgmr.msra.gmra.mrb[100].mxu0 %v1266_v31  ;;  %v932_v35 = vpop.f32.mrb[6].mxu1  ;;  %v6753_v34 = vld [vmem:[%s8777_s4 + $0x228] sm:$0xff]  }
 0x1dc   :  { %6059 = vmatpush3.bf16.msra.mxu0 %v6721_v29  ;;  %v933_v36 = vadd.f32 %v7457_v20, %v932_v35  ;;  %v934_v38 = vpop.f32.mrb[7].mxu1  ;;  %v1121_v17 = vmax.f32 %v930_v7, 0.0  ;;  %v6773_v7 = vld [vmem:[%s8777_s4 + $0x310] sm:$0xff]  }
 0x1dd   :  { %6060 = vmatprep.subr.bf16.mxu0 %v6722_v33  ;;  %v6752_v33 = vld [vmem:[%s8777_s4 + $0x188] sm:$0xff]  }
 0x1de   :  { %v1122_v40 = vmax.f32 %v933_v36, 0.0  ;;  %v1268_v26 = vpack.c.bf16 %v1121_v17, %v1121_v17  ;;  %v6754_v36 = vld [vmem:[%s8777_s4 + $0x1d0] sm:$0xff]   ;;  %v6778_v17 = vld [vmem:[%s8777_s4 + $0x2c0] sm:$0xff]  }
 0x1e0   :  { %v1269_v42 = vpack.c.bf16 %v1122_v40, %v1122_v40  ;;  %6061 = vmatpush3.bf16.msra.mxu0 %v6723_v37  ;;  %v6755_v37 = vld [vmem:[%s8777_s4 + $0x270] sm:$0xff]  }
 0x1e1   :  { %v937_v43 = vpop.f32.mrb[8].mxu1  ;;  %6062 = vmatprep.subr.bf16.mxu0 %v6724_v39  ;;  %v6756_v39 = vld [vmem:[%s8777_s4 + $0x190] sm:$0xff]  }
 0x1e2   :  { %v938_v45 = vadd.f32 %v7457_v20, %v937_v43  ;;  %v939_v46 = vpop.f32.mrb[9].mxu1  ;;  %4530 = vmatprep.mubr.bf16.mxu0 %v1269_v42  ;;  %v6757_v40 = vld [vmem:[%s8777_s4 + $0x230] sm:$0xff]   ;;  %v6759_v42 = vld [vmem:[%s8777_s4 + $0x278] sm:$0xff]  }
 0x1e3   :  { %v940_v47 = vpop.f32.mrb[10].mxu1 }
 0x1e4   :  { %v1123_v49 = vmax.f32 %v938_v45, 0.0  ;;  %v941_v50 = vadd.f32 %v7457_v20, %v940_v47  ;;  %6063 = vmatpush3.bf16.msra.mxu0 %v6725_v41  ;;  %v942_v51 = vpop.f32.mrb[11].mxu1  ;;  %v6758_v41 = vld [vmem:[%s8777_s4 + $0x1d8] sm:$0xff]  }
 0x1e5   :  { %6064 = vmatprep.subr.bf16.mxu0 %v6726_v44  ;;  %v6760_v47 = vld [vmem:[%s8777_s4 + $0x198] sm:$0xff]   ;;  %v6762_v51 = vld [vmem:[%s8777_s4 + $0x1e0] sm:$0xff]  }
 0x1e6   :  { %v1124_v53 = vmax.f32 %v941_v50, 0.0  ;;  %v1270_v56 = vpack.c.bf16 %v1123_v49, %v1123_v49 }
 0x1e8   :  { %v1271_v58 = vpack.c.bf16 %v1124_v53, %v1124_v53  ;;  %6065 = vmatpush3.bf16.msra.mxu0 %v6728_v48  ;;  %v6761_v48 = vld [vmem:[%s8777_s4 + $0x238] sm:$0xff]  }
 0x1e9   :  { %6066 = vmatprep.subr.bf16.mxu0 %v6730_v52  ;;  %v7500_v60 = vpop.f32.mrb[12].mxu1  ;;  %v6763_v52 = vld [vmem:[%s8777_s4 + $0x340] sm:$0xff]  }
 0x1ea   :  { %4570 = vmatprep.mubr.bf16.mxu1 %v1271_v58  ;;  %v947_v61 = vpop.f32.mrb[13].mxu1  ;;  %v6767_v58 = vld [vmem:[%s8777_s4 + $0x348] sm:$0xff]  }
 0x1eb   :  { %4571 = vmatmul.mubr.bf16.vlgmr.msra.gmra.mrb[100].mxu1 %v1270_v56  ;;  %v948_v63 = vpop.f32.mrb[14].mxu1  ;;  %v6765_v56 = vld [vmem:[%s8777_s4 + $0x300] sm:$0xff]  }
 0x1ec   :  { %6067 = vmatpush3.bf16.msra.mxu0 %v6732_v54  ;;  %6125 = vmatpush3.bf16.msra.mxu1 %v6733_v55  ;;  %v950_v2 = vpop.f32.mrb[15].mxu1  ;;  %v949_v11 = vadd.f32 %v7457_v20, %v948_v63  ;;  %v6764_v55 = vld [vmem:[%s8777_s4 + $0x1a0] sm:$0xff]  }
 0x1ed   :  { %6068 = vmatprep.subr.bf16.mxu0 %v6734_v57  ;;  %6126 = vmatprep.subr.bf16.mxu1 %v6735_v59  ;;  %v6766_v57 = vld [vmem:[%s8777_s4 + $0x1e8] sm:$0xff]  }
 0x1ee   :  { %v1126_v21 = vmax.f32 %v949_v11, 0.0  ;;  %v6769_v2 = vld [vmem:[%s8777_s4 + $0x308] sm:$0xff]  }
 0x1f0   :  { %6069 = vmatpush3.bf16.msra.mxu0 %v6736_v62  ;;  %6127 = vmatpush3.bf16.msra.mxu1 %v6737_v0  ;;  %v1273_v30 = vpack.c.bf16 %v1126_v21, %v1126_v21  ;;  %v6768_v0 = vld [vmem:[%s8777_s4 + $0x1a8] sm:$0xff]   ;;  %v6780_v21 = vld [vmem:[%s8777_s4 + $0x280] sm:$0xff]  }
 0x1f1   :  { %6070 = vmatprep.subr.bf16.mxu0 %v6738_v3  ;;  %6128 = vmatprep.subr.bf16.mxu1 %v6739_v4  ;;  %v953_v10 = vpop.f32.mrb[16].mxu1  ;;  %v6770_v4 = vld [vmem:[%s8777_s4 + $0x1f0] sm:$0xff]  }
 0x1f2   :  { %v955_v1 = vpop.f32.mrb[17].mxu1  ;;  %v954_v38 = vadd.f32 %v7457_v20, %v953_v10  ;;  %v6775_v10 = vld [vmem:[%s8777_s4 + $0x358] sm:$0xff]  }
 0x1f3   :  { %v956_v12 = vpop.f32.mrb[18].mxu1 }
 0x1f4   :  { %6071 = vmatpush3.bf16.msra.mxu0 %v6740_v5  ;;  %6129 = vmatpush3.bf16.msra.mxu1 %v6741_v6  ;;  %v957_v15 = vadd.f32 %v7457_v20, %v956_v12  ;;  %v958_v16 = vpop.f32.mrb[19].mxu1  ;;  %v1127_v45 = vmax.f32 %v954_v38, 0.0  ;;  %v6771_v5 = vld [vmem:[%s8777_s4 + $0x350] sm:$0xff]  }
 0x1f5   :  { %6072 = vmatprep.subr.bf16.mxu0 %v6742_v8  ;;  %6130 = vmatprep.subr.bf16.mxu1 %v6743_v9  ;;  %v6772_v6 = vld [vmem:[%s8777_s4 + $0x1b0] sm:$0xff]   ;;  %v946_v8 = vadd.f32 %v7457_v20, %v7500_v60  ;;  %v6774_v9 = vld [vmem:[%s8777_s4 + $0x1f8] sm:$0xff]  }
 0x1f6   :  { %v1128_v22 = vmax.f32 %v957_v15, 0.0  ;;  %v1274_v54 = vpack.c.bf16 %v1127_v45, %v1127_v45  ;;  %v6776_v60 = vld [vmem:[%s8777_s4 + $0x1b8] sm:$0xff]   ;;  %v6789_v38 = vld [vmem:[%s8777_s4 + $0x330] sm:$0xff]  }
 0x1f7   :  { %v1125_v16 = vmax.f32 %v946_v8, 0.0 }
 0x1f8   :  { %6073 = vmatpush3.bf16.msra.mxu0 %v6744_v13  ;;  %6131 = vmatpush3.bf16.msra.mxu1 %v6745_v14  ;;  %v1275_v25 = vpack.c.bf16 %v1128_v22, %v1128_v22  ;;  %v6777_v14 = vld [vmem:[%s8777_s4 + $0x318] sm:$0xff]   ;;  %v6781_v22 = vld [vmem:[%s8777_s4 + $0x320] sm:$0xff]  }
 0x1f9   :  { %6102 = vmatprep.subr.bf16.mxu0 %v6746_v18  ;;  %6132 = vmatprep.subr.bf16.mxu1 %v6747_v19  ;;  %v7553_v29 = vpop.f32.mrb[20].mxu1  ;;  %v6779_v18 = vld [vmem:[%s8777_s4 + $0x360] sm:$0xff]  }
 0x1fa   :  { %4650 = vmatprep.mubr.bf16.mxu1 %v1275_v25  ;;  %v963_v31 = vpop.f32.mrb[21].mxu1  ;;  %v6783_v25 = vld [vmem:[%s8777_s4 + $0x368] sm:$0xff]   ;;  %v962_v8 = vadd.f32 %v7457_v20, %v7553_v29  ;;  %v6808_v29 = vld [vmem:[%s8777_s4 + $0x2b8] sm:$0xff]  }
 0x1fb   :  { %4531 = vmatmul.mubr.bf16.vlgmr.msra.gmra.mrb[104].mxu0 %v1268_v26  ;;  %v7555_v32 = vpop.f32.mrb[22].mxu1  ;;  %v6784_v31 = vld [vmem:[%s8777_s4 + $0x288] sm:$0xff]  }
 0x1fc   :  { %6103 = vmatpush3.bf16.msra.mxu0 %v6748_v23  ;;  %6133 = vmatpush3.bf16.msra.mxu1 %v6749_v24  ;;  %v966_v35 = vpop.f32.mrb[23].mxu1  ;;  %v965_v1 = vadd.f32 %v7457_v20, %v7555_v32  ;;  %v1272_v23 = vpack.c.bf16 %v1125_v16, %v1125_v16  ;;  %v6782_v24 = vld [vmem:[%s8777_s4 + $0x2c8] sm:$0xff]   ;;  %v1129_v16 = vmax.f32 %v962_v8, 0.0  ;;  %v6835_v8 = vld [vmem:[%s8777_s4 + $0x550] sm:$0xff]  }
 0x1fd   :  { %6104 = vmatprep.subr.bf16.mxu0 %v6750_v27  ;;  %6134 = vmatprep.subr.bf16.mxu1 %v6751_v28  ;;  %v6785_v32 = vld [vmem:[%s8777_s4 + $0x328] sm:$0xff]   ;;  %v6787_v35 = vld [vmem:[%s8777_s4 + $0x370] sm:$0xff]  }
 0x1fe   :  { %4610 = vmatprep.mubr.bf16.mxu0 %v1273_v30  ;;  %v1130_v19 = vmax.f32 %v965_v1, 0.0 }
 0x200   :  { %6105 = vmatpush3.bf16.msra.mxu0 %v6752_v33  ;;  %6135 = vmatpush3.bf16.msra.mxu1 %v6753_v34  ;;  %v1277_v27 = vpack.c.bf16 %v1130_v19, %v1130_v19  ;;  %v6786_v34 = vld [vmem:[%s8777_s4 + $0x2d0] sm:$0xff]   ;;  %v6812_v19 = vld [vmem:[%s8777_s4 + $0x380] sm:$0xff]  }
 0x201   :  { %6106 = vmatprep.subr.bf16.mxu0 %v6754_v36  ;;  %6136 = vmatprep.subr.bf16.mxu1 %v6755_v37  ;;  %v7582_v43 = vpop.f32.mrb[24].mxu1  ;;  %v6788_v37 = vld [vmem:[%s8777_s4 + $0x290] sm:$0xff]  }
 0x202   :  { %v971_v44 = vpop.f32.mrb[25].mxu1  ;;  %v970_v36 = vadd.f32 %v7457_v20, %v7582_v43 }
 0x203   :  { %v972_v46 = vpop.f32.mrb[26].mxu1 }
 0x204   :  { %6107 = vmatpush3.bf16.msra.mxu0 %v6756_v39  ;;  %6137 = vmatpush3.bf16.msra.mxu1 %v6757_v40  ;;  %v973_v49 = vadd.f32 %v7457_v20, %v972_v46  ;;  %v974_v50 = vpop.f32.mrb[27].mxu1  ;;  %v6790_v39 = vld [vmem:[%s8777_s4 + $0x2d8] sm:$0xff]   ;;  %v1131_v44 = vmax.f32 %v970_v36, 0.0  ;;  %v6819_v36 = vld [vmem:[%s8777_s4 + $0x470] sm:$0xff]  }
 0x205   :  { %6108 = vmatprep.subr.bf16.mxu0 %v6758_v41  ;;  %6138 = vmatprep.subr.bf16.mxu1 %v6759_v42  ;;  %v6791_v40 = vld [vmem:[%s8777_s4 + $0x378] sm:$0xff]   ;;  %v6795_v50 = vld [vmem:[%s8777_s4 + $0x440] sm:$0xff]  }
 0x206   :  { %v1132_v53 = vmax.f32 %v973_v49, 0.0  ;;  %v6792_v46 = vld [vmem:[%s8777_s4 + $0x298] sm:$0xff]   ;;  %v6794_v49 = vld [vmem:[%s8777_s4 + $0x2e0] sm:$0xff]  }
 0x208   :  { %6109 = vmatpush3.bf16.msra.mxu0 %v6760_v47  ;;  %6139 = vmatpush3.bf16.msra.mxu1 %v6761_v48  ;;  %v1279_v61 = vpack.c.bf16 %v1132_v53, %v1132_v53  ;;  %v6793_v47 = vld [vmem:[%s8777_s4 + $0x338] sm:$0xff]   ;;  %v6796_v53 = vld [vmem:[%s8777_s4 + $0x2a0] sm:$0xff]  }
 0x209   :  { %6110 = vmatprep.subr.bf16.mxu0 %v6762_v51  ;;  %6168 = vmatprep.subr.bf16.mxu1 %v6763_v52  ;;  %v7609_v59 = vpop.f32.mrb[28].mxu1  ;;  %v1278_v52 = vpack.c.bf16 %v1131_v44, %v1131_v44 }
 0x20a   :  { %v979_v62 = vpop.f32.mrb[29].mxu1 }
 0x20b   :  { %4651 = vmatmul.mubr.bf16.vlgmr.msra.gmra.mrb[104].mxu1 %v1274_v54  ;;  %v7611_v63 = vpop.f32.mrb[30].mxu1  ;;  %v6797_v54 = vld [vmem:[%s8777_s4 + $0x400] sm:$0xff]  }
 0x20c   :  { %6111 = vmatpush3.bf16.msra.mxu0 %v6764_v55  ;;  %6169 = vmatpush3.bf16.msra.mxu1 %v6765_v56  ;;  %v982_v3 = vpop.f32.mrb[31].mxu1  ;;  %v6798_v55 = vld [vmem:[%s8777_s4 + $0x2e8] sm:$0xff]  }
 0x20d   :  { %6112 = vmatprep.subr.bf16.mxu0 %v6766_v57  ;;  %6170 = vmatprep.subr.bf16.mxu1 %v6767_v58  ;;  %v6799_v56 = vld [vmem:[%s8777_s4 + $0x448] sm:$0xff]  }
 0x20e   :  { %4730 = vmatprep.mubr.bf16.mxu1 %v1279_v61 }
 0x210   :  { %6113 = vmatpush3.bf16.msra.mxu0 %v6768_v0  ;;  %6171 = vmatpush3.bf16.msra.mxu1 %v6769_v2  ;;  %v6800_v0 = vld [vmem:[%s8777_s4 + $0x2a8] sm:$0xff]  }
 0x211   :  { %6114 = vmatprep.subr.bf16.mxu0 %v6770_v4  ;;  %6172 = vmatprep.subr.bf16.mxu1 %v6771_v5  ;;  %v7639_v11 = vpop.f32.mrb[32].mxu1  ;;  %v6801_v2 = vld [vmem:[%s8777_s4 + $0x408] sm:$0xff]   ;;  %v6802_v4 = vld [vmem:[%s8777_s4 + $0x2f0] sm:$0xff]  }
 0x212   :  { %v987_v12 = vpop.f32.mrb[33].mxu1  ;;  %v6803_v5 = vld [vmem:[%s8777_s4 + $0x450] sm:$0xff]  }
 0x213   :  { %v988_v13 = vpop.f32.mrb[34].mxu1  ;;  %v981_v12 = vadd.f32 %v7457_v20, %v7611_v63  ;;  %v6810_v63 = vld [vmem:[%s8777_s4 + $0x3c0] sm:$0xff]  }
 0x214   :  { %6115 = vmatpush3.bf16.msra.mxu0 %v6772_v6  ;;  %6173 = vmatpush3.bf16.msra.mxu1 %v6773_v7  ;;  %v990_v15 = vpop.f32.mrb[35].mxu1  ;;  %v989_v42 = vadd.f32 %v7457_v20, %v988_v13  ;;  %v6804_v6 = vld [vmem:[%s8777_s4 + $0x2b0] sm:$0xff]  }
 0x215   :  { %6116 = vmatprep.subr.bf16.mxu0 %v6774_v9  ;;  %6174 = vmatprep.subr.bf16.mxu1 %v6775_v10  ;;  %v6805_v7 = vld [vmem:[%s8777_s4 + $0x410] sm:$0xff]   ;;  %v6806_v9 = vld [vmem:[%s8777_s4 + $0x2f8] sm:$0xff]  }
 0x216   :  { %v1136_v51 = vmax.f32 %v989_v42, 0.0  ;;  %v6807_v10 = vld [vmem:[%s8777_s4 + $0x458] sm:$0xff]  }
 0x218   :  { %6117 = vmatpush3.bf16.msra.mxu0 %v6776_v60  ;;  %6175 = vmatpush3.bf16.msra.mxu1 %v6777_v14  ;;  %v1283_v58 = vpack.c.bf16 %v1136_v51, %v1136_v51  ;;  %v6809_v14 = vld [vmem:[%s8777_s4 + $0x418] sm:$0xff]   ;;  %v6827_v51 = vld [vmem:[%s8777_s4 + $0x540] sm:$0xff]  }
 0x219   :  { %6146 = vmatprep.subr.bf16.mxu0 %v6778_v17  ;;  %6176 = vmatprep.subr.bf16.mxu1 %v6779_v18  ;;  %v7667_v26 = vpop.f32.mrb[36].mxu1  ;;  %v6811_v17 = vld [vmem:[%s8777_s4 + $0x460] sm:$0xff]   ;;  %v1134_v18 = vmax.f32 %v981_v12, 0.0  ;;  %v978_v12 = vadd.f32 %v7457_v20, %v7609_v59  ;;  %v6840_v59 = vld [vmem:[%s8777_s4 + $0x3b8] sm:$0xff]  }
 0x21a   :  { %v995_v28 = vpop.f32.mrb[37].mxu1 }
 0x21b   :  { %4611 = vmatmul.mubr.bf16.vlgmr.msra.gmra.mrb[108].mxu0 %v1272_v23  ;;  %v7669_v30 = vpop.f32.mrb[38].mxu1  ;;  %v6814_v23 = vld [vmem:[%s8777_s4 + $0x3c8] sm:$0xff]  }
 0x21c   :  { %6147 = vmatpush3.bf16.msra.mxu0 %v6780_v21  ;;  %6177 = vmatpush3.bf16.msra.mxu1 %v6781_v22  ;;  %v998_v33 = vpop.f32.mrb[39].mxu1  ;;  %v6813_v21 = vld [vmem:[%s8777_s4 + $0x420] sm:$0xff]   ;;  %v1276_v22 = vpack.c.bf16 %v1129_v16, %v1129_v16 }
 0x21d   :  { %6148 = vmatprep.subr.bf16.mxu0 %v6782_v24  ;;  %6178 = vmatprep.subr.bf16.mxu1 %v6783_v25  ;;  %v6815_v24 = vld [vmem:[%s8777_s4 + $0x468] sm:$0xff]  }
 0x21e   :  { %4690 = vmatprep.mubr.bf16.mxu0 %v1277_v27  ;;  %v1281_v27 = vpack.c.bf16 %v1134_v18, %v1134_v18  ;;  %v6817_v33 = vld [vmem:[%s8777_s4 + $0x428] sm:$0xff]  }
 0x220   :  { %6149 = vmatpush3.bf16.msra.mxu0 %v6784_v31  ;;  %6179 = vmatpush3.bf16.msra.mxu1 %v6785_v32  ;;  %v6816_v32 = vld [vmem:[%s8777_s4 + $0x388] sm:$0xff]  }
 0x221   :  { %6150 = vmatprep.subr.bf16.mxu0 %v6786_v34  ;;  %6180 = vmatprep.subr.bf16.mxu1 %v6787_v35  ;;  %v7697_v41 = vpop.f32.mrb[40].mxu1  ;;  %v6818_v35 = vld [vmem:[%s8777_s4 + $0x3d0] sm:$0xff]  }
 0x222   :  { %v1003_v43 = vpop.f32.mrb[41].mxu1 }
 0x223   :  { %v7700_v45 = vpop.f32.mrb[42].mxu1 }
 0x224   :  { %6151 = vmatpush3.bf16.msra.mxu0 %v6788_v37  ;;  %6181 = vmatpush3.bf16.msra.mxu1 %v6789_v38  ;;  %v1006_v48 = vpop.f32.mrb[43].mxu1  ;;  %v986_v37 = vadd.f32 %v7457_v20, %v7639_v11  ;;  %v6820_v38 = vld [vmem:[%s8777_s4 + $0x390] sm:$0xff]   ;;  %v6823_v11 = vld [vmem:[%s8777_s4 + $0x478] sm:$0xff]   ;;  %v1005_v43 = vadd.f32 %v7457_v20, %v7700_v45  ;;  %v6826_v45 = vld [vmem:[%s8777_s4 + $0x3e0] sm:$0xff]  }
 0x225   :  { %6152 = vmatprep.subr.bf16.mxu0 %v6790_v39  ;;  %6182 = vmatprep.subr.bf16.mxu1 %v6791_v40  ;;  %v6821_v39 = vld [vmem:[%s8777_s4 + $0x430] sm:$0xff]   ;;  %v6822_v40 = vld [vmem:[%s8777_s4 + $0x3d8] sm:$0xff]  }
 0x226   :  { %v6824_v48 = vld [vmem:[%s8777_s4 + $0x398] sm:$0xff]  }
 0x228   :  { %6153 = vmatpush3.bf16.msra.mxu0 %v6792_v46  ;;  %6183 = vmatpush3.bf16.msra.mxu1 %v6793_v47  ;;  %v1135_v46 = vmax.f32 %v986_v37, 0.0  ;;  %v6848_v37 = vld [vmem:[%s8777_s4 + $0x488] sm:$0xff]  }
 0x229   :  { %6154 = vmatprep.subr.bf16.mxu0 %v6794_v49  ;;  %6212 = vmatprep.subr.bf16.mxu1 %v6795_v50  ;;  %v7726_v57 = vpop.f32.mrb[44].mxu1  ;;  %v6825_v49 = vld [vmem:[%s8777_s4 + $0x438] sm:$0xff]  }
 0x22a   :  { %v1011_v61 = vpop.f32.mrb[45].mxu1 }
 0x22b   :  { %4731 = vmatmul.mubr.bf16.vlgmr.msra.gmra.mrb[108].mxu1 %v1278_v52  ;;  %v7728_v62 = vpop.f32.mrb[46].mxu1  ;;  %v1140_v52 = vmax.f32 %v1005_v43, 0.0  ;;  %v6852_v43 = vld [vmem:[%s8777_s4 + $0x490] sm:$0xff]  }
 0x22c   :  { %6155 = vmatpush3.bf16.msra.mxu0 %v6796_v53  ;;  %6213 = vmatpush3.bf16.msra.mxu1 %v6797_v54  ;;  %v1014_v3 = vpop.f32.mrb[47].mxu1  ;;  %v1282_v53 = vpack.c.bf16 %v1135_v46, %v1135_v46  ;;  %v6828_v54 = vld [vmem:[%s8777_s4 + $0x3a0] sm:$0xff]   ;;  %v6854_v46 = vld [vmem:[%s8777_s4 + $0x4d8] sm:$0xff]  }
 0x22d   :  { %6156 = vmatprep.subr.bf16.mxu0 %v6798_v55  ;;  %6214 = vmatprep.subr.bf16.mxu1 %v6799_v56  ;;  %v6829_v55 = vld [vmem:[%s8777_s4 + $0x500] sm:$0xff]   ;;  %v6830_v56 = vld [vmem:[%s8777_s4 + $0x3e8] sm:$0xff]  }
 0x22e   :  { %4810 = vmatprep.mubr.bf16.mxu1 %v1283_v58  ;;  %v6831_v58 = vld [vmem:[%s8777_s4 + $0x548] sm:$0xff]  }
 0x230   :  { %6157 = vmatpush3.bf16.msra.mxu0 %v6800_v0  ;;  %6215 = vmatpush3.bf16.msra.mxu1 %v6801_v2  ;;  %v1287_v0 = vpack.c.bf16 %v1140_v52, %v1140_v52 }
 0x231   :  { %6158 = vmatprep.subr.bf16.mxu0 %v6802_v4  ;;  %6216 = vmatprep.subr.bf16.mxu1 %v6803_v5  ;;  %v7756_v1 = vpop.f32.mrb[48].mxu1  ;;  %v6832_v4 = vld [vmem:[%s8777_s4 + $0x3a8] sm:$0xff]  }
 0x232   :  { %v1019_v13 = vpop.f32.mrb[49].mxu1  ;;  %v6833_v5 = vld [vmem:[%s8777_s4 + $0x508] sm:$0xff]  }
 0x233   :  { %v7760_v60 = vpop.f32.mrb[50].mxu1  ;;  %v6838_v13 = vld [vmem:[%s8777_s4 + $0x3f8] sm:$0xff]  }
 0x234   :  { %6159 = vmatpush3.bf16.msra.mxu0 %v6804_v6  ;;  %6217 = vmatpush3.bf16.msra.mxu1 %v6805_v7  ;;  %v1022_v15 = vpop.f32.mrb[51].mxu1  ;;  %v6834_v7 = vld [vmem:[%s8777_s4 + $0x3f0] sm:$0xff]  }
 0x235   :  { %6160 = vmatprep.subr.bf16.mxu0 %v6806_v9  ;;  %6218 = vmatprep.subr.bf16.mxu1 %v6807_v10  ;;  %v6836_v9 = vld [vmem:[%s8777_s4 + $0x3b0] sm:$0xff]   ;;  %v997_v15 = vadd.f32 %v7457_v20, %v7669_v30  ;;  %v6842_v30 = vld [vmem:[%s8777_s4 + $0x4c0] sm:$0xff]  }
 0x236   :  { %v6837_v10 = vld [vmem:[%s8777_s4 + $0x510] sm:$0xff]  }
 0x238   :  { %6161 = vmatpush3.bf16.msra.mxu0 %v6808_v29  ;;  %6219 = vmatpush3.bf16.msra.mxu1 %v6809_v14  ;;  %v6839_v29 = vld [vmem:[%s8777_s4 + $0x558] sm:$0xff]  }
 0x239   :  { %6190 = vmatprep.subr.bf16.mxu0 %v6810_v63  ;;  %6220 = vmatprep.subr.bf16.mxu1 %v6811_v17  ;;  %v7786_v25 = vpop.f32.mrb[52].mxu1  ;;  %v6841_v17 = vld [vmem:[%s8777_s4 + $0x518] sm:$0xff]  }
 0x23a   :  { %v1027_v28 = vpop.f32.mrb[53].mxu1 }
 0x23b   :  { %4691 = vmatmul.mubr.bf16.vlgmr.msra.gmra.mrb[112].mxu0 %v1276_v22  ;;  %v7788_v31 = vpop.f32.mrb[54].mxu1  ;;  %v1138_v22 = vmax.f32 %v997_v15, 0.0  ;;  %v6846_v28 = vld [vmem:[%s8777_s4 + $0x4c8] sm:$0xff]   ;;  %v6867_v15 = vld [vmem:[%s8777_s4 + $0x650] sm:$0xff]  }
 0x23c   :  { %6191 = vmatpush3.bf16.msra.mxu0 %v6812_v19  ;;  %6221 = vmatpush3.bf16.msra.mxu1 %v6813_v21  ;;  %v1030_v34 = vpop.f32.mrb[55].mxu1  ;;  %v1133_v19 = vmax.f32 %v978_v12, 0.0  ;;  %v6843_v21 = vld [vmem:[%s8777_s4 + $0x560] sm:$0xff]  }
 0x23d   :  { %6192 = vmatprep.subr.bf16.mxu0 %v6814_v23  ;;  %6222 = vmatprep.subr.bf16.mxu1 %v6815_v24  ;;  %v6844_v23 = vld [vmem:[%s8777_s4 + $0x480] sm:$0xff]   ;;  %v6847_v34 = vld [vmem:[%s8777_s4 + $0x568] sm:$0xff]  }
 0x23e   :  { %4770 = vmatprep.mubr.bf16.mxu0 %v1281_v27  ;;  %v1280_v24 = vpack.c.bf16 %v1133_v19, %v1133_v19  ;;  %v6845_v27 = vld [vmem:[%s8777_s4 + $0x520] sm:$0xff]   ;;  %v6870_v19 = vld [vmem:[%s8777_s4 + $0x4f8] sm:$0xff]  }
 0x240   :  { %6193 = vmatpush3.bf16.msra.mxu0 %v6816_v32  ;;  %6223 = vmatpush3.bf16.msra.mxu1 %v6817_v33  ;;  %v1285_v33 = vpack.c.bf16 %v1138_v22, %v1138_v22 }
 0x241   :  { %6194 = vmatprep.subr.bf16.mxu0 %v6818_v35  ;;  %6224 = vmatprep.subr.bf16.mxu1 %v6819_v36  ;;  %v7816_v42 = vpop.f32.mrb[56].mxu1 }
 0x242   :  { %v1035_v44 = vpop.f32.mrb[57].mxu1 }
 0x243   :  { %v7820_v47 = vpop.f32.mrb[58].mxu1  ;;  %v6853_v44 = vld [vmem:[%s8777_s4 + $0x530] sm:$0xff]  }
 0x244   :  { %6195 = vmatpush3.bf16.msra.mxu0 %v6820_v38  ;;  %6225 = vmatpush3.bf16.msra.mxu1 %v6821_v39  ;;  %v1038_v50 = vpop.f32.mrb[59].mxu1  ;;  %v6849_v39 = vld [vmem:[%s8777_s4 + $0x528] sm:$0xff]  }
 0x245   :  { %6196 = vmatprep.subr.bf16.mxu0 %v6822_v40  ;;  %6226 = vmatprep.subr.bf16.mxu1 %v6823_v11  ;;  %v6850_v40 = vld [vmem:[%s8777_s4 + $0x4d0] sm:$0xff]   ;;  %v1021_v50 = vadd.f32 %v7457_v20, %v7760_v60 }
 0x246   :  { %v6851_v11 = vld [vmem:[%s8777_s4 + $0x570] sm:$0xff]  }
 0x248   :  { %6197 = vmatpush3.bf16.msra.mxu0 %v6824_v48  ;;  %6227 = vmatpush3.bf16.msra.mxu1 %v6825_v49  ;;  %v1002_v49 = vadd.f32 %v7457_v20, %v7697_v41  ;;  %v6857_v41 = vld [vmem:[%s8777_s4 + $0x538] sm:$0xff]   ;;  %v6858_v20 = vld [vmem:[%s8777_s4 + $0x4e0] sm:$0xff]  }
 0x249   :  { %6198 = vmatprep.subr.bf16.mxu0 %v6826_v45  ;;  %6256 = vmatprep.subr.bf16.mxu1 %v6827_v51  ;;  %v7846_v61 = vpop.f32.mrb[60].mxu1  ;;  %v6855_v45 = vld [vmem:[%s8777_s4 + $0x578] sm:$0xff]  }
 0x24a   :  { %v1043_v2 = vpop.f32.mrb[61].mxu1  ;;  %v1139_v60 = vmax.f32 %v1002_v49, 0.0 }
 0x24b   :  { %4811 = vmatmul.mubr.bf16.vlgmr.msra.gmra.mrb[112].mxu1 %v1282_v53  ;;  %v7848_v3 = vpop.f32.mrb[62].mxu1  ;;  %v6856_v53 = vld [vmem:[%s8777_s4 + $0x498] sm:$0xff]   ;;  %v6862_v2 = vld [vmem:[%s8777_s4 + $0x4e8] sm:$0xff]  }
 0x24c   :  { %6199 = vmatpush3.bf16.msra.mxu0 %v6828_v54  ;;  %6257 = vmatpush3.bf16.msra.mxu1 %v6829_v55  ;;  %v1046_v6 = vpop.f32.mrb[63].mxu1  ;;  %v1144_v55 = vmax.f32 %v1021_v50, 0.0  ;;  %v6880_v50 = vld [vmem:[%s8777_s4 + $0x588] sm:$0xff]  }
 0x24d   :  { %6200 = vmatprep.subr.bf16.mxu0 %v6830_v56  ;;  %6258 = vmatprep.subr.bf16.mxu1 %v6831_v58  ;;  %v6859_v56 = vld [vmem:[%s8777_s4 + $0x640] sm:$0xff]  }
 0x24e   :  { %4890 = vmatprep.mubr.bf16.mxu1 %v1287_v0  ;;  %v6860_v58 = vld [vmem:[%s8777_s4 + $0x4a0] sm:$0xff]   ;;  %v1291_v6 = vpack.c.bf16 %v1144_v55, %v1144_v55 }
 0x24f   :  { %v6861_v0 = vld [vmem:[%s8777_s4 + $0x600] sm:$0xff]  }
 0x250   :  { %6201 = vmatpush3.bf16.msra.mxu0 %v6832_v4  ;;  %6259 = vmatpush3.bf16.msra.mxu1 %v6833_v5  ;;  %v1286_v5 = vpack.c.bf16 %v1139_v60, %v1139_v60  ;;  %v6886_v60 = vld [vmem:[%s8777_s4 + $0x5d8] sm:$0xff]  }
 0x251   :  { %6202 = vmatprep.subr.bf16.mxu0 %v6834_v7  ;;  %6260 = vmatprep.subr.bf16.mxu1 %v6835_v8  ;;  %v7876_v14 = vpop.f32.mrb[64].mxu1  ;;  %v6863_v7 = vld [vmem:[%s8777_s4 + $0x648] sm:$0xff]  }
 0x252   :  { %v1051_v16 = vpop.f32.mrb[65].mxu1 }
 0x253   :  { %v7880_v63 = vpop.f32.mrb[66].mxu1  ;;  %v6868_v16 = vld [vmem:[%s8777_s4 + $0x4b0] sm:$0xff]  }
 0x254   :  { %6203 = vmatpush3.bf16.msra.mxu0 %v6836_v9  ;;  %6261 = vmatpush3.bf16.msra.mxu1 %v6837_v10  ;;  %v1054_v18 = vpop.f32.mrb[67].mxu1  ;;  %v6864_v10 = vld [vmem:[%s8777_s4 + $0x4a8] sm:$0xff]  }
 0x255   :  { %6204 = vmatprep.subr.bf16.mxu0 %v6838_v13  ;;  %6262 = vmatprep.subr.bf16.mxu1 %v6839_v29  ;;  %v6865_v13 = vld [vmem:[%s8777_s4 + $0x608] sm:$0xff]   ;;  %v6866_v29 = vld [vmem:[%s8777_s4 + $0x4f0] sm:$0xff]  }
 0x256   :  { %v6869_v18 = vld [vmem:[%s8777_s4 + $0x610] sm:$0xff]  }
 0x258   :  { %6205 = vmatpush3.bf16.msra.mxu0 %v6840_v59  ;;  %6263 = vmatpush3.bf16.msra.mxu1 %v6841_v17  ;;  %v7988_v59 = vld [vmem:[%s8778_s3] ss:$0 sm:$0xff] }
 0x259   :  { %6234 = vmatprep.subr.bf16.mxu0 %v6842_v30  ;;  %6264 = vmatprep.subr.bf16.mxu1 %v6843_v21  ;;  %v7903_v32 = vpop.f32.mrb[68].mxu1  ;;  %v994_v17 = vadd.f32 %v7988_v59, %v7667_v26  ;;  %v1013_v21 = vadd.f32 %v7988_v59, %v7728_v62  ;;  %v6871_v26 = vld [vmem:[%s8777_s4 + $0x658] sm:$0xff]  }
 0x25a   :  { %v1059_v35 = vpop.f32.mrb[69].mxu1  ;;  %v6873_v62 = vld [vmem:[%s8777_s4 + $0x618] sm:$0xff]  }
 0x25b   :  { %4771 = vmatmul.mubr.bf16.vlgmr.msra.gmra.mrb[116].mxu0 %v1280_v24  ;;  %v7908_v36 = vpop.f32.mrb[70].mxu1  ;;  %v6872_v24 = vld [vmem:[%s8777_s4 + $0x4b8] sm:$0xff]   ;;  %v6875_v35 = vld [vmem:[%s8777_s4 + $0x660] sm:$0xff]  }
 0x25c   :  { %6235 = vmatpush3.bf16.msra.mxu0 %v6844_v23  ;;  %4850 = vmatprep.mubr.bf16.mxu0 %v1285_v33  ;;  %v1062_v38 = vpop.f32.mrb[71].mxu1  ;;  %v6874_v33 = vld [vmem:[%s8777_s4 + $0x5c0] sm:$0xff]  }
 0x25d   :  { %6265 = vmatpush3.bf16.msra.mxu1 %v6845_v27  ;;  %6236 = vmatprep.subr.bf16.mxu0 %v6846_v28  ;;  %v1137_v28 = vmax.f32 %v994_v17, 0.0  ;;  %v6894_v17 = vld [vmem:[%s8777_s4 + $0x5e8] sm:$0xff]  }
 0x25e   :  { %6266 = vmatprep.subr.bf16.mxu1 %v6847_v34  ;;  %v1142_v34 = vmax.f32 %v1013_v21, 0.0 }
 0x25f   :  { %v1284_v38 = vpack.c.bf16 %v1137_v28, %v1137_v28  ;;  %v6898_v28 = vld [vmem:[%s8777_s4 + $0x5f0] sm:$0xff]  }
 0x260   :  { %6237 = vmatpush3.bf16.msra.mxu0 %v6848_v37  ;;  %v6876_v37 = vld [vmem:[%s8777_s4 + $0x580] sm:$0xff]  }
 0x261   :  { %6267 = vmatpush3.bf16.msra.mxu1 %v6849_v39  ;;  %6238 = vmatprep.subr.bf16.mxu0 %v6850_v40  ;;  %v7931_v48 = vpop.f32.mrb[72].mxu1  ;;  %v6877_v39 = vld [vmem:[%s8777_s4 + $0x620] sm:$0xff]   ;;  %v6878_v40 = vld [vmem:[%s8777_s4 + $0x5c8] sm:$0xff]  }
 0x262   :  { %6268 = vmatprep.subr.bf16.mxu1 %v6851_v11  ;;  %v1067_v51 = vpop.f32.mrb[73].mxu1 }
 0x263   :  { %v7940_v52 = vpop.f32.mrb[74].mxu1  ;;  %v6881_v51 = vld [vmem:[%s8777_s4 + $0x628] sm:$0xff]  }
 0x264   :  { %6239 = vmatpush3.bf16.msra.mxu0 %v6852_v43  ;;  %v1070_v54 = vpop.f32.mrb[75].mxu1  ;;  %v1289_v43 = vpack.c.bf16 %v1142_v34, %v1142_v34  ;;  %v1010_v34 = vadd.f32 %v7988_v59, %v7726_v57  ;;  %v6903_v57 = vld [vmem:[%s8777_s4 + $0x758] sm:$0xff]  }
 0x265   :  { %6269 = vmatpush3.bf16.msra.mxu1 %v6853_v44  ;;  %6240 = vmatprep.subr.bf16.mxu0 %v6854_v46  ;;  %v6879_v44 = vld [vmem:[%s8777_s4 + $0x668] sm:$0xff]   ;;  %v6883_v54 = vld [vmem:[%s8777_s4 + $0x670] sm:$0xff]  }
 0x266   :  { %6270 = vmatprep.subr.bf16.mxu1 %v6855_v45 }
 0x268   :  { %6241 = vmatpush3.bf16.msra.mxu0 %v6856_v53  ;;  %v6882_v53 = vld [vmem:[%s8777_s4 + $0x5d0] sm:$0xff]  }
 0x269   :  { %6271 = vmatpush3.bf16.msra.mxu1 %v6857_v41  ;;  %6242 = vmatprep.subr.bf16.mxu0 %v6858_v20  ;;  %v7963_v4 = vpop.f32.mrb[76].mxu1  ;;  %v6884_v41 = vld [vmem:[%s8777_s4 + $0x590] sm:$0xff]  }
 0x26a   :  { %6300 = vmatprep.subr.bf16.mxu1 %v6859_v56  ;;  %v1075_v8 = vpop.f32.mrb[77].mxu1  ;;  %v6885_v20 = vld [vmem:[%s8777_s4 + $0x630] sm:$0xff]   ;;  %v1018_v56 = vadd.f32 %v7988_v59, %v7756_v1  ;;  %v6889_v1 = vld [vmem:[%s8777_s4 + $0x638] sm:$0xff]  }
 0x26b   :  { %v7968_v9 = vpop.f32.mrb[78].mxu1  ;;  %v6890_v8 = vld [vmem:[%s8777_s4 + $0x5e0] sm:$0xff]  }
 0x26c   :  { %4891 = vmatmul.mubr.bf16.vlgmr.msra.gmra.mrb[116].mxu1 %v1286_v5  ;;  %6243 = vmatpush3.bf16.msra.mxu0 %v6860_v58  ;;  %v1078_v12 = vpop.f32.mrb[79].mxu1  ;;  %v6887_v58 = vld [vmem:[%s8777_s4 + $0x678] sm:$0xff]  }
 0x26d   :  { %6301 = vmatpush3.bf16.msra.mxu1 %v6861_v0  ;;  %6244 = vmatprep.subr.bf16.mxu0 %v6862_v2  ;;  %v1037_v2 = vadd.f32 %v7988_v59, %v7820_v47  ;;  %v6891_v47 = vld [vmem:[%s8777_s4 + $0x740] sm:$0xff]  }
 0x26e   :  { %6302 = vmatprep.subr.bf16.mxu1 %v6863_v7  ;;  %4970 = vmatprep.mubr.bf16.mxu1 %v1291_v6  ;;  %v6888_v6 = vld [vmem:[%s8777_s4 + $0x598] sm:$0xff]  }
 0x26f   :  { %v1148_v12 = vmax.f32 %v1037_v2, 0.0  ;;  %v6913_v2 = vld [vmem:[%s8777_s4 + $0x728] sm:$0xff]  }
 0x270   :  { %6245 = vmatpush3.bf16.msra.mxu0 %v6864_v10  ;;  %v1143_v10 = vmax.f32 %v1018_v56, 0.0 }
 0x271   :  { %6303 = vmatpush3.bf16.msra.mxu1 %v6865_v13  ;;  %6246 = vmatprep.subr.bf16.mxu0 %v6866_v29  ;;  %v7998_v30 = vpop.f32.mrb[80].mxu1  ;;  %v6892_v13 = vld [vmem:[%s8777_s4 + $0x5a0] sm:$0xff]   ;;  %v1295_v21 = vpack.c.bf16 %v1148_v12, %v1148_v12  ;;  %v6919_v12 = vld [vmem:[%s8777_s4 + $0x778] sm:$0xff]  }
 0x272   :  { %6304 = vmatprep.subr.bf16.mxu1 %v6867_v15  ;;  %v1083_v22 = vpop.f32.mrb[81].mxu1  ;;  %v6893_v29 = vld [vmem:[%s8777_s4 + $0x700] sm:$0xff]  }
 0x273   :  { %v8005_v23 = vpop.f32.mrb[82].mxu1  ;;  %v6896_v22 = vld [vmem:[%s8777_s4 + $0x5a8] sm:$0xff]  }
 0x274   :  { %6247 = vmatpush3.bf16.msra.mxu0 %v6868_v16  ;;  %v1086_v27 = vpop.f32.mrb[83].mxu1  ;;  %v1290_v16 = vpack.c.bf16 %v1143_v10, %v1143_v10  ;;  %v6918_v10 = vld [vmem:[%s8777_s4 + $0x6d8] sm:$0xff]  }
 0x275   :  { %6305 = vmatpush3.bf16.msra.mxu1 %v6869_v18  ;;  %6248 = vmatprep.subr.bf16.mxu0 %v6870_v19  ;;  %v6895_v18 = vld [vmem:[%s8777_s4 + $0x748] sm:$0xff]  }
 0x276   :  { %6306 = vmatprep.subr.bf16.mxu1 %v6871_v26  ;;  %v6897_v27 = vld [vmem:[%s8777_s4 + $0x708] sm:$0xff]  }
 0x278   :  { %6249 = vmatpush3.bf16.msra.mxu0 %v6872_v24 }
 0x279   :  { %6307 = vmatpush3.bf16.msra.mxu1 %v6873_v62  ;;  %6278 = vmatprep.subr.bf16.mxu0 %v6874_v33  ;;  %v8028_v11 = vpop.f32.mrb[84].mxu1  ;;  %v6899_v62 = vld [vmem:[%s8777_s4 + $0x750] sm:$0xff]  }
 0x27a   :  { %6308 = vmatprep.subr.bf16.mxu1 %v6875_v35  ;;  %v1091_v46 = vpop.f32.mrb[85].mxu1  ;;  %v6900_v33 = vld [vmem:[%s8777_s4 + $0x5b0] sm:$0xff]  }
 0x27b   :  { %4851 = vmatmul.mubr.bf16.vlgmr.msra.gmra.mrb[120].mxu0 %v1284_v38  ;;  %v8033_v49 = vpop.f32.mrb[86].mxu1  ;;  %v6901_v35 = vld [vmem:[%s8777_s4 + $0x710] sm:$0xff]  }
 0x27c   :  { %6279 = vmatpush3.bf16.msra.mxu0 %v6876_v37  ;;  %4930 = vmatprep.mubr.bf16.mxu0 %v1289_v43  ;;  %v1094_v45 = vpop.f32.mrb[87].mxu1  ;;  %v6902_v37 = vld [vmem:[%s8777_s4 + $0x5f8] sm:$0xff]  }
 0x27d   :  { %6309 = vmatpush3.bf16.msra.mxu1 %v6877_v39  ;;  %6280 = vmatprep.subr.bf16.mxu0 %v6878_v40  ;;  %v1029_v39 = vadd.f32 %v7988_v59, %v7788_v31  ;;  %v6905_v31 = vld [vmem:[%s8777_s4 + $0x718] sm:$0xff]   ;;  %v6906_v45 = vld [vmem:[%s8777_s4 + $0x6c0] sm:$0xff]  }
 0x27e   :  { %6310 = vmatprep.subr.bf16.mxu1 %v6879_v44  ;;  %v6904_v44 = vld [vmem:[%s8777_s4 + $0x5b8] sm:$0xff]  }
 0x280   :  { %6281 = vmatpush3.bf16.msra.mxu0 %v6880_v50  ;;  %v1141_v50 = vmax.f32 %v1010_v34, 0.0  ;;  %v6930_v34 = vld [vmem:[%s8777_s4 + $0x6f0] sm:$0xff]  }
 0x281   :  { %6311 = vmatpush3.bf16.msra.mxu1 %v6881_v51  ;;  %6282 = vmatprep.subr.bf16.mxu0 %v6882_v53  ;;  %v8056_v55 = vpop.f32.mrb[88].mxu1  ;;  %v1146_v51 = vmax.f32 %v1029_v39, 0.0  ;;  %v6907_v53 = vld [vmem:[%s8777_s4 + $0x760] sm:$0xff]  }
 0x282   :  { %6312 = vmatprep.subr.bf16.mxu1 %v6883_v54  ;;  %v1099_v0 = vpop.f32.mrb[89].mxu1  ;;  %v6908_v54 = vld [vmem:[%s8777_s4 + $0x680] sm:$0xff]  }
 0x283   :  { %v8065_v5 = vpop.f32.mrb[90].mxu1  ;;  %v1293_v56 = vpack.c.bf16 %v1146_v51, %v1146_v51  ;;  %v6912_v0 = vld [vmem:[%s8777_s4 + $0x688] sm:$0xff]   ;;  %v6935_v51 = vld [vmem:[%s8777_s4 + $0x858] sm:$0xff]  }
 0x284   :  { %6283 = vmatpush3.bf16.msra.mxu0 %v6884_v41  ;;  %v1102_v7 = vpop.f32.mrb[91].mxu1  ;;  %v1288_v41 = vpack.c.bf16 %v1141_v50, %v1141_v50  ;;  %v6933_v50 = vld [vmem:[%s8777_s4 + $0x810] sm:$0xff]  }
 0x285   :  { %6313 = vmatpush3.bf16.msra.mxu1 %v6885_v20  ;;  %6284 = vmatprep.subr.bf16.mxu0 %v6886_v60  ;;  %v6909_v20 = vld [vmem:[%s8777_s4 + $0x720] sm:$0xff]   ;;  %v6910_v60 = vld [vmem:[%s8777_s4 + $0x6c8] sm:$0xff]   ;;  %v6915_v7 = vld [vmem:[%s8777_s4 + $0x770] sm:$0xff]  }
 0x286   :  { %6314 = vmatprep.subr.bf16.mxu1 %v6887_v58  ;;  %v6911_v58 = vld [vmem:[%s8777_s4 + $0x768] sm:$0xff]  }
 0x288   :  { %6285 = vmatpush3.bf16.msra.mxu0 %v6888_v6  ;;  %v6914_v6 = vld [vmem:[%s8777_s4 + $0x6d0] sm:$0xff]  }
 0x289   :  { %6315 = vmatpush3.bf16.msra.mxu1 %v6889_v1  ;;  %6286 = vmatprep.subr.bf16.mxu0 %v6890_v8  ;;  %v8085_v15 = vpop.f32.mrb[92].mxu1  ;;  %v6916_v1 = vld [vmem:[%s8777_s4 + $0x690] sm:$0xff]  }
 0x28a   :  { %6344 = vmatprep.subr.bf16.mxu1 %v6891_v47  ;;  %v1107_v19 = vpop.f32.mrb[93].mxu1  ;;  %v6917_v8 = vld [vmem:[%s8777_s4 + $0x730] sm:$0xff]   ;;  %v1034_v47 = vadd.f32 %v7988_v59, %v7816_v42  ;;  %v6922_v42 = vld [vmem:[%s8777_s4 + $0x6e0] sm:$0xff]  }
 0x28b   :  { %v8093_v26 = vpop.f32.mrb[94].mxu1  ;;  %v6924_v19 = vld [vmem:[%s8777_s4 + $0x6a0] sm:$0xff]  }
 0x28c   :  { %4971 = vmatmul.mubr.bf16.vlgmr.msra.gmra.mrb[120].mxu1 %v1290_v16  ;;  %6287 = vmatpush3.bf16.msra.mxu0 %v6892_v13  ;;  %v1110_v24 = vpop.f32.mrb[95].mxu1  ;;  %v1053_v13 = vadd.f32 %v7988_v59, %v7880_v63  ;;  %v6921_v16 = vld [vmem:[%s8777_s4 + $0x738] sm:$0xff]   ;;  %v6923_v63 = vld [vmem:[%s8777_s4 + $0x840] sm:$0xff]  }
 0x28d   :  { %6345 = vmatpush3.bf16.msra.mxu1 %v6893_v29  ;;  %5050 = vmatprep.mubr.bf16.mxu1 %v1295_v21  ;;  %v6920_v29 = vld [vmem:[%s8777_s4 + $0x698] sm:$0xff]   ;;  %v6925_v21 = vld [vmem:[%s8777_s4 + $0x800] sm:$0xff]   ;;  %v6926_v24 = vld [vmem:[%s8777_s4 + $0x6e8] sm:$0xff]  }
 0x28e   :  { %6288 = vmatprep.subr.bf16.mxu0 %v6894_v17  ;;  %6346 = vmatprep.subr.bf16.mxu1 %v6895_v18  ;;  %v1147_v17 = vmax.f32 %v1034_v47, 0.0  ;;  %v1152_v18 = vmax.f32 %v1053_v13, 0.0  ;;  %v6948_v13 = vld [vmem:[%s8777_s4 + $0x790] sm:$0xff]  }
 0x290   :  { %6289 = vmatpush3.bf16.msra.mxu0 %v6896_v22  ;;  %v1294_v22 = vpack.c.bf16 %v1147_v17, %v1147_v17  ;;  %v6950_v17 = vld [vmem:[%s8777_s4 + $0x7d8] sm:$0xff]  }
 0x291   :  { %6347 = vmatpush3.bf16.msra.mxu1 %v6897_v27  ;;  %6290 = vmatprep.subr.bf16.mxu0 %v6898_v28  ;;  %v8118_v38 = vpop.f32.mrb[96].mxu1  ;;  %v6927_v27 = vld [vmem:[%s8777_s4 + $0x848] sm:$0xff]   ;;  %v1299_v28 = vpack.c.bf16 %v1152_v18, %v1152_v18  ;;  %v1050_v18 = vadd.f32 %v7988_v59, %v7876_v14  ;;  %v6954_v14 = vld [vmem:[%s8777_s4 + $0x7e0] sm:$0xff]  }
 0x292   :  { %6348 = vmatprep.subr.bf16.mxu1 %v6899_v62  ;;  %v1115_v40 = vpop.f32.mrb[97].mxu1  ;;  %v6928_v62 = vld [vmem:[%s8777_s4 + $0x6a8] sm:$0xff]  }
 0x293   :  { %v1116_v43 = vpop.f32.mrb[98].mxu1 }
 0x294   :  { %6291 = vmatpush3.bf16.msra.mxu0 %v6900_v33  ;;  %v1117_v46 = vpop.f32.mrb[99].mxu1  ;;  %v6929_v33 = vld [vmem:[%s8777_s4 + $0x808] sm:$0xff]   ;;  %v6932_v43 = vld [vmem:[%s8777_s4 + $0x6b0] sm:$0xff]  }
 0x295   :  { %6349 = vmatpush3.bf16.msra.mxu1 %v6901_v35  ;;  %6292 = vmatprep.subr.bf16.mxu0 %v6902_v37  ;;  %v6931_v37 = vld [vmem:[%s8777_s4 + $0x850] sm:$0xff]  }
 0x296   :  { %6350 = vmatprep.subr.bf16.mxu1 %v6903_v57 }
 0x298   :  { %6293 = vmatpush3.bf16.msra.mxu0 %v6904_v44  ;;  %v1026_v44 = vadd.f32 %v7988_v59, %v7786_v25  ;;  %v6936_v25 = vld [vmem:[%s8777_s4 + $0x6b8] sm:$0xff]  }
 0x299   :  { %6351 = vmatpush3.bf16.msra.mxu1 %v6905_v31  ;;  %6322 = vmatprep.subr.bf16.mxu0 %v6906_v45  ;;  %v6934_v31 = vld [vmem:[%s8777_s4 + $0x6f8] sm:$0xff]   ;;  %v1045_v45 = vadd.f32 %v7988_v59, %v7848_v3  ;;  %v6938_v3 = vld [vmem:[%s8777_s4 + $0x7c0] sm:$0xff]  }
 0x29a   :  { %6352 = vmatprep.subr.bf16.mxu1 %v6907_v53  ;;  %v1145_v53 = vmax.f32 %v1026_v44, 0.0  ;;  %v6961_v44 = vld [vmem:[%s8777_s4 + $0x908] sm:$0xff]  }
 0x29b   :  { %4931 = vmatmul.mubr.bf16.vlgmr.msra.gmra.mrb[124].mxu0 %v1288_v41  ;;  %v1150_v41 = vmax.f32 %v1045_v45, 0.0 }
 0x29c   :  { %6323 = vmatpush3.bf16.msra.mxu0 %v6908_v54  ;;  %5010 = vmatprep.mubr.bf16.mxu0 %v1293_v56  ;;  %v6937_v54 = vld [vmem:[%s8777_s4 + $0x818] sm:$0xff]   ;;  %v1292_v56 = vpack.c.bf16 %v1145_v53, %v1145_v53 }
 0x29d   :  { %6353 = vmatpush3.bf16.msra.mxu1 %v6909_v20  ;;  %6324 = vmatprep.subr.bf16.mxu0 %v6910_v60  ;;  %v6939_v20 = vld [vmem:[%s8777_s4 + $0x860] sm:$0xff]  }
 0x29e   :  { %6354 = vmatprep.subr.bf16.mxu1 %v6911_v58  ;;  %v6940_v60 = vld [vmem:[%s8777_s4 + $0x780] sm:$0xff]  }
 0x29f   :  { %v6941_v58 = vld [vmem:[%s8777_s4 + $0x820] sm:$0xff]  }
 0x2a0   :  { %6325 = vmatpush3.bf16.msra.mxu0 %v6912_v0  ;;  %v6942_v0 = vld [vmem:[%s8777_s4 + $0x7c8] sm:$0xff]  }
 0x2a1   :  { %6355 = vmatpush3.bf16.msra.mxu1 %v6913_v2  ;;  %6326 = vmatprep.subr.bf16.mxu0 %v6914_v6  ;;  %v1297_v2 = vpack.c.bf16 %v1150_v41, %v1150_v41  ;;  %v6943_v6 = vld [vmem:[%s8777_s4 + $0x868] sm:$0xff]  }
 0x2a2   :  { %6356 = vmatprep.subr.bf16.mxu1 %v6915_v7  ;;  %v6944_v7 = vld [vmem:[%s8777_s4 + $0x788] sm:$0xff]  }
 0x2a4   :  { %6327 = vmatpush3.bf16.msra.mxu0 %v6916_v1  ;;  %v6945_v1 = vld [vmem:[%s8777_s4 + $0x828] sm:$0xff]  }
 0x2a5   :  { %6357 = vmatpush3.bf16.msra.mxu1 %v6917_v8  ;;  %6328 = vmatprep.subr.bf16.mxu0 %v6918_v10  ;;  %v6946_v8 = vld [vmem:[%s8777_s4 + $0x7d0] sm:$0xff]  }
 0x2a6   :  { %6358 = vmatprep.subr.bf16.mxu1 %v6919_v12  ;;  %v6947_v10 = vld [vmem:[%s8777_s4 + $0x870] sm:$0xff]  }
 0x2a8   :  { %6329 = vmatpush3.bf16.msra.mxu0 %v6920_v29 }
 0x2a9   :  { %6359 = vmatpush3.bf16.msra.mxu1 %v6921_v16  ;;  %6330 = vmatprep.subr.bf16.mxu0 %v6922_v42  ;;  %v6949_v42 = vld [vmem:[%s8777_s4 + $0x830] sm:$0xff]  }
 0x2aa   :  { %6388 = vmatprep.subr.bf16.mxu1 %v6923_v63 }
 0x2ac   :  { %5051 = vmatmul.mubr.bf16.vlgmr.msra.gmra.mrb[124].mxu1 %v1294_v22  ;;  %6331 = vmatpush3.bf16.msra.mxu0 %v6924_v19  ;;  %v6951_v19 = vld [vmem:[%s8777_s4 + $0x878] sm:$0xff]  }
 0x2ad   :  { %6389 = vmatpush3.bf16.msra.mxu1 %v6925_v21  ;;  %5130 = vmatprep.mubr.bf16.mxu1 %v1299_v28  ;;  %v1069_v21 = vadd.f32 %v7988_v59, %v7940_v52  ;;  %v6952_v22 = vld [vmem:[%s8777_s4 + $0x798] sm:$0xff]   ;;  %v6955_v52 = vld [vmem:[%s8777_s4 + $0x940] sm:$0xff]  }
 0x2ae   :  { %v6052_v35 = vpop.f32.mrb[100].mxu0  ;;  %6332 = vmatprep.subr.bf16.mxu0 %v6926_v24  ;;  %6390 = vmatprep.subr.bf16.mxu1 %v6927_v27  ;;  %v6953_v24 = vld [vmem:[%s8777_s4 + $0x838] sm:$0xff]   ;;  %v1151_v27 = vmax.f32 %v1050_v18, 0.0 }
 0x2af   :  { %v6053_v39 = vpop.f32.mrb[101].mxu0  ;;  %v1156_v28 = vmax.f32 %v1069_v21, 0.0  ;;  %v6980_v21 = vld [vmem:[%s8777_s4 + $0x890] sm:$0xff]  }
 0x2b0   :  { %v8213_v57 = vadd.f32 %v6053_v39, %v6052_v35  ;;  %6333 = vmatpush3.bf16.msra.mxu0 %v6928_v62  ;;  %v6055_v40 = vpop.f32.mrb[102].mxu0  ;;  %v6956_v62 = vld [vmem:[%s8777_s4 + $0x7a0] sm:$0xff]   ;;  %v6958_v35 = vld [vmem:[%s8777_s4 + $0x7e8] sm:$0xff]  }
 0x2b1   :  { %6391 = vmatpush3.bf16.msra.mxu1 %v6929_v33  ;;  %v6056_v46 = vpop.f32.mrb[103].mxu0  ;;  %6334 = vmatprep.subr.bf16.mxu0 %v6930_v34  ;;  %v6957_v33 = vld [vmem:[%s8777_s4 + $0x900] sm:$0xff]   ;;  %v1298_v34 = vpack.c.bf16 %v1151_v27, %v1151_v27  ;;  %v1303_v39 = vpack.c.bf16 %v1156_v28, %v1156_v28  ;;  %v6960_v40 = vld [vmem:[%s8777_s4 + $0x7a8] sm:$0xff]   ;;  %v6982_v27 = vld [vmem:[%s8777_s4 + $0x8d8] sm:$0xff]   ;;  %v1066_v28 = vadd.f32 %v7988_v59, %v7931_v48 }
 0x2b2   :  { %6392 = vmatprep.subr.bf16.mxu1 %v6931_v37  ;;  %v6959_v37 = vld [vmem:[%s8777_s4 + $0x948] sm:$0xff]   ;;  %v6962_v46 = vld [vmem:[%s8777_s4 + $0x7f0] sm:$0xff]   ;;  %v6986_v48 = vld [vmem:[%s8777_s4 + $0x8e0] sm:$0xff]  }
 0x2b4   :  { %6335 = vmatpush3.bf16.msra.mxu0 %v6932_v43  ;;  %v5634_v43 = vld [vmem:[%s8779_s5] ss:$0 sm:$0xff] }
 0x2b5   :  { %6393 = vmatpush3.bf16.msra.mxu1 %v6933_v50  ;;  %6336 = vmatprep.subr.bf16.mxu0 %v6934_v31  ;;  %v6963_v31 = vld [vmem:[%s8777_s4 + $0x950] sm:$0xff]  }
 0x2b6   :  { %6394 = vmatprep.subr.bf16.mxu1 %v6935_v51  ;;  %v4493_v51 = vadd.f32 %v8213_v57, %v5634_v43  ;;  %v6966_v57 = vld [vmem:[%s8777_s4 + $0x7f8] sm:$0xff]   ;;  %v6989_v43 = vld [vmem:[%s8777_s4 + $0xa00] sm:$0xff]  }
 0x2b8   :  { %6337 = vmatpush3.bf16.msra.mxu0 %v6936_v25 }
 0x2b9   :  { %6395 = vmatpush3.bf16.msra.mxu1 %v6937_v54  ;;  %6366 = vmatprep.subr.bf16.mxu0 %v6938_v3  ;;  %v6964_v54 = vld [vmem:[%s8777_s4 + $0x7b0] sm:$0xff]   ;;  %v1042_v3 = vadd.f32 %v7988_v59, %v7846_v61  ;;  %v6967_v61 = vld [vmem:[%s8777_s4 + $0x958] sm:$0xff]  }
 0x2ba   :  { %6396 = vmatprep.subr.bf16.mxu1 %v6939_v20  ;;  %v6965_v20 = vld [vmem:[%s8777_s4 + $0x910] sm:$0xff]  }
 0x2bb   :  { %5011 = vmatmul.mubr.bf16.vlgmr.msra.gmra.mrb[128].mxu0 %v1292_v56 }
 0x2bc   :  { %6367 = vmatpush3.bf16.msra.mxu0 %v6940_v60  ;;  %5090 = vmatprep.mubr.bf16.mxu0 %v1297_v2  ;;  %v1061_v60 = vadd.f32 %v7988_v59, %v7908_v36  ;;  %v1149_v2 = vmax.f32 %v1042_v3, 0.0  ;;  %v6969_v36 = vld [vmem:[%s8777_s4 + $0x918] sm:$0xff]  }
 0x2bd   :  { %6397 = vmatpush3.bf16.msra.mxu1 %v6941_v58  ;;  %6368 = vmatprep.subr.bf16.mxu0 %v6942_v0  ;;  %v6968_v58 = vld [vmem:[%s8777_s4 + $0x7b8] sm:$0xff]  }
 0x2be   :  { %6398 = vmatprep.subr.bf16.mxu1 %v6943_v6  ;;  %v6096_v47 = vpop.f32.mrb[100].mxu1  ;;  %v6970_v6 = vld [vmem:[%s8777_s4 + $0x8c0] sm:$0xff]  }
 0x2bf   :  { %v6097_v12 = vpop.f32.mrb[101].mxu1 }
 0x2c0   :  { %6369 = vmatpush3.bf16.msra.mxu0 %v6944_v7  ;;  %v6098_v29 = vadd.f32 %v6097_v12, %v6096_v47  ;;  %v6099_v16 = vpop.f32.mrb[102].mxu1  ;;  %v1154_v7 = vmax.f32 %v1061_v60, 0.0  ;;  %v6973_v47 = vld [vmem:[%s8777_s4 + $0x920] sm:$0xff]   ;;  %v6974_v12 = vld [vmem:[%s8777_s4 + $0x8c8] sm:$0xff]   ;;  %v1058_v60 = vadd.f32 %v7988_v59, %v7903_v32  ;;  %v6999_v32 = vld [vmem:[%s8777_s4 + $0xa58] sm:$0xff]  }
 0x2c1   :  { %6399 = vmatpush3.bf16.msra.mxu1 %v6945_v1  ;;  %6370 = vmatprep.subr.bf16.mxu0 %v6946_v8  ;;  %v6100_v63 = vpop.f32.mrb[103].mxu1  ;;  %v6971_v1 = vld [vmem:[%s8777_s4 + $0x960] sm:$0xff]   ;;  %v6976_v16 = vld [vmem:[%s8777_s4 + $0x888] sm:$0xff]  }
 0x2c2   :  { %6400 = vmatprep.subr.bf16.mxu1 %v6947_v10  ;;  %v6972_v8 = vld [vmem:[%s8777_s4 + $0x880] sm:$0xff]   ;;  %v1296_v10 = vpack.c.bf16 %v1149_v2, %v1149_v2  ;;  %v6979_v63 = vld [vmem:[%s8777_s4 + $0x970] sm:$0xff]   ;;  %v1077_v2 = vadd.f32 %v7988_v59, %v7968_v9  ;;  %v7001_v9 = vld [vmem:[%s8777_s4 + $0xa18] sm:$0xff]  }
 0x2c4   :  { %6371 = vmatpush3.bf16.msra.mxu0 %v6948_v13  ;;  %v1301_v13 = vpack.c.bf16 %v1154_v7, %v1154_v7 }
 0x2c5   :  { %6401 = vmatpush3.bf16.msra.mxu1 %v6949_v42  ;;  %6372 = vmatprep.subr.bf16.mxu0 %v6950_v17  ;;  %v6977_v42 = vld [vmem:[%s8777_s4 + $0x928] sm:$0xff]   ;;  %v6978_v17 = vld [vmem:[%s8777_s4 + $0x8d0] sm:$0xff]  }
 0x2c6   :  { %6402 = vmatprep.subr.bf16.mxu1 %v6951_v19 }
 0x2c8   :  { %6373 = vmatpush3.bf16.msra.mxu0 %v6952_v22 }
 0x2c9   :  { %6403 = vmatpush3.bf16.msra.mxu1 %v6953_v24  ;;  %6374 = vmatprep.subr.bf16.mxu0 %v6954_v14  ;;  %v6981_v14 = vld [vmem:[%s8777_s4 + $0x930] sm:$0xff]  }
 0x2ca   :  { %6432 = vmatprep.subr.bf16.mxu1 %v6955_v52 }
 0x2cc   :  { %5131 = vmatmul.mubr.bf16.vlgmr.msra.gmra.mrb[128].mxu1 %v1298_v34  ;;  %6375 = vmatpush3.bf16.msra.mxu0 %v6956_v62  ;;  %v6983_v62 = vld [vmem:[%s8777_s4 + $0x978] sm:$0xff]  }
 0x2cd   :  { %6433 = vmatpush3.bf16.msra.mxu1 %v6957_v33  ;;  %5210 = vmatprep.mubr.bf16.mxu1 %v1303_v39  ;;  %v1085_v33 = vadd.f32 %v7988_v59, %v8005_v23  ;;  %v6984_v34 = vld [vmem:[%s8777_s4 + $0x898] sm:$0xff]   ;;  %v6987_v23 = vld [vmem:[%s8777_s4 + $0xa40] sm:$0xff]  }
 0x2ce   :  { %v6074_v50 = vpop.f32.mrb[104].mxu0  ;;  %6376 = vmatprep.subr.bf16.mxu0 %v6958_v35  ;;  %6434 = vmatprep.subr.bf16.mxu1 %v6959_v37  ;;  %v6985_v35 = vld [vmem:[%s8777_s4 + $0x938] sm:$0xff]   ;;  %v1155_v37 = vmax.f32 %v1066_v28, 0.0 }
 0x2cf   :  { %v6075_v45 = vpop.f32.mrb[105].mxu0  ;;  %v1160_v39 = vmax.f32 %v1085_v33, 0.0  ;;  %v7014_v28 = vld [vmem:[%s8777_s4 + $0x9d8] sm:$0xff]   ;;  %v1082_v33 = vadd.f32 %v7988_v59, %v7998_v30  ;;  %v7018_v30 = vld [vmem:[%s8777_s4 + $0x9e0] sm:$0xff]  }
 0x2d0   :  { %v6076_v25 = vadd.f32 %v6075_v45, %v6074_v50  ;;  %v6077_v53 = vpop.f32.mrb[106].mxu0  ;;  %6377 = vmatpush3.bf16.msra.mxu0 %v6960_v40  ;;  %v6988_v40 = vld [vmem:[%s8777_s4 + $0x8a0] sm:$0xff]   ;;  %v6991_v50 = vld [vmem:[%s8777_s4 + $0xa48] sm:$0xff]  }
 0x2d1   :  { %6435 = vmatpush3.bf16.msra.mxu1 %v6961_v44  ;;  %v6078_v41 = vpop.f32.mrb[107].mxu0  ;;  %6378 = vmatprep.subr.bf16.mxu0 %v6962_v46  ;;  %v1302_v44 = vpack.c.bf16 %v1155_v37, %v1155_v37  ;;  %v6990_v46 = vld [vmem:[%s8777_s4 + $0x8e8] sm:$0xff]   ;;  %v7017_v37 = vld [vmem:[%s8777_s4 + $0xa38] sm:$0xff]  }
 0x2d2   :  { %v4533_v56 = vadd.f32 %v6076_v25, %v4493_v51  ;;  %6436 = vmatprep.subr.bf16.mxu1 %v6963_v31  ;;  %v1307_v31 = vpack.c.bf16 %v1160_v39, %v1160_v39  ;;  %v6992_v45 = vld [vmem:[%s8777_s4 + $0x8a8] sm:$0xff]   ;;  %v6994_v25 = vld [vmem:[%s8777_s4 + $0x8f0] sm:$0xff]  }
 0x2d3   :  { %v6993_v51 = vld [vmem:[%s8777_s4 + $0xa08] sm:$0xff]  }
 0x2d4   :  { %6379 = vmatpush3.bf16.msra.mxu0 %v6964_v54  ;;  %v8342_v0 = vadd.f32 %v6098_v29, %v4533_v56  ;;  %v6975_v29 = vld [vmem:[%s8777_s4 + $0x968] sm:$0xff]   ;;  %v6995_v54 = vld [vmem:[%s8777_s4 + $0xa50] sm:$0xff]  }
 0x2d5   :  { %6437 = vmatpush3.bf16.msra.mxu1 %v6965_v20  ;;  %6380 = vmatprep.subr.bf16.mxu0 %v6966_v57  ;;  %v6996_v57 = vld [vmem:[%s8777_s4 + $0x8b0] sm:$0xff]  }
 0x2d6   :  { %6438 = vmatprep.subr.bf16.mxu1 %v6967_v61  ;;  %v6997_v61 = vld [vmem:[%s8777_s4 + $0xa10] sm:$0xff]  }
 0x2d8   :  { %6381 = vmatpush3.bf16.msra.mxu0 %v6968_v58  ;;  %v6998_v58 = vld [vmem:[%s8777_s4 + $0x8f8] sm:$0xff]  }
 0x2d9   :  { %6439 = vmatpush3.bf16.msra.mxu1 %v6969_v36  ;;  %6410 = vmatprep.subr.bf16.mxu0 %v6970_v6  ;;  %v7000_v6 = vld [vmem:[%s8777_s4 + $0x8b8] sm:$0xff]  }
 0x2da   :  { %6440 = vmatprep.subr.bf16.mxu1 %v6971_v1  ;;  %v1153_v1 = vmax.f32 %v1058_v60, 0.0  ;;  %v1074_v60 = vadd.f32 %v7988_v59, %v7963_v4  ;;  %v7031_v4 = vld [vmem:[%s8777_s4 + $0xb58] sm:$0xff]  }
 0x2db   :  { %5091 = vmatmul.mubr.bf16.vlgmr.msra.gmra.mrb[132].mxu0 %v1296_v10  ;;  %v7003_v10 = vld [vmem:[%s8777_s4 + $0xa60] sm:$0xff]  }
 0x2dc   :  { %6411 = vmatpush3.bf16.msra.mxu0 %v6972_v8  ;;  %5170 = vmatprep.mubr.bf16.mxu0 %v1301_v13  ;;  %v1158_v8 = vmax.f32 %v1077_v2, 0.0  ;;  %v7005_v13 = vld [vmem:[%s8777_s4 + $0xa20] sm:$0xff]   ;;  %v1093_v2 = vadd.f32 %v7988_v59, %v8033_v49 }
 0x2dd   :  { %6441 = vmatpush3.bf16.msra.mxu1 %v6973_v47  ;;  %6412 = vmatprep.subr.bf16.mxu0 %v6974_v12  ;;  %v7004_v47 = vld [vmem:[%s8777_s4 + $0x980] sm:$0xff]   ;;  %v1300_v12 = vpack.c.bf16 %v1153_v1, %v1153_v1  ;;  %v1157_v1 = vmax.f32 %v1074_v60, 0.0  ;;  %v7061_v60 = vld [vmem:[%s8777_s4 + $0xc18] sm:$0xff]  }
 0x2de   :  { %6442 = vmatprep.subr.bf16.mxu1 %v6975_v29  ;;  %v6140_v18 = vpop.f32.mrb[104].mxu1  ;;  %v7006_v29 = vld [vmem:[%s8777_s4 + $0x9c8] sm:$0xff]   ;;  %v7034_v49 = vld [vmem:[%s8777_s4 + $0xac0] sm:$0xff]  }
 0x2df   :  { %v6141_v19 = vpop.f32.mrb[105].mxu1 }
 0x2e0   :  { %6413 = vmatpush3.bf16.msra.mxu0 %v6976_v16  ;;  %v6142_v22 = vadd.f32 %v6141_v19, %v6140_v18  ;;  %v6143_v24 = vpop.f32.mrb[106].mxu1  ;;  %v1305_v16 = vpack.c.bf16 %v1158_v8, %v1158_v8  ;;  %v7010_v18 = vld [vmem:[%s8777_s4 + $0x9d0] sm:$0xff]   ;;  %v1304_v8 = vpack.c.bf16 %v1157_v1, %v1157_v1 }
 0x2e1   :  { %6443 = vmatpush3.bf16.msra.mxu1 %v6977_v42  ;;  %6414 = vmatprep.subr.bf16.mxu0 %v6978_v17  ;;  %v6144_v52 = vpop.f32.mrb[107].mxu1  ;;  %v7007_v42 = vld [vmem:[%s8777_s4 + $0xa68] sm:$0xff]   ;;  %v7011_v19 = vld [vmem:[%s8777_s4 + $0xa70] sm:$0xff]  }
 0x2e2   :  { %6444 = vmatprep.subr.bf16.mxu1 %v6979_v63  ;;  %v7008_v17 = vld [vmem:[%s8777_s4 + $0x988] sm:$0xff]   ;;  %v7012_v24 = vld [vmem:[%s8777_s4 + $0x990] sm:$0xff]  }
 0x2e3   :  { %v7009_v63 = vld [vmem:[%s8777_s4 + $0xa28] sm:$0xff]   ;;  %v7013_v52 = vld [vmem:[%s8777_s4 + $0xa30] sm:$0xff]  }
 0x2e4   :  { %6415 = vmatpush3.bf16.msra.mxu0 %v6980_v21  ;;  %v7068_v1 = vld [vmem:[%s8777_s4 + $0xbd0] sm:$0xff]  }
 0x2e5   :  { %6445 = vmatpush3.bf16.msra.mxu1 %v6981_v14  ;;  %6416 = vmatprep.subr.bf16.mxu0 %v6982_v27 }
 0x2e6   :  { %6446 = vmatprep.subr.bf16.mxu1 %v6983_v62 }
 0x2e8   :  { %6417 = vmatpush3.bf16.msra.mxu0 %v6984_v34  ;;  %v7015_v34 = vld [vmem:[%s8777_s4 + $0xa78] sm:$0xff]  }
 0x2e9   :  { %6447 = vmatpush3.bf16.msra.mxu1 %v6985_v35  ;;  %6418 = vmatprep.subr.bf16.mxu0 %v6986_v48  ;;  %v1101_v35 = vadd.f32 %v7988_v59, %v8065_v5  ;;  %v7016_v48 = vld [vmem:[%s8777_s4 + $0x998] sm:$0xff]   ;;  %v7019_v5 = vld [vmem:[%s8777_s4 + $0xb40] sm:$0xff]  }
 0x2ea   :  { %6476 = vmatprep.subr.bf16.mxu1 %v6987_v23  ;;  %v1159_v23 = vmax.f32 %v1082_v33, 0.0  ;;  %v7033_v59 = vld [vmem:[%s8777_s4 + $0xb18] sm:$0xff]  }
 0x2eb   :  { %v1164_v39 = vmax.f32 %v1101_v35, 0.0  ;;  %v7048_v33 = vld [vmem:[%s8777_s4 + $0xa98] sm:$0xff]  }
 0x2ec   :  { %5211 = vmatmul.mubr.bf16.vlgmr.msra.gmra.mrb[132].mxu1 %v1302_v44  ;;  %6419 = vmatpush3.bf16.msra.mxu0 %v6988_v40  ;;  %v7020_v40 = vld [vmem:[%s8777_s4 + $0x9a0] sm:$0xff]   ;;  %v1306_v44 = vpack.c.bf16 %v1159_v23, %v1159_v23 }
 0x2ed   :  { %6477 = vmatpush3.bf16.msra.mxu1 %v6989_v43  ;;  %5290 = vmatprep.mubr.bf16.mxu1 %v1307_v31  ;;  %v7021_v43 = vld [vmem:[%s8777_s4 + $0xb00] sm:$0xff]   ;;  %v1311_v31 = vpack.c.bf16 %v1164_v39, %v1164_v39  ;;  %v7054_v39 = vld [vmem:[%s8777_s4 + $0xaa8] sm:$0xff]  }
 0x2ee   :  { %v6118_v53 = vpop.f32.mrb[108].mxu0  ;;  %6420 = vmatprep.subr.bf16.mxu0 %v6990_v46  ;;  %6478 = vmatprep.subr.bf16.mxu1 %v6991_v50  ;;  %v7022_v46 = vld [vmem:[%s8777_s4 + $0x9e8] sm:$0xff]  }
 0x2ef   :  { %v6119_v3 = vpop.f32.mrb[109].mxu0  ;;  %v7023_v50 = vld [vmem:[%s8777_s4 + $0xb48] sm:$0xff]  }
 0x2f0   :  { %v6120_v41 = vadd.f32 %v6119_v3, %v6118_v53  ;;  %v6121_v20 = vpop.f32.mrb[110].mxu0  ;;  %6421 = vmatpush3.bf16.msra.mxu0 %v6992_v45  ;;  %v7024_v45 = vld [vmem:[%s8777_s4 + $0x9a8] sm:$0xff]  }
 0x2f1   :  { %6479 = vmatpush3.bf16.msra.mxu1 %v6993_v51  ;;  %v6122_v56 = vpop.f32.mrb[111].mxu0  ;;  %6422 = vmatprep.subr.bf16.mxu0 %v6994_v25  ;;  %v7025_v51 = vld [vmem:[%s8777_s4 + $0xb08] sm:$0xff]   ;;  %v7026_v25 = vld [vmem:[%s8777_s4 + $0x9f0] sm:$0xff]  }
 0x2f2   :  { %v4613_v36 = vadd.f32 %v6120_v41, %v8342_v0  ;;  %6480 = vmatprep.subr.bf16.mxu1 %v6995_v54  ;;  %v7002_v0 = vld [vmem:[%s8777_s4 + $0x9c0] sm:$0xff]   ;;  %v7027_v54 = vld [vmem:[%s8777_s4 + $0xb50] sm:$0xff]  }
 0x2f4   :  { %6423 = vmatpush3.bf16.msra.mxu0 %v6996_v57  ;;  %v8449_v7 = vadd.f32 %v6142_v22, %v4613_v36  ;;  %v7028_v57 = vld [vmem:[%s8777_s4 + $0x9b0] sm:$0xff]  }
 0x2f5   :  { %6481 = vmatpush3.bf16.msra.mxu1 %v6997_v61  ;;  %6424 = vmatprep.subr.bf16.mxu0 %v6998_v58  ;;  %v7029_v61 = vld [vmem:[%s8777_s4 + $0xb10] sm:$0xff]   ;;  %v7030_v58 = vld [vmem:[%s8777_s4 + $0x9f8] sm:$0xff]  }
 0x2f6   :  { %6482 = vmatprep.subr.bf16.mxu1 %v6999_v32  ;;  %v7032_v32 = vld [vmem:[%s8777_s4 + $0x9b8] sm:$0xff]  }
 0x2f8   :  { %6425 = vmatpush3.bf16.msra.mxu0 %v7000_v6 }
 0x2f9   :  { %6483 = vmatpush3.bf16.msra.mxu1 %v7001_v9  ;;  %6454 = vmatprep.subr.bf16.mxu0 %v7002_v0  ;;  %v7035_v9 = vld [vmem:[%s8777_s4 + $0xb60] sm:$0xff]  }
 0x2fa   :  { %6484 = vmatprep.subr.bf16.mxu1 %v7003_v10  ;;  %v7036_v0 = vld [vmem:[%s8777_s4 + $0xa80] sm:$0xff]  }
 0x2fb   :  { %5171 = vmatmul.mubr.bf16.vlgmr.msra.gmra.mrb[136].mxu0 %v1300_v12  ;;  %v7037_v10 = vld [vmem:[%s8777_s4 + $0xb20] sm:$0xff]  }
 0x2fc   :  { %6455 = vmatpush3.bf16.msra.mxu0 %v7004_v47  ;;  %5250 = vmatprep.mubr.bf16.mxu0 %v1305_v16  ;;  %v7038_v47 = vld [vmem:[%s8777_s4 + $0xac8] sm:$0xff]  }
 0x2fd   :  { %6485 = vmatpush3.bf16.msra.mxu1 %v7005_v13  ;;  %6456 = vmatprep.subr.bf16.mxu0 %v7006_v29  ;;  %v7039_v13 = vld [vmem:[%s8777_s4 + $0xb68] sm:$0xff]  }
 0x2fe   :  { %6486 = vmatprep.subr.bf16.mxu1 %v7007_v42  ;;  %v6184_v21 = vpop.f32.mrb[108].mxu1  ;;  %v7040_v29 = vld [vmem:[%s8777_s4 + $0xa88] sm:$0xff]   ;;  %v7042_v42 = vld [vmem:[%s8777_s4 + $0xad0] sm:$0xff]  }
 0x2ff   :  { %v6185_v22 = vpop.f32.mrb[109].mxu1  ;;  %v7041_v16 = vld [vmem:[%s8777_s4 + $0xb28] sm:$0xff]  }
 0x300   :  { %6457 = vmatpush3.bf16.msra.mxu0 %v7008_v17  ;;  %v6186_v14 = vadd.f32 %v6185_v22, %v6184_v21  ;;  %v6187_v27 = vpop.f32.mrb[110].mxu1  ;;  %v7044_v22 = vld [vmem:[%s8777_s4 + $0xa90] sm:$0xff]  }
 0x301   :  { %6487 = vmatpush3.bf16.msra.mxu1 %v7009_v63  ;;  %6458 = vmatprep.subr.bf16.mxu0 %v7010_v18  ;;  %v6188_v62 = vpop.f32.mrb[111].mxu1  ;;  %v7043_v63 = vld [vmem:[%s8777_s4 + $0xb70] sm:$0xff]   ;;  %v7046_v27 = vld [vmem:[%s8777_s4 + $0xad8] sm:$0xff]  }
 0x302   :  { %6488 = vmatprep.subr.bf16.mxu1 %v7011_v19  ;;  %v7047_v62 = vld [vmem:[%s8777_s4 + $0xb78] sm:$0xff]  }
 0x304   :  { %6459 = vmatpush3.bf16.msra.mxu0 %v7012_v24 }
 0x305   :  { %6489 = vmatpush3.bf16.msra.mxu1 %v7013_v52  ;;  %6460 = vmatprep.subr.bf16.mxu0 %v7014_v28  ;;  %v8603_v52 = vld [vmem:[%s8778_s3] ss:$0 sm:$0xff] }
 0x306   :  { %6490 = vmatprep.subr.bf16.mxu1 %v7015_v34  ;;  %v1098_v28 = vadd.f32 %v8603_v52, %v8056_v55  ;;  %v7049_v34 = vld [vmem:[%s8777_s4 + $0xb38] sm:$0xff]   ;;  %v7050_v55 = vld [vmem:[%s8777_s4 + $0xae0] sm:$0xff]  }
 0x308   :  { %6461 = vmatpush3.bf16.msra.mxu0 %v7016_v48  ;;  %v1163_v35 = vmax.f32 %v1098_v28, 0.0  ;;  %v7051_v48 = vld [vmem:[%s8777_s4 + $0xaa0] sm:$0xff]   ;;  %v1106_v28 = vadd.f32 %v8603_v52, %v8085_v15 }
 0x309   :  { %6491 = vmatpush3.bf16.msra.mxu1 %v7017_v37  ;;  %6462 = vmatprep.subr.bf16.mxu0 %v7018_v30  ;;  %v7052_v37 = vld [vmem:[%s8777_s4 + $0xc00] sm:$0xff]   ;;  %v7053_v30 = vld [vmem:[%s8777_s4 + $0xae8] sm:$0xff]  }
 0x30a   :  { %6520 = vmatprep.subr.bf16.mxu1 %v7019_v5  ;;  %v1310_v23 = vpack.c.bf16 %v1163_v35, %v1163_v35  ;;  %v7093_v5 = vmov 0.0  }
 0x30c   :  { %5291 = vmatmul.mubr.bf16.vlgmr.msra.gmra.mrb[136].mxu1 %v1306_v44  ;;  %6463 = vmatpush3.bf16.msra.mxu0 %v7020_v40  ;;  %v7055_v40 = vld [vmem:[%s8777_s4 + $0xc08] sm:$0xff]  }
 0x30d   :  { %6521 = vmatpush3.bf16.msra.mxu1 %v7021_v43  ;;  %5370 = vmatprep.mubr.bf16.mxu1 %v1311_v31  ;;  %v7056_v43 = vld [vmem:[%s8777_s4 + $0xaf0] sm:$0xff]  }
 0x30e   :  { %v6162_v53 = vpop.f32.mrb[112].mxu0  ;;  %6464 = vmatprep.subr.bf16.mxu0 %v7022_v46  ;;  %6522 = vmatprep.subr.bf16.mxu1 %v7023_v50 }
 0x30f   :  { %v6163_v3 = vpop.f32.mrb[113].mxu0 }
 0x310   :  { %v6164_v41 = vadd.f32 %v6163_v3, %v6162_v53  ;;  %v6165_v20 = vpop.f32.mrb[114].mxu0  ;;  %6465 = vmatpush3.bf16.msra.mxu0 %v7024_v45  ;;  %v7057_v45 = vld [vmem:[%s8777_s4 + $0xab0] sm:$0xff]   ;;  %v1109_v3 = vadd.f32 %v8603_v52, %v8093_v26  ;;  %v7062_v26 = vld [vmem:[%s8777_s4 + $0xbc0] sm:$0xff]  }
 0x311   :  { %6523 = vmatpush3.bf16.msra.mxu1 %v7025_v51  ;;  %v6166_v56 = vpop.f32.mrb[115].mxu0  ;;  %6466 = vmatprep.subr.bf16.mxu0 %v7026_v25  ;;  %v1090_v51 = vadd.f32 %v8603_v52, %v8028_v11  ;;  %v7058_v53 = vld [vmem:[%s8777_s4 + $0xc10] sm:$0xff]   ;;  %v7060_v11 = vld [vmem:[%s8777_s4 + $0xab8] sm:$0xff]  }
 0x312   :  { %v4693_v36 = vadd.f32 %v6164_v41, %v8449_v7  ;;  %6524 = vmatprep.subr.bf16.mxu1 %v7027_v54  ;;  %v1162_v7 = vmax.f32 %v1093_v2, 0.0  ;;  %v7059_v54 = vld [vmem:[%s8777_s4 + $0xaf8] sm:$0xff]   ;;  %v1166_v56 = vmax.f32 %v1109_v3, 0.0  ;;  %v7064_v2 = vld [vmem:[%s8777_s4 + $0xc20] sm:$0xff]  }
 0x314   :  { %6467 = vmatpush3.bf16.msra.mxu0 %v7028_v57  ;;  %v8556_v6 = vadd.f32 %v6186_v14, %v4693_v36  ;;  %v1309_v12 = vpack.c.bf16 %v1162_v7, %v1162_v7  ;;  %v7045_v14 = vld [vmem:[%s8777_s4 + $0xb30] sm:$0xff]   ;;  %v1161_v57 = vmax.f32 %v1090_v51, 0.0  ;;  %v7065_v36 = vld [vmem:[%s8777_s4 + $0xbc8] sm:$0xff]  }
 0x315   :  { %6525 = vmatpush3.bf16.msra.mxu1 %v7029_v61  ;;  %6468 = vmatprep.subr.bf16.mxu0 %v7030_v58  ;;  %v7063_v61 = vld [vmem:[%s8777_s4 + $0xb80] sm:$0xff]   ;;  %v7069_v7 = vld [vmem:[%s8777_s4 + $0xb90] sm:$0xff]  }
 0x316   :  { %6526 = vmatprep.subr.bf16.mxu1 %v7031_v4  ;;  %v1308_v58 = vpack.c.bf16 %v1161_v57, %v1161_v57  ;;  %v1313_v4 = vpack.c.bf16 %v1166_v56, %v1166_v56  ;;  %v7082_v56 = vld [vmem:[%s8780_s6] sm:$0xff]  }
 0x318   :  { %6469 = vmatpush3.bf16.msra.mxu0 %v7032_v32  ;;  %v7066_v32 = vld [vmem:[%s8777_s4 + $0xb88] sm:$0xff]  }
 0x319   :  { %6527 = vmatpush3.bf16.msra.mxu1 %v7033_v59  ;;  %6498 = vmatprep.subr.bf16.mxu0 %v7034_v49 }
 0x31a   :  { %6528 = vmatprep.subr.bf16.mxu1 %v7035_v9 }
 0x31b   :  { %5251 = vmatmul.mubr.bf16.vlgmr.msra.gmra.mrb[140].mxu0 %v1304_v8  ;;  %v7070_v8 = vld [vmem:[%s8777_s4 + $0xc30] sm:$0xff]  }
 0x31c   :  { %6499 = vmatpush3.bf16.msra.mxu0 %v7036_v0  ;;  %5330 = vmatprep.mubr.bf16.mxu0 %v1309_v12 }
 0x31d   :  { %6529 = vmatpush3.bf16.msra.mxu1 %v7037_v10  ;;  %6500 = vmatprep.subr.bf16.mxu0 %v7038_v47  ;;  %v7071_v10 = vld [vmem:[%s8777_s4 + $0xbd8] sm:$0xff]   ;;  %v1114_v47 = vadd.f32 %v8603_v52, %v8118_v38  ;;  %v7075_v38 = vld [vmem:[%s8777_s4 + $0xba0] sm:$0xff]  }
 0x31e   :  { %v6228_v17 = vpop.f32.mrb[112].mxu1  ;;  %6530 = vmatprep.subr.bf16.mxu1 %v7039_v13  ;;  %v7072_v13 = vld [vmem:[%s8777_s4 + $0xb98] sm:$0xff]  }
 0x31f   :  { %v6229_v18 = vpop.f32.mrb[113].mxu1 }
 0x320   :  { %v6230_v19 = vadd.f32 %v6229_v18, %v6228_v17  ;;  %6501 = vmatpush3.bf16.msra.mxu0 %v7040_v29  ;;  %v6231_v21 = vpop.f32.mrb[114].mxu1  ;;  %v7073_v29 = vld [vmem:[%s8777_s4 + $0xc38] sm:$0xff]   ;;  %v7076_v17 = vld [vmem:[%s8777_s4 + $0xbe8] sm:$0xff]  }
 0x321   :  { %6531 = vmatpush3.bf16.msra.mxu1 %v7041_v16  ;;  %v6232_v24 = vpop.f32.mrb[115].mxu1  ;;  %6502 = vmatprep.subr.bf16.mxu0 %v7042_v42  ;;  %v7074_v16 = vld [vmem:[%s8777_s4 + $0xbe0] sm:$0xff]   ;;  %v1167_v42 = vmax.f32 %v1114_v47, 0.0  ;;  %v7077_v18 = vld [vmem:[%s8777_s4 + $0xba8] sm:$0xff]  }
 0x322   :  { %6532 = vmatprep.subr.bf16.mxu1 %v7043_v63 }
 0x323   :  { %v1314_v63 = vpack.c.bf16 %v1167_v42, %v1167_v42 }
 0x324   :  { %6503 = vmatpush3.bf16.msra.mxu0 %v7044_v22 }
 0x325   :  { %6533 = vmatpush3.bf16.msra.mxu1 %v7045_v14  ;;  %6504 = vmatprep.subr.bf16.mxu0 %v7046_v27  ;;  %v7079_v27 = vld [vmem:[%s8777_s4 + $0xbb0] sm:$0xff]  }
 0x326   :  { %6534 = vmatprep.subr.bf16.mxu1 %v7047_v62 }
 0x328   :  { %6505 = vmatpush3.bf16.msra.mxu0 %v7048_v33  ;;  %v7080_v33 = vld [vmem:[%s8777_s4 + $0xbf8] sm:$0xff]  }
 0x329   :  { %6535 = vmatpush3.bf16.msra.mxu1 %v7049_v34  ;;  %6506 = vmatprep.subr.bf16.mxu0 %v7050_v55  ;;  %v7081_v55 = vld [vmem:[%s8777_s4 + $0xbb8] sm:$0xff]  }
 0x32a   :  { %6582 = vmatprep.subr.bf16.mxu1 %v7093_v5 }
 0x32c   :  { %5371 = vmatmul.mubr.bf16.vlgmr.msra.gmra.mrb[140].mxu1 %v1310_v23  ;;  %6507 = vmatpush3.bf16.msra.mxu0 %v7051_v48  ;;  %v1165_v48 = vmax.f32 %v1106_v28, 0.0 }
 0x32d   :  { %6583 = vmatpush3.bf16.msra.mxu1 %v7052_v37  ;;  %6508 = vmatprep.subr.bf16.mxu0 %v7053_v30 }
 0x32e   :  { %v6206_v44 = vpop.f32.mrb[116].mxu0  ;;  %6584 = vmatprep.subr.bf16.mxu1 %v7093_v5  ;;  %6598 = vmatprep.mubr.msk.bf16.mxu1 %vm7094_vm0, %v7093_v5  ;;  %v1312_v37 = vpack.c.bf16 %v1165_v48, %v1165_v48 }
 0x32f   :  { %v6207_v46 = vpop.f32.mrb[117].mxu0 }
 0x330   :  { %v6208_v50 = vadd.f32 %v6207_v46, %v6206_v44  ;;  %v6209_v31 = vpop.f32.mrb[118].mxu0  ;;  %6509 = vmatpush3.bf16.msra.mxu0 %v7054_v39 }
 0x331   :  { %6585 = vmatpush3.bf16.msra.mxu1 %v7055_v40  ;;  %v6210_v25 = vpop.f32.mrb[119].mxu0  ;;  %6510 = vmatprep.subr.bf16.mxu0 %v7056_v43 }
 0x332   :  { %v4773_v41 = vadd.f32 %v6208_v50, %v8556_v6  ;;  %6586 = vmatprep.subr.bf16.mxu1 %v7093_v5  ;;  %v7067_v6 = vld [vmem:[%s8777_s4 + $0xc28] sm:$0xff]  }
 0x334   :  { %6511 = vmatpush3.bf16.msra.mxu0 %v7057_v45  ;;  %v8659_v20 = vadd.f32 %v6230_v19, %v4773_v41  ;;  %v7078_v19 = vld [vmem:[%s8777_s4 + $0xbf0] sm:$0xff]  }
 0x335   :  { %6587 = vmatpush3.bf16.msra.mxu1 %v7058_v53  ;;  %6512 = vmatprep.subr.bf16.mxu0 %v7059_v54 }
 0x336   :  { %6588 = vmatprep.subr.bf16.mxu1 %v7093_v5 }
 0x338   :  { %6513 = vmatpush3.bf16.msra.mxu0 %v7060_v11 }
 0x339   :  { %6589 = vmatpush3.bf16.msra.mxu1 %v7061_v60  ;;  %6542 = vmatprep.subr.bf16.mxu0 %v7062_v26 }
 0x33a   :  { %6590 = vmatprep.subr.bf16.mxu1 %v7093_v5 }
 0x33b   :  { %5331 = vmatmul.mubr.bf16.vlgmr.msra.gmra.mrb[144].mxu0 %v1308_v58  ;;  %v7083_v58 = vld [vmem:[%s8780_s6 + $0x8] sm:$0xff]  }
 0x33c   :  { %6543 = vmatpush3.bf16.msra.mxu0 %v7063_v61  ;;  %5410 = vmatprep.mubr.bf16.mxu0 %v1313_v4 }
 0x33d   :  { %6591 = vmatpush3.bf16.msra.mxu1 %v7064_v2  ;;  %6544 = vmatprep.subr.bf16.mxu0 %v7065_v36 }
 0x33e   :  { %6592 = vmatprep.subr.bf16.mxu1 %v7093_v5 }
 0x33f   :  { %v6272_v59 = vpop.f32.mrb[116].mxu1 }
 0x340   :  { %v6273_v49 = vpop.f32.mrb[117].mxu1  ;;  %6545 = vmatpush3.bf16.msra.mxu0 %v7066_v32 }
 0x341   :  { %v6274_v9 = vadd.f32 %v6273_v49, %v6272_v59  ;;  %v6275_v0 = vpop.f32.mrb[118].mxu1  ;;  %6593 = vmatpush3.bf16.msra.mxu1 %v7067_v6  ;;  %6546 = vmatprep.subr.bf16.mxu0 %v7068_v1  ;;  %v7084_v1 = vld [vmem:[%s8780_s6 + $0x10] sm:$0xff]   ;;  %v7085_v59 = vld [vmem:[%s8780_s6 + $0x18] sm:$0xff]   ;;  %v7086_v49 = vld [vmem:[%s8780_s6 + $0x20] sm:$0xff]  }
 0x342   :  { %v6276_v12 = vpop.f32.mrb[119].mxu1  ;;  %6594 = vmatprep.subr.bf16.mxu1 %v7093_v5 }
 0x344   :  { %6547 = vmatpush3.bf16.msra.mxu0 %v7069_v7 }
 0x345   :  { %6595 = vmatpush3.bf16.msra.mxu1 %v7070_v8  ;;  %6548 = vmatprep.subr.bf16.mxu0 %v7071_v10 }
 0x346   :  { %6596 = vmatprep.subr.bf16.mxu1 %v7093_v5 }
 0x348   :  { %6549 = vmatpush3.bf16.msra.mxu0 %v7072_v13  ;;  %v7088_v13 = vld [vmem:[%s8780_s6 + $0x30] sm:$0xff]  }
 0x349   :  { %6597 = vmatpush3.bf16.msra.mxu1 %v7073_v29  ;;  %6550 = vmatprep.subr.bf16.mxu0 %v7074_v16  ;;  %v7089_v16 = vld [vmem:[%s8780_s6 + $0x38] sm:$0xff]  }
 0x34c   :  { %6599 = vmatmul.mubr.bf16.vlgmr.msra.gmra.mrb[144].mxu1 %v1314_v63  ;;  %6551 = vmatpush3.bf16.msra.mxu0 %v7075_v38 }
 0x34d   :  { %6552 = vmatprep.subr.bf16.mxu0 %v7076_v17 }
 0x34e   :  { %v6250_v21 = vpop.f32.mrb[120].mxu0 }
 0x34f   :  { %v6251_v22 = vpop.f32.mrb[121].mxu0 }
 0x350   :  { %v6252_v24 = vadd.f32 %v6251_v22, %v6250_v21  ;;  %v6253_v14 = vpop.f32.mrb[122].mxu0  ;;  %6553 = vmatpush3.bf16.msra.mxu0 %v7077_v18 }
 0x351   :  { %v6254_v62 = vpop.f32.mrb[123].mxu0  ;;  %6554 = vmatprep.subr.bf16.mxu0 %v7078_v19 }
 0x352   :  { %v4853_v34 = vadd.f32 %v6252_v24, %v8659_v20 }
 0x354   :  { %6555 = vmatpush3.bf16.msra.mxu0 %v7079_v27  ;;  %v4893_v35 = vadd.f32 %v6274_v9, %v4853_v34  ;;  %v7087_v9 = vld [vmem:[%s8780_s6 + $0x28] sm:$0xff]  }
 0x355   :  { %6556 = vmatprep.subr.bf16.mxu0 %v7080_v33 }
 0x358   :  { %6557 = vmatpush3.bf16.msra.mxu0 %v7081_v55 }
 0x359   :  { %6602 = vmatprep.subr.bf16.mxu0 %v7093_v5 }
 0x35b   :  { %5411 = vmatmul.mubr.bf16.vlgmr.msra.gmra.mrb[148].mxu0 %v1312_v37 }
 0x35c   :  { %6618 = vmatprep.mubr.msk.bf16.mxu0 %vm7094_vm0, %v7093_v5  ;;  %6603 = vmatpush3.bf16.msra.mxu0 %v7082_v56 }
 0x35d   :  { %6604 = vmatprep.subr.bf16.mxu0 %v7093_v5 }
 0x35f   :  { %v6316_v15 = vpop.f32.mrb[120].mxu1 }
 0x360   :  { %v6317_v52 = vpop.f32.mrb[121].mxu1  ;;  %6605 = vmatpush3.bf16.msra.mxu0 %v7083_v58 }
 0x361   :  { %v6318_v30 = vadd.f32 %v6317_v52, %v6316_v15  ;;  %v6319_v23 = vpop.f32.mrb[122].mxu1  ;;  %6606 = vmatprep.subr.bf16.mxu0 %v7093_v5 }
 0x362   :  { %v6320_v39 = vpop.f32.mrb[123].mxu1 }
 0x364   :  { %6607 = vmatpush3.bf16.msra.mxu0 %v7084_v1 }
 0x365   :  { %6608 = vmatprep.subr.bf16.mxu0 %v7093_v5 }
 0x368   :  { %6609 = vmatpush3.bf16.msra.mxu0 %v7085_v59 }
 0x369   :  { %6610 = vmatprep.subr.bf16.mxu0 %v7093_v5 }
 0x36c   :  { %6611 = vmatpush3.bf16.msra.mxu0 %v7086_v49 }
 0x36d   :  { %6612 = vmatprep.subr.bf16.mxu0 %v7093_v5 }
 0x36e   :  { %v6294_v40 = vpop.f32.mrb[124].mxu0 }
 0x36f   :  { %v6295_v43 = vpop.f32.mrb[125].mxu0 }
 0x370   :  { %v6296_v44 = vadd.f32 %v6295_v43, %v6294_v40  ;;  %v6297_v46 = vpop.f32.mrb[126].mxu0  ;;  %6613 = vmatpush3.bf16.msra.mxu0 %v7087_v9 }
 0x371   :  { %v6298_v50 = vpop.f32.mrb[127].mxu0  ;;  %6614 = vmatprep.subr.bf16.mxu0 %v7093_v5 }
 0x372   :  { %v4933_v31 = vadd.f32 %v6296_v44, %v4893_v35 }
 0x374   :  { %v4973_v45 = vadd.f32 %v6318_v30, %v4933_v31  ;;  %6615 = vmatpush3.bf16.msra.mxu0 %v7088_v13 }
 0x375   :  { %6616 = vmatprep.subr.bf16.mxu0 %v7093_v5 }
 0x378   :  { %6617 = vmatpush3.bf16.msra.mxu0 %v7089_v16 }
 0x37f   :  { %v6360_v51 = vpop.f32.mrb[124].mxu1 }
 0x380   :  { %v6361_v25 = vpop.f32.mrb[125].mxu1 }
 0x381   :  { %v6362_v53 = vadd.f32 %v6361_v25, %v6360_v51  ;;  %v6363_v54 = vpop.f32.mrb[126].mxu1 }
 0x382   :  { %v6364_v3 = vpop.f32.mrb[127].mxu1 }
 0x38e   :  { %v6338_v41 = vpop.f32.mrb[128].mxu0 }
 0x38f   :  { %v6339_v11 = vpop.f32.mrb[129].mxu0 }
 0x390   :  { %v6340_v20 = vadd.f32 %v6339_v11, %v6338_v41  ;;  %v6341_v57 = vpop.f32.mrb[130].mxu0 }
 0x391   :  { %v6342_v60 = vpop.f32.mrb[131].mxu0 }
 0x392   :  { %v5013_v26 = vadd.f32 %v6340_v20, %v4973_v45 }
 0x394   :  { %v5053_v61 = vadd.f32 %v6362_v53, %v5013_v26 }
 0x39f   :  { %v6404_v2 = vpop.f32.mrb[128].mxu1 }
 0x3a0   :  { %v6405_v36 = vpop.f32.mrb[129].mxu1 }
 0x3a1   :  { %v6406_v4 = vadd.f32 %v6405_v36, %v6404_v2  ;;  %v6407_v32 = vpop.f32.mrb[130].mxu1 }
 0x3a2   :  { %v6408_v6 = vpop.f32.mrb[131].mxu1  ;;  %v6027_v32 = vld [vmem:[%s8781_s7] ss:$0 sm:$0xff] }
 0x3ae   :  { %v6382_v7 = vpop.f32.mrb[132].mxu0 }
 0x3af   :  { %v6383_v0 = vpop.f32.mrb[133].mxu0 }
 0x3b0   :  { %v6384_v8 = vadd.f32 %v6383_v0, %v6382_v7  ;;  %v6385_v10 = vpop.f32.mrb[134].mxu0 }
 0x3b1   :  { %v6386_v47 = vpop.f32.mrb[135].mxu0 }
 0x3b2   :  { %v5093_v12 = vadd.f32 %v6384_v8, %v5053_v61 }
 0x3b4   :  { %v5133_v29 = vadd.f32 %v6406_v4, %v5093_v12 }
 0x3bf   :  { %v6448_v42 = vpop.f32.mrb[132].mxu1 }
 0x3c0   :  { %v6449_v38 = vpop.f32.mrb[133].mxu1 }
 0x3c1   :  { %v6450_v17 = vadd.f32 %v6449_v38, %v6448_v42  ;;  %v6451_v63 = vpop.f32.mrb[134].mxu1 }
 0x3c2   :  { %v6452_v18 = vpop.f32.mrb[135].mxu1 }
 0x3ce   :  { %v6426_v19 = vpop.f32.mrb[136].mxu0 }
 0x3cf   :  { %v6427_v21 = vpop.f32.mrb[137].mxu0 }
 0x3d0   :  { %v6428_v22 = vadd.f32 %v6427_v21, %v6426_v19  ;;  %v6429_v24 = vpop.f32.mrb[138].mxu0 }
 0x3d1   :  { %v6430_v14 = vpop.f32.mrb[139].mxu0 }
 0x3d2   :  { %v5173_v27 = vadd.f32 %v6428_v22, %v5133_v29 }
 0x3d4   :  { %v5213_v28 = vadd.f32 %v6450_v17, %v5173_v27 }
 0x3df   :  { %v6492_v62 = vpop.f32.mrb[136].mxu1 }
 0x3e0   :  { %v6493_v33 = vpop.f32.mrb[137].mxu1 }
 0x3e1   :  { %v6494_v5 = vadd.f32 %v6493_v33, %v6492_v62  ;;  %v6495_v34 = vpop.f32.mrb[138].mxu1 }
 0x3e2   :  { %v6496_v55 = vpop.f32.mrb[139].mxu1 }
 0x3ee   :  { %v6470_v35 = vpop.f32.mrb[140].mxu0 }
 0x3ef   :  { %v6471_v48 = vpop.f32.mrb[141].mxu0 }
 0x3f0   :  { %v6472_v37 = vadd.f32 %v6471_v48, %v6470_v35  ;;  %v6473_v15 = vpop.f32.mrb[142].mxu0 }
 0x3f1   :  { %v6474_v52 = vpop.f32.mrb[143].mxu0 }
 0x3f2   :  { %v5253_v30 = vadd.f32 %v6472_v37, %v5213_v28 }
 0x3f4   :  { %v5293_v23 = vadd.f32 %v6494_v5, %v5253_v30 }
 0x3ff   :  { %v6536_v39 = vpop.f32.mrb[140].mxu1 }
 0x400   :  { %v6537_v40 = vpop.f32.mrb[141].mxu1 }
 0x401   :  { %v6538_v43 = vadd.f32 %v6537_v40, %v6536_v39  ;;  %v6539_v44 = vpop.f32.mrb[142].mxu1 }
 0x402   :  { %v6540_v46 = vpop.f32.mrb[143].mxu1 }
 0x40e   :  { %v6514_v50 = vpop.f32.mrb[144].mxu0 }
 0x40f   :  { %v6515_v31 = vpop.f32.mrb[145].mxu0 }
 0x410   :  { %v6516_v45 = vadd.f32 %v6515_v31, %v6514_v50  ;;  %v6517_v51 = vpop.f32.mrb[146].mxu0 }
 0x411   :  { %v6518_v25 = vpop.f32.mrb[147].mxu0 }
 0x412   :  { %v5333_v53 = vadd.f32 %v6516_v45, %v5293_v23 }
 0x414   :  { %v5373_v54 = vadd.f32 %v6538_v43, %v5333_v53 }
 0x41f   :  { %v5452_v3 = vpop.f32.mrb[144].mxu1 }
 0x420   :  { %v6600_v41 = vpop.f32.mrb[145].mxu1 }
 0x421   :  { %v5455_v11 = vpop.f32.mrb[146].mxu1 }
 0x422   :  { %v6601_v20 = vpop.f32.mrb[147].mxu1 }
 0x42e   :  { %v6558_v57 = vpop.f32.mrb[148].mxu0 }
 0x42f   :  { %v6559_v60 = vpop.f32.mrb[149].mxu0 }
 0x430   :  { %v6560_v26 = vadd.f32 %v6559_v60, %v6558_v57  ;;  %v6561_v56 = vpop.f32.mrb[150].mxu0 }
 0x431   :  { %v6562_v61 = vpop.f32.mrb[151].mxu0 }
 0x432   :  { %v5413_v58 = vadd.f32 %v6560_v26, %v5373_v54 }
 0x434   :  { %v5453_v2 = vadd.f32 %v5452_v3, %v5413_v58 }
 0x436   :  { %v5458_v36 = vmax.f32 %v5453_v2, 0.0 }
 0x438   :  { %v5459_v4 = vpack.c.bf16 %v5458_v36, %v5458_v36 }
 0x43a   :  { %6619 = vmatmul.mubr.bf16.vlgmr.msra.gmra.mrb[152].mxu0 %v5459_v4 }
 0x50d   :  { %v5565_v6 = vpop.f32.mrb[152].mxu0 }
 0x50e   :  { %v5566_v1 = vadd.f32 %v6027_v32, %v5565_v6  ;;  %v6620_v59 = vpop.f32.mrb[153].mxu0 }
 0x50f   :  { %v5568_v49 = vpop.f32.mrb[154].mxu0 }
 0x510   :  { %5571 = vst [vmem:[%s8782_s8] sm:$0xff] %v5566_v1  ;;  %v6621_v7 = vpop.f32.mrb[155].mxu0 }

</bundles_post_ra>
